<compile_context>
chip_gen: v7x
topology: tpu7x:2x2x1
jax: 0.10.0
libtpu: 0.0.40
codegen_flags: <defaults>
</compile_context>

<pallas_src>
import math
from functools import partial

import jax
import jax.numpy as jnp
import numpy as np
from jax import lax
from jax.experimental import pallas as pl
from jax.experimental.pallas import tpu as pltpu

INPUT_SIZE = 1030    # 6 pose dims + 1024 global features
FEAT_SIZE = 1024
POSE_SIZE = 6
HIDDEN_DIM = 12
N_LAYERS = 2
OUTPUT_SIZE = 6

LANE = 128
GATES = 4
GPAD = GATES * LANE  # 512: gate-ALIGNED width (each gate 128-lane aligned)


def _sigmoid(x):
    # sigmoid(x) == 0.5 * tanh(0.5 * x) + 0.5 : one EUP tanh + a VPU FMA,
    # no full-precision divide on the serial per-timestep chain.
    return 0.5 * jnp.tanh(0.5 * x) + 0.5


def lstm_kernel(feats_ref, pose_ref, wp_ref, wf_ref, b0_ref,
                whh0_ref, wih1_ref, whh1_ref, b1_ref, fcw_ref, fcb_ref,
                out_ref,
                xw_ref, hseq_ref, h1_ref, c1_ref, h2_ref, c2_ref,
                *, unroll):
    tile = pl.program_id(0)
    TT = feats_ref.shape[0]
    H = HIDDEN_DIM

    # Zero-init recurrent state at the first tile only (state persists in
    # scratch across grid steps -> sequential "arbitrary" grid axis).
    @pl.when(tile == 0)
    def _():
        h1_ref[...] = jnp.zeros_like(h1_ref)
        c1_ref[...] = jnp.zeros_like(c1_ref)
        h2_ref[...] = jnp.zeros_like(h2_ref)
        c2_ref[...] = jnp.zeros_like(c2_ref)

    # --- batched layer-0 input projection (MXU), gate-PACKED bf16 operands ---
    xw_pack = (
        jnp.dot(feats_ref[...], wf_ref[...], preferred_element_type=jnp.float32)
        + jnp.dot(pose_ref[...], wp_ref[...], preferred_element_type=jnp.float32)
        + b0_ref[...])                                           # (TT, 128) f32

    # One lane scatter per tile into the gate-ALIGNED (TT, 512) scratch so the
    # per-step gate slices below are free vreg picks (no XLU rotates on the
    # serial chain).  Pad columns of xw_ref are never read.
    for g in range(GATES):
        xw_ref[:, g * LANE:g * LANE + H] = xw_pack[:, g * H:(g + 1) * H]

    # Loop-invariant recurrent weights (tiny) hoisted out of the loop.
    whh0 = whh0_ref[...]     # (12, 512)
    wih1 = wih1_ref[...]     # (12, 512)
    whh1 = whh1_ref[...]     # (12, 512)
    b1 = b1_ref[...]         # (1, 512)

    def gates(pre):
        # 128-lane-aligned gate slices -> no lane rotates on the chain.
        i = _sigmoid(pre[:, 0 * LANE:0 * LANE + H])
        f = _sigmoid(pre[:, 1 * LANE:1 * LANE + H])
        g = jnp.tanh(pre[:, 2 * LANE:2 * LANE + H])
        o = _sigmoid(pre[:, 3 * LANE:3 * LANE + H])
        return i, f, g, o

    def step(t, carry):
        h1, c1, h2, c2, rec1b = carry
        xw_row = xw_ref[pl.ds(t, 1), :]                           # (1, 512)
        # layer 0
        pre0 = xw_row + jnp.dot(h1, whh0, preferred_element_type=jnp.float32)
        i0, f0, g0, o0 = gates(pre0)
        c1 = f0 * c1 + i0 * g0
        h1 = o0 * jnp.tanh(c1)
        # layer 1: the h2(t-1)-dependent term rec1b was precomputed last step,
        # so this only waits on the freshly produced h1.
        pre1 = jnp.dot(h1, wih1, preferred_element_type=jnp.float32) + rec1b
        i1, f1, g1, o1 = gates(pre1)
        c2 = f1 * c2 + i1 * g1
        h2 = o1 * jnp.tanh(c2)
        hseq_ref[pl.ds(t, 1), :] = h2
        # h2 recurrent dot for the NEXT step — off that step's critical chain.
        rec1b = jnp.dot(h2, whh1, preferred_element_type=jnp.float32) + b1
        return h1, c1, h2, c2, rec1b

    h2_0 = h2_ref[...]
    rec1b0 = jnp.dot(h2_0, whh1, preferred_element_type=jnp.float32) + b1
    carry = (h1_ref[...], c1_ref[...], h2_0, c2_ref[...], rec1b0)
    h1, c1, h2, c2, _ = lax.fori_loop(0, TT, step, carry, unroll=unroll)
    h1_ref[...] = h1
    c1_ref[...] = c1
    h2_ref[...] = h2
    c2_ref[...] = c2

    # fc: (TT, 12) x (12, 6) + bias, batched over the tile.
    out = jnp.dot(hseq_ref[...], fcw_ref[...],
                  preferred_element_type=jnp.float32) + fcb_ref[...]

    # corrected = pose;  corrected[2:] += out[2:]   (single masked pass)
    # TODO(synk): original PyTorch does `corrected[2:] += out`, a (T-2,6)+(T,6)
    # shape mismatch; we apply the row-aligned correction corrected[2:] += out[2:].
    row = tile * TT + lax.broadcasted_iota(jnp.int32, out.shape, 0)
    corr = pose_ref[...] + jnp.where(row >= 2, out, 0.0)

    # Single lane-contiguous output block: [correction | corrected pose].
    out_ref[...] = jnp.concatenate([out, corr], axis=-1)


# ----------------------------------------------------------------------------
# Parameter handling
# ----------------------------------------------------------------------------
def init_params(key, input_size=INPUT_SIZE, hidden_dim=HIDDEN_DIM,
                output_size=OUTPUT_SIZE):
    """Deterministic synthetic parameters with nn.LSTM / nn.Linear shapes."""
    H = hidden_dim
    ks = jax.random.split(key, 10)
    s = 1.0 / math.sqrt(H)

    def u(k, shape):
        return jax.random.uniform(k, shape, jnp.float32, -s, s)

    return {
        'w_ih_l0': u(ks[0], (4 * H, input_size)),
        'w_hh_l0': u(ks[1], (4 * H, H)),
        'b_ih_l0': u(ks[2], (4 * H,)),
        'b_hh_l0': u(ks[3], (4 * H,)),
        'w_ih_l1': u(ks[4], (4 * H, H)),
        'w_hh_l1': u(ks[5], (4 * H, H)),
        'b_ih_l1': u(ks[6], (4 * H,)),
        'b_hh_l1': u(ks[7], (4 * H,)),
        'fc_w': u(ks[8], (output_size, H)),
        'fc_b': u(ks[9], (output_size,)),
    }


def _scatter_gates(w, hidden_dim=HIDDEN_DIM):
    """(K, 4H) -> (K, 512): gate g moves to columns [g*128, g*128+H)."""
    w = np.asarray(w, np.float32)
    out = np.zeros((w.shape[0], GPAD), np.float32)
    for g in range(GATES):
        out[:, g * LANE:g * LANE + hidden_dim] = \
            w[:, g * hidden_dim:(g + 1) * hidden_dim]
    return out


def _pack_gates(w, hidden_dim=HIDDEN_DIM):
    """(K, 4H) -> (K, 128): gates contiguous in columns [0, 4H), zero pad."""
    w = np.asarray(w, np.float32)
    out = np.zeros((w.shape[0], LANE), np.float32)
    out[:, :GATES * hidden_dim] = w
    return out


def pack_params(raw):
    """Repack raw PyTorch-layout params into the kernel's layouts."""
    w_ih0_T = np.asarray(raw['w_ih_l0'], np.float32).T               # (1030, 48)
    b0 = np.asarray(raw['b_ih_l0']) + np.asarray(raw['b_hh_l0'])
    b1 = np.asarray(raw['b_ih_l1']) + np.asarray(raw['b_hh_l1'])
    return {
        # gate-PACKED operands of the big input projection (feature part bf16)
        'wp_pack': jnp.asarray(_pack_gates(w_ih0_T[:POSE_SIZE])),                  # (6, 128) f32
        'wf_pack': jnp.asarray(_pack_gates(w_ih0_T[POSE_SIZE:]), jnp.bfloat16),    # (1024, 128) bf16
        'b0_pack': jnp.asarray(_pack_gates(b0[None, :])),                          # (1, 128) f32
        # gate-ALIGNED recurrent weights (tiny, f32)
        'whh0_pad': jnp.asarray(_scatter_gates(np.asarray(raw['w_hh_l0']).T)),     # (12, 512)
        'wih1_pad': jnp.asarray(_scatter_gates(np.asarray(raw['w_ih_l1']).T)),     # (12, 512)
        'whh1_pad': jnp.asarray(_scatter_gates(np.asarray(raw['w_hh_l1']).T)),     # (12, 512)
        'b1_pad':   jnp.asarray(_scatter_gates(b1[None, :])),                      # (1, 512)
        'fcw': jnp.asarray(np.asarray(raw['fc_w']).T, dtype=jnp.float32),          # (12, 6)
        'fcb': jnp.asarray(np.asarray(raw['fc_b'])[None, :], dtype=jnp.float32),   # (1, 6)
    }


def _round_up(x, m):
    return ((x + m - 1) // m) * m


# ----------------------------------------------------------------------------
# Forward wrapper
# ----------------------------------------------------------------------------
def lstm_forward(trajectory_batch, params, tile_rows=256, unroll=8):
    pose = trajectory_batch['pose_vector_estimate_lf'].astype(jnp.float32)       # (T, 6)
    feats3 = trajectory_batch['normalized_global_features'].astype(jnp.float32)  # (T, 1024, 1)

    # Module also returns x = cat(pose.unsqueeze(1), feats.transpose(-2,-1)).
    x3 = jnp.concatenate([pose[:, None, :], jnp.swapaxes(feats3, -2, -1)],
                         axis=-1)                                                # (T, 1, 1030)

    feats = feats3[:, :, 0].astype(jnp.bfloat16)     # bf16 MXU operand / HBM stream
    T = pose.shape[0]
    H = HIDDEN_DIM

    # Tile the trajectory dimension.
    TT = tile_rows
    T_pad = _round_up(T, 8)
    if T_pad <= TT:
        TT = T_pad
    else:
        TT = _round_up(TT, 16)                       # bf16 sublane packing safety
        T_pad = _round_up(T, TT)
    n_tiles = T_pad // TT

    if T_pad != T:
        feats = jnp.pad(feats, ((0, T_pad - T), (0, 0)))
        pose_p = jnp.pad(pose, ((0, T_pad - T), (0, 0)))
    else:
        pose_p = pose

    const = lambda i: (0, 0)
    row_tile = lambda i: (i, 0)
    kernel = partial(lstm_kernel, unroll=unroll)

    combined = pl.pallas_call(
        kernel,
        out_shape=jax.ShapeDtypeStruct((T_pad, 2 * OUTPUT_SIZE), jnp.float32),
        grid_spec=pltpu.PrefetchScalarGridSpec(
            num_scalar_prefetch=0,
            grid=(n_tiles,),
            in_specs=[
                pl.BlockSpec((TT, FEAT_SIZE), row_tile),       # features tile (bf16)
                pl.BlockSpec((TT, POSE_SIZE), row_tile),       # pose tile (f32)
                pl.BlockSpec((POSE_SIZE, LANE), const),        # W_ih0 pose part, packed
                pl.BlockSpec((FEAT_SIZE, LANE), const),        # W_ih0 feat part, packed bf16
                pl.BlockSpec((1, LANE), const),                # b_ih0 + b_hh0, packed
                pl.BlockSpec((H, GPAD), const),                # W_hh0, gate-aligned
                pl.BlockSpec((H, GPAD), const),                # W_ih1, gate-aligned
                pl.BlockSpec((H, GPAD), const),                # W_hh1, gate-aligned
                pl.BlockSpec((1, GPAD), const),                # b_ih1 + b_hh1, gate-aligned
                pl.BlockSpec((H, OUTPUT_SIZE), const),         # fc weight
                pl.BlockSpec((1, OUTPUT_SIZE), const),         # fc bias
            ],
            out_specs=pl.BlockSpec((TT, 2 * OUTPUT_SIZE), row_tile),
            scratch_shapes=[
                pltpu.VMEM((TT, GPAD), jnp.float32),   # gate-aligned x @ W_ih0^T + b0
                pltpu.VMEM((TT, H), jnp.float32),      # layer-1 hidden sequence
                pltpu.VMEM((1, H), jnp.float32),       # h layer 0 (tile carry)
                pltpu.VMEM((1, H), jnp.float32),       # c layer 0
                pltpu.VMEM((1, H), jnp.float32),       # h layer 1
                pltpu.VMEM((1, H), jnp.float32),       # c layer 1
            ]),
        compiler_params=pltpu.CompilerParams(
            dimension_semantics=("arbitrary",),        # sequential recurrence across tiles
            vmem_limit_bytes=32 * 1024 * 1024),
    )(feats, pose_p, params['wp_pack'], params['wf_pack'], params['b0_pack'],
      params['whh0_pad'], params['wih1_pad'], params['whh1_pad'],
      params['b1_pad'], params['fcw'], params['fcb'])

    return {'lstm_correction': combined[:T, :OUTPUT_SIZE],
            'corrected_kalman_prediction_lf': combined[:T, OUTPUT_SIZE:],
            'input': x3}


# ----------------------------------------------------------------------------
# Float64 numpy reference (same forward semantics; mirrors the kernel's bf16
# rounding of the feature-projection operands, everything else f64).
# ----------------------------------------------------------------------------
def _bf16_round(a):
    return np.asarray(
        jnp.asarray(np.asarray(a, np.float32), jnp.bfloat16).astype(jnp.float32),
        np.float64)


def _reference_numpy(pose, feats, raw):
    H = HIDDEN_DIM
    p = {k: np.asarray(v, np.float64) for k, v in raw.items()}
    pose = np.asarray(pose, np.float64)
    feats = np.asarray(feats, np.float64)
    T = pose.shape[0]

    def sigmoid(z):
        return 1.0 / (1.0 + np.exp(-z))

    def cell(pre, c_prev):
        i = sigmoid(pre[:, 0 * H:1 * H])
        f = sigmoid(pre[:, 1 * H:2 * H])
        g = np.tanh(pre[:, 2 * H:3 * H])
        o = sigmoid(pre[:, 3 * H:4 * H])
        c = f * c_prev + i * g
        return o * np.tanh(c), c

    w_pose = p['w_ih_l0'][:, :POSE_SIZE].T                 # (6, 48)
    w_feat = _bf16_round(p['w_ih_l0'][:, POSE_SIZE:]).T    # (1024, 48), bf16-rounded
    feats_q = _bf16_round(feats)                           # (T, 1024),  bf16-rounded
    w_hh0 = p['w_hh_l0'].T
    w_ih1 = p['w_ih_l1'].T
    w_hh1 = p['w_hh_l1'].T
    b0 = p['b_ih_l0'] + p['b_hh_l0']
    b1 = p['b_ih_l1'] + p['b_hh_l1']

    h1 = np.zeros((1, H)); c1 = np.zeros((1, H))
    h2 = np.zeros((1, H)); c2 = np.zeros((1, H))
    hseq = np.zeros((T, H))
    xw = feats_q @ w_feat + pose @ w_pose + b0
    for t in range(T):
        h1, c1 = cell(xw[t:t + 1] + h1 @ w_hh0, c1)
        h2, c2 = cell(h1 @ w_ih1 + h2 @ w_hh1 + b1, c2)
        hseq[t] = h2[0]
    out = hseq @ p['fc_w'].T + p['fc_b']
    corr = pose.copy()
    corr[2:, :] = corr[2:, :] + out[2:, :]
    return out, corr


if __name__ == "__main__":
    key = jax.random.PRNGKey(0)
    kp, kf, kw = jax.random.split(key, 3)

    T = 8  # small trajectory length
    trajectory_batch = {
        'pose_vector_estimate_lf':
            jax.random.normal(kp, (T, OUTPUT_SIZE), dtype=jnp.float32),
        'normalized_global_features':
            jax.random.normal(kf, (T, FEAT_SIZE, 1), dtype=jnp.float32),
    }
    raw = init_params(kw)
    params = pack_params(raw)

    result = lstm_forward(trajectory_batch, params)
    jax.block_until_ready(result)

    ref_out, ref_corr = _reference_numpy(
        trajectory_batch['pose_vector_estimate_lf'],
        trajectory_batch['normalized_global_features'][:, :, 0], raw)
    assert result['input'].shape == (T, 1, INPUT_SIZE)
    assert np.allclose(np.asarray(result['lstm_correction']), ref_out,
                       rtol=1e-2, atol=1e-2)
    assert np.allclose(np.asarray(result['corrected_kalman_prediction_lf']),
                       ref_corr, rtol=1e-2, atol=1e-2)

    print("KERNEL_OK")
</pallas_src>

<mosaic_0001>
module attributes {stable_mosaic.version = 11 : i64} {
  func.func @lstm_kernel(%arg0: i32, %arg1: memref<8x1024xbf16, #tpu.memory_space<vmem>>, %arg2: memref<8x6xf32, #tpu.memory_space<vmem>>, %arg3: memref<6x128xf32, #tpu.memory_space<vmem>>, %arg4: memref<1024x128xbf16, #tpu.memory_space<vmem>>, %arg5: memref<1x128xf32, #tpu.memory_space<vmem>>, %arg6: memref<12x512xf32, #tpu.memory_space<vmem>>, %arg7: memref<12x512xf32, #tpu.memory_space<vmem>>, %arg8: memref<12x512xf32, #tpu.memory_space<vmem>>, %arg9: memref<1x512xf32, #tpu.memory_space<vmem>>, %arg10: memref<12x6xf32, #tpu.memory_space<vmem>>, %arg11: memref<1x6xf32, #tpu.memory_space<vmem>>, %arg12: memref<8x12xf32, #tpu.memory_space<vmem>>, %arg13: memref<8x512xf32, #tpu.memory_space<vmem>>, %arg14: memref<8x12xf32, #tpu.memory_space<vmem>>, %arg15: memref<1x12xf32, #tpu.memory_space<vmem>>, %arg16: memref<1x12xf32, #tpu.memory_space<vmem>>, %arg17: memref<1x12xf32, #tpu.memory_space<vmem>>, %arg18: memref<1x12xf32, #tpu.memory_space<vmem>>) attributes {dimension_semantics = [#tpu.dimension_semantics<arbitrary>], iteration_bounds = array<i64: 1>, scalar_prefetch = 0 : i64, scratch_operands = 6 : i64, tpu.core_type = #tpu.core_type<tc>, window_params = [{transform_indices = @transform_0, window_bounds = array<i64: 8, 1024>}, {transform_indices = @transform_1, window_bounds = array<i64: 8, 6>}, {pipeline_mode = #tpu.pipeline_mode<synchronous>, transform_indices = @transform_2, window_bounds = array<i64: 6, 128>}, {pipeline_mode = #tpu.pipeline_mode<synchronous>, transform_indices = @transform_3, window_bounds = array<i64: 1024, 128>}, {pipeline_mode = #tpu.pipeline_mode<synchronous>, transform_indices = @transform_4, window_bounds = array<i64: 1, 128>}, {pipeline_mode = #tpu.pipeline_mode<synchronous>, transform_indices = @transform_5, window_bounds = array<i64: 12, 512>}, {pipeline_mode = #tpu.pipeline_mode<synchronous>, transform_indices = @transform_6, window_bounds = array<i64: 12, 512>}, {pipeline_mode = #tpu.pipeline_mode<synchronous>, transform_indices = @transform_7, window_bounds = array<i64: 12, 512>}, {pipeline_mode = #tpu.pipeline_mode<synchronous>, transform_indices = @transform_8, window_bounds = array<i64: 1, 512>}, {pipeline_mode = #tpu.pipeline_mode<synchronous>, transform_indices = @transform_9, window_bounds = array<i64: 12, 6>}, {pipeline_mode = #tpu.pipeline_mode<synchronous>, transform_indices = @transform_10, window_bounds = array<i64: 1, 6>}, {transform_indices = @transform_11, window_bounds = array<i64: 8, 12>}]} {
    %c0_i32 = arith.constant 0 : i32
    %0 = arith.cmpi eq, %arg0, %c0_i32 : i32
    %1 = arith.extui %0 : i1 to i32
    %c0_i32_0 = arith.constant 0 : i32
    %2 = arith.cmpi ne, %1, %c0_i32_0 : i32
    scf.if %2 {
      %cst_240 = arith.constant 0.000000e+00 : f32
      %629 = vector.broadcast %cst_240 : f32 to vector<1x12xf32>
      %c0_241 = arith.constant 0 : index
      %c0_242 = arith.constant 0 : index
      %630 = vector.load %arg15[%c0_241, %c0_242] : memref<1x12xf32, #tpu.memory_space<vmem>>, vector<1x12xf32>
      tpu.vector_store %arg15[%c0_241, %c0_242], %629 {strides = array<i32>} : memref<1x12xf32, #tpu.memory_space<vmem>>, vector<1x12xf32>,
      %cst_243 = arith.constant 0.000000e+00 : f32
      %631 = vector.broadcast %cst_243 : f32 to vector<1x12xf32>
      %c0_244 = arith.constant 0 : index
      %c0_245 = arith.constant 0 : index
      %632 = vector.load %arg16[%c0_244, %c0_245] : memref<1x12xf32, #tpu.memory_space<vmem>>, vector<1x12xf32>
      tpu.vector_store %arg16[%c0_244, %c0_245], %631 {strides = array<i32>} : memref<1x12xf32, #tpu.memory_space<vmem>>, vector<1x12xf32>,
      %cst_246 = arith.constant 0.000000e+00 : f32
      %633 = vector.broadcast %cst_246 : f32 to vector<1x12xf32>
      %c0_247 = arith.constant 0 : index
      %c0_248 = arith.constant 0 : index
      %634 = vector.load %arg17[%c0_247, %c0_248] : memref<1x12xf32, #tpu.memory_space<vmem>>, vector<1x12xf32>
      tpu.vector_store %arg17[%c0_247, %c0_248], %633 {strides = array<i32>} : memref<1x12xf32, #tpu.memory_space<vmem>>, vector<1x12xf32>,
      %cst_249 = arith.constant 0.000000e+00 : f32
      %635 = vector.broadcast %cst_249 : f32 to vector<1x12xf32>
      %c0_250 = arith.constant 0 : index
      %c0_251 = arith.constant 0 : index
      %636 = vector.load %arg18[%c0_250, %c0_251] : memref<1x12xf32, #tpu.memory_space<vmem>>, vector<1x12xf32>
      tpu.vector_store %arg18[%c0_250, %c0_251], %635 {strides = array<i32>} : memref<1x12xf32, #tpu.memory_space<vmem>>, vector<1x12xf32>,
    } else {
    }
    %c0 = arith.constant 0 : index
    %c0_1 = arith.constant 0 : index
    %3 = vector.load %arg1[%c0, %c0_1] : memref<8x1024xbf16, #tpu.memory_space<vmem>>, vector<8x1024xbf16>
    %c0_2 = arith.constant 0 : index
    %c0_3 = arith.constant 0 : index
    %4 = vector.load %arg4[%c0_2, %c0_3] : memref<1024x128xbf16, #tpu.memory_space<vmem>>, vector<1024x128xbf16>
    %cst = arith.constant dense<0.000000e+00> : vector<8x128xf32>
    %5 = tpu.matmul %3, %4, %cst {dimension_numbers = #tpu.dot_dimension_numbers<[1], [0], [0], [1], [0, 0, 1, 1], [], []>} : vector<8x1024xbf16>, vector<1024x128xbf16>, vector<8x128xf32> -> vector<8x128xf32>
    %c0_4 = arith.constant 0 : index
    %c0_5 = arith.constant 0 : index
    %6 = vector.load %arg2[%c0_4, %c0_5] : memref<8x6xf32, #tpu.memory_space<vmem>>, vector<8x6xf32>
    %c0_6 = arith.constant 0 : index
    %c0_7 = arith.constant 0 : index
    %7 = vector.load %arg3[%c0_6, %c0_7] : memref<6x128xf32, #tpu.memory_space<vmem>>, vector<6x128xf32>
    %cst_8 = arith.constant dense<0.000000e+00> : vector<8x128xf32>
    %8 = tpu.matmul %6, %7, %cst_8 {dimension_numbers = #tpu.dot_dimension_numbers<[1], [0], [0], [1], [0, 0, 1, 1], [], []>} : vector<8x6xf32>, vector<6x128xf32>, vector<8x128xf32> -> vector<8x128xf32>
    %9 = arith.addf %5, %8 : vector<8x128xf32>
    %c0_9 = arith.constant 0 : index
    %c0_10 = arith.constant 0 : index
    %10 = vector.load %arg5[%c0_9, %c0_10] : memref<1x128xf32, #tpu.memory_space<vmem>>, vector<1x128xf32>
    %11 = vector.broadcast %10 : vector<1x128xf32> to vector<8x128xf32>
    %12 = arith.addf %9, %11 : vector<8x128xf32>
    %13 = vector.extract_strided_slice %12 {offsets = [0, 0], sizes = [8, 12], strides = [1, 1]} : vector<8x128xf32> to vector<8x12xf32>
    %c0_11 = arith.constant 0 : index
    %c0_12 = arith.constant 0 : index
    %14 = vector.load %arg13[%c0_11, %c0_12] : memref<8x512xf32, #tpu.memory_space<vmem>>, vector<8x12xf32>
    tpu.vector_store %arg13[%c0_11, %c0_12], %13 {strides = array<i32>} : memref<8x512xf32, #tpu.memory_space<vmem>>, vector<8x12xf32>,
    %15 = vector.extract_strided_slice %12 {offsets = [0, 12], sizes = [8, 12], strides = [1, 1]} : vector<8x128xf32> to vector<8x12xf32>
    %c0_13 = arith.constant 0 : index
    %c128 = arith.constant 128 : index
    %16 = vector.load %arg13[%c0_13, %c128] : memref<8x512xf32, #tpu.memory_space<vmem>>, vector<8x12xf32>
    tpu.vector_store %arg13[%c0_13, %c128], %15 {strides = array<i32>} : memref<8x512xf32, #tpu.memory_space<vmem>>, vector<8x12xf32>,
    %17 = vector.extract_strided_slice %12 {offsets = [0, 24], sizes = [8, 12], strides = [1, 1]} : vector<8x128xf32> to vector<8x12xf32>
    %c0_14 = arith.constant 0 : index
    %c256 = arith.constant 256 : index
    %18 = vector.load %arg13[%c0_14, %c256] : memref<8x512xf32, #tpu.memory_space<vmem>>, vector<8x12xf32>
    tpu.vector_store %arg13[%c0_14, %c256], %17 {strides = array<i32>} : memref<8x512xf32, #tpu.memory_space<vmem>>, vector<8x12xf32>,
    %19 = vector.extract_strided_slice %12 {offsets = [0, 36], sizes = [8, 12], strides = [1, 1]} : vector<8x128xf32> to vector<8x12xf32>
    %c0_15 = arith.constant 0 : index
    %c384 = arith.constant 384 : index
    %20 = vector.load %arg13[%c0_15, %c384] : memref<8x512xf32, #tpu.memory_space<vmem>>, vector<8x12xf32>
    tpu.vector_store %arg13[%c0_15, %c384], %19 {strides = array<i32>} : memref<8x512xf32, #tpu.memory_space<vmem>>, vector<8x12xf32>,
    %c0_16 = arith.constant 0 : index
    %c0_17 = arith.constant 0 : index
    %21 = vector.load %arg6[%c0_16, %c0_17] : memref<12x512xf32, #tpu.memory_space<vmem>>, vector<12x512xf32>
    %c0_18 = arith.constant 0 : index
    %c0_19 = arith.constant 0 : index
    %22 = vector.load %arg7[%c0_18, %c0_19] : memref<12x512xf32, #tpu.memory_space<vmem>>, vector<12x512xf32>
    %c0_20 = arith.constant 0 : index
    %c0_21 = arith.constant 0 : index
    %23 = vector.load %arg8[%c0_20, %c0_21] : memref<12x512xf32, #tpu.memory_space<vmem>>, vector<12x512xf32>
    %c0_22 = arith.constant 0 : index
    %c0_23 = arith.constant 0 : index
    %24 = vector.load %arg9[%c0_22, %c0_23] : memref<1x512xf32, #tpu.memory_space<vmem>>, vector<1x512xf32>
    %c0_24 = arith.constant 0 : index
    %c0_25 = arith.constant 0 : index
    %25 = vector.load %arg17[%c0_24, %c0_25] : memref<1x12xf32, #tpu.memory_space<vmem>>, vector<1x12xf32>
    %cst_26 = arith.constant dense<0.000000e+00> : vector<1x512xf32>
    %26 = tpu.matmul %25, %23, %cst_26 {dimension_numbers = #tpu.dot_dimension_numbers<[1], [0], [0], [1], [0, 0, 1, 1], [], []>} : vector<1x12xf32>, vector<12x512xf32>, vector<1x512xf32> -> vector<1x512xf32>
    %27 = arith.addf %26, %24 : vector<1x512xf32>
    %c0_27 = arith.constant 0 : index
    %c0_28 = arith.constant 0 : index
    %28 = vector.load %arg15[%c0_27, %c0_28] : memref<1x12xf32, #tpu.memory_space<vmem>>, vector<1x12xf32>
    %c0_29 = arith.constant 0 : index
    %c0_30 = arith.constant 0 : index
    %29 = vector.load %arg16[%c0_29, %c0_30] : memref<1x12xf32, #tpu.memory_space<vmem>>, vector<1x12xf32>
    %c0_31 = arith.constant 0 : index
    %c0_32 = arith.constant 0 : index
    %30 = vector.load %arg18[%c0_31, %c0_32] : memref<1x12xf32, #tpu.memory_space<vmem>>, vector<1x12xf32>
    %c0_i32_33 = arith.constant 0 : i32
    %31 = arith.index_cast %c0_i32_33 : i32 to index
    %c0_34 = arith.constant 0 : index
    %32 = vector.load %arg13[%31, %c0_34] : memref<8x512xf32, #tpu.memory_space<vmem>>, vector<1x512xf32>
    %cst_35 = arith.constant dense<0.000000e+00> : vector<1x512xf32>
    %33 = tpu.matmul %28, %21, %cst_35 {dimension_numbers = #tpu.dot_dimension_numbers<[1], [0], [0], [1], [0, 0, 1, 1], [], []>} : vector<1x12xf32>, vector<12x512xf32>, vector<1x512xf32> -> vector<1x512xf32>
    %34 = arith.addf %32, %33 : vector<1x512xf32>
    %35 = vector.extract_strided_slice %34 {offsets = [0, 0], sizes = [1, 12], strides = [1, 1]} : vector<1x512xf32> to vector<1x12xf32>
    %cst_36 = arith.constant 5.000000e-01 : f32
    %36 = vector.broadcast %cst_36 : f32 to vector<1x12xf32>
    %37 = arith.mulf %36, %35 : vector<1x12xf32>
    %38 = math.tanh %37 : vector<1x12xf32>
    %cst_37 = arith.constant 5.000000e-01 : f32
    %39 = vector.broadcast %cst_37 : f32 to vector<1x12xf32>
    %40 = arith.mulf %39, %38 : vector<1x12xf32>
    %cst_38 = arith.constant 5.000000e-01 : f32
    %41 = vector.broadcast %cst_38 : f32 to vector<1x12xf32>
    %42 = arith.addf %40, %41 : vector<1x12xf32>
    %43 = vector.extract_strided_slice %34 {offsets = [0, 128], sizes = [1, 12], strides = [1, 1]} : vector<1x512xf32> to vector<1x12xf32>
    %cst_39 = arith.constant 5.000000e-01 : f32
    %44 = vector.broadcast %cst_39 : f32 to vector<1x12xf32>
    %45 = arith.mulf %44, %43 : vector<1x12xf32>
    %46 = math.tanh %45 : vector<1x12xf32>
    %cst_40 = arith.constant 5.000000e-01 : f32
    %47 = vector.broadcast %cst_40 : f32 to vector<1x12xf32>
    %48 = arith.mulf %47, %46 : vector<1x12xf32>
    %cst_41 = arith.constant 5.000000e-01 : f32
    %49 = vector.broadcast %cst_41 : f32 to vector<1x12xf32>
    %50 = arith.addf %48, %49 : vector<1x12xf32>
    %51 = vector.extract_strided_slice %34 {offsets = [0, 256], sizes = [1, 12], strides = [1, 1]} : vector<1x512xf32> to vector<1x12xf32>
    %52 = math.tanh %51 : vector<1x12xf32>
    %53 = vector.extract_strided_slice %34 {offsets = [0, 384], sizes = [1, 12], strides = [1, 1]} : vector<1x512xf32> to vector<1x12xf32>
    %cst_42 = arith.constant 5.000000e-01 : f32
    %54 = vector.broadcast %cst_42 : f32 to vector<1x12xf32>
    %55 = arith.mulf %54, %53 : vector<1x12xf32>
    %56 = math.tanh %55 : vector<1x12xf32>
    %cst_43 = arith.constant 5.000000e-01 : f32
    %57 = vector.broadcast %cst_43 : f32 to vector<1x12xf32>
    %58 = arith.mulf %57, %56 : vector<1x12xf32>
    %cst_44 = arith.constant 5.000000e-01 : f32
    %59 = vector.broadcast %cst_44 : f32 to vector<1x12xf32>
    %60 = arith.addf %58, %59 : vector<1x12xf32>
    %61 = arith.mulf %50, %29 : vector<1x12xf32>
    %62 = arith.mulf %42, %52 : vector<1x12xf32>
    %63 = arith.addf %61, %62 : vector<1x12xf32>
    %64 = math.tanh %63 : vector<1x12xf32>
    %65 = arith.mulf %60, %64 : vector<1x12xf32>
    %cst_45 = arith.constant dense<0.000000e+00> : vector<1x512xf32>
    %66 = tpu.matmul %65, %22, %cst_45 {dimension_numbers = #tpu.dot_dimension_numbers<[1], [0], [0], [1], [0, 0, 1, 1], [], []>} : vector<1x12xf32>, vector<12x512xf32>, vector<1x512xf32> -> vector<1x512xf32>
    %67 = arith.addf %66, %27 : vector<1x512xf32>
    %68 = vector.extract_strided_slice %67 {offsets = [0, 0], sizes = [1, 12], strides = [1, 1]} : vector<1x512xf32> to vector<1x12xf32>
    %cst_46 = arith.constant 5.000000e-01 : f32
    %69 = vector.broadcast %cst_46 : f32 to vector<1x12xf32>
    %70 = arith.mulf %69, %68 : vector<1x12xf32>
    %71 = math.tanh %70 : vector<1x12xf32>
    %cst_47 = arith.constant 5.000000e-01 : f32
    %72 = vector.broadcast %cst_47 : f32 to vector<1x12xf32>
    %73 = arith.mulf %72, %71 : vector<1x12xf32>
    %cst_48 = arith.constant 5.000000e-01 : f32
    %74 = vector.broadcast %cst_48 : f32 to vector<1x12xf32>
    %75 = arith.addf %73, %74 : vector<1x12xf32>
    %76 = vector.extract_strided_slice %67 {offsets = [0, 128], sizes = [1, 12], strides = [1, 1]} : vector<1x512xf32> to vector<1x12xf32>
    %cst_49 = arith.constant 5.000000e-01 : f32
    %77 = vector.broadcast %cst_49 : f32 to vector<1x12xf32>
    %78 = arith.mulf %77, %76 : vector<1x12xf32>
    %79 = math.tanh %78 : vector<1x12xf32>
    %cst_50 = arith.constant 5.000000e-01 : f32
    %80 = vector.broadcast %cst_50 : f32 to vector<1x12xf32>
    %81 = arith.mulf %80, %79 : vector<1x12xf32>
    %cst_51 = arith.constant 5.000000e-01 : f32
    %82 = vector.broadcast %cst_51 : f32 to vector<1x12xf32>
    %83 = arith.addf %81, %82 : vector<1x12xf32>
    %84 = vector.extract_strided_slice %67 {offsets = [0, 256], sizes = [1, 12], strides = [1, 1]} : vector<1x512xf32> to vector<1x12xf32>
    %85 = math.tanh %84 : vector<1x12xf32>
    %86 = vector.extract_strided_slice %67 {offsets = [0, 384], sizes = [1, 12], strides = [1, 1]} : vector<1x512xf32> to vector<1x12xf32>
    %cst_52 = arith.constant 5.000000e-01 : f32
    %87 = vector.broadcast %cst_52 : f32 to vector<1x12xf32>
    %88 = arith.mulf %87, %86 : vector<1x12xf32>
    %89 = math.tanh %88 : vector<1x12xf32>
    %cst_53 = arith.constant 5.000000e-01 : f32
    %90 = vector.broadcast %cst_53 : f32 to vector<1x12xf32>
    %91 = arith.mulf %90, %89 : vector<1x12xf32>
    %cst_54 = arith.constant 5.000000e-01 : f32
    %92 = vector.broadcast %cst_54 : f32 to vector<1x12xf32>
    %93 = arith.addf %91, %92 : vector<1x12xf32>
    %94 = arith.mulf %83, %30 : vector<1x12xf32>
    %95 = arith.mulf %75, %85 : vector<1x12xf32>
    %96 = arith.addf %94, %95 : vector<1x12xf32>
    %97 = math.tanh %96 : vector<1x12xf32>
    %98 = arith.mulf %93, %97 : vector<1x12xf32>
    %99 = arith.index_cast %c0_i32_33 : i32 to index
    %c0_55 = arith.constant 0 : index
    %100 = vector.load %arg14[%99, %c0_55] : memref<8x12xf32, #tpu.memory_space<vmem>>, vector<1x12xf32>
    tpu.vector_store %arg14[%99, %c0_55], %98 {strides = array<i32>} : memref<8x12xf32, #tpu.memory_space<vmem>>, vector<1x12xf32>,
    %cst_56 = arith.constant dense<0.000000e+00> : vector<1x512xf32>
    %101 = tpu.matmul %98, %23, %cst_56 {dimension_numbers = #tpu.dot_dimension_numbers<[1], [0], [0], [1], [0, 0, 1, 1], [], []>} : vector<1x12xf32>, vector<12x512xf32>, vector<1x512xf32> -> vector<1x512xf32>
    %102 = arith.addf %101, %24 : vector<1x512xf32>
    %c1_i32 = arith.constant 1 : i32
    %103 = arith.index_cast %c1_i32 : i32 to index
    %c0_57 = arith.constant 0 : index
    %104 = vector.load %arg13[%103, %c0_57] : memref<8x512xf32, #tpu.memory_space<vmem>>, vector<1x512xf32>
    %cst_58 = arith.constant dense<0.000000e+00> : vector<1x512xf32>
    %105 = tpu.matmul %65, %21, %cst_58 {dimension_numbers = #tpu.dot_dimension_numbers<[1], [0], [0], [1], [0, 0, 1, 1], [], []>} : vector<1x12xf32>, vector<12x512xf32>, vector<1x512xf32> -> vector<1x512xf32>
    %106 = arith.addf %104, %105 : vector<1x512xf32>
    %107 = vector.extract_strided_slice %106 {offsets = [0, 0], sizes = [1, 12], strides = [1, 1]} : vector<1x512xf32> to vector<1x12xf32>
    %cst_59 = arith.constant 5.000000e-01 : f32
    %108 = vector.broadcast %cst_59 : f32 to vector<1x12xf32>
    %109 = arith.mulf %108, %107 : vector<1x12xf32>
    %110 = math.tanh %109 : vector<1x12xf32>
    %cst_60 = arith.constant 5.000000e-01 : f32
    %111 = vector.broadcast %cst_60 : f32 to vector<1x12xf32>
    %112 = arith.mulf %111, %110 : vector<1x12xf32>
    %cst_61 = arith.constant 5.000000e-01 : f32
    %113 = vector.broadcast %cst_61 : f32 to vector<1x12xf32>
    %114 = arith.addf %112, %113 : vector<1x12xf32>
    %115 = vector.extract_strided_slice %106 {offsets = [0, 128], sizes = [1, 12], strides = [1, 1]} : vector<1x512xf32> to vector<1x12xf32>
    %cst_62 = arith.constant 5.000000e-01 : f32
    %116 = vector.broadcast %cst_62 : f32 to vector<1x12xf32>
    %117 = arith.mulf %116, %115 : vector<1x12xf32>
    %118 = math.tanh %117 : vector<1x12xf32>
    %cst_63 = arith.constant 5.000000e-01 : f32
    %119 = vector.broadcast %cst_63 : f32 to vector<1x12xf32>
    %120 = arith.mulf %119, %118 : vector<1x12xf32>
    %cst_64 = arith.constant 5.000000e-01 : f32
    %121 = vector.broadcast %cst_64 : f32 to vector<1x12xf32>
    %122 = arith.addf %120, %121 : vector<1x12xf32>
    %123 = vector.extract_strided_slice %106 {offsets = [0, 256], sizes = [1, 12], strides = [1, 1]} : vector<1x512xf32> to vector<1x12xf32>
    %124 = math.tanh %123 : vector<1x12xf32>
    %125 = vector.extract_strided_slice %106 {offsets = [0, 384], sizes = [1, 12], strides = [1, 1]} : vector<1x512xf32> to vector<1x12xf32>
    %cst_65 = arith.constant 5.000000e-01 : f32
    %126 = vector.broadcast %cst_65 : f32 to vector<1x12xf32>
    %127 = arith.mulf %126, %125 : vector<1x12xf32>
    %128 = math.tanh %127 : vector<1x12xf32>
    %cst_66 = arith.constant 5.000000e-01 : f32
    %129 = vector.broadcast %cst_66 : f32 to vector<1x12xf32>
    %130 = arith.mulf %129, %128 : vector<1x12xf32>
    %cst_67 = arith.constant 5.000000e-01 : f32
    %131 = vector.broadcast %cst_67 : f32 to vector<1x12xf32>
    %132 = arith.addf %130, %131 : vector<1x12xf32>
    %133 = arith.mulf %122, %63 : vector<1x12xf32>
    %134 = arith.mulf %114, %124 : vector<1x12xf32>
    %135 = arith.addf %133, %134 : vector<1x12xf32>
    %136 = math.tanh %135 : vector<1x12xf32>
    %137 = arith.mulf %132, %136 : vector<1x12xf32>
    %cst_68 = arith.constant dense<0.000000e+00> : vector<1x512xf32>
    %138 = tpu.matmul %137, %22, %cst_68 {dimension_numbers = #tpu.dot_dimension_numbers<[1], [0], [0], [1], [0, 0, 1, 1], [], []>} : vector<1x12xf32>, vector<12x512xf32>, vector<1x512xf32> -> vector<1x512xf32>
    %139 = arith.addf %138, %102 : vector<1x512xf32>
    %140 = vector.extract_strided_slice %139 {offsets = [0, 0], sizes = [1, 12], strides = [1, 1]} : vector<1x512xf32> to vector<1x12xf32>
    %cst_69 = arith.constant 5.000000e-01 : f32
    %141 = vector.broadcast %cst_69 : f32 to vector<1x12xf32>
    %142 = arith.mulf %141, %140 : vector<1x12xf32>
    %143 = math.tanh %142 : vector<1x12xf32>
    %cst_70 = arith.constant 5.000000e-01 : f32
    %144 = vector.broadcast %cst_70 : f32 to vector<1x12xf32>
    %145 = arith.mulf %144, %143 : vector<1x12xf32>
    %cst_71 = arith.constant 5.000000e-01 : f32
    %146 = vector.broadcast %cst_71 : f32 to vector<1x12xf32>
    %147 = arith.addf %145, %146 : vector<1x12xf32>
    %148 = vector.extract_strided_slice %139 {offsets = [0, 128], sizes = [1, 12], strides = [1, 1]} : vector<1x512xf32> to vector<1x12xf32>
    %cst_72 = arith.constant 5.000000e-01 : f32
    %149 = vector.broadcast %cst_72 : f32 to vector<1x12xf32>
    %150 = arith.mulf %149, %148 : vector<1x12xf32>
    %151 = math.tanh %150 : vector<1x12xf32>
    %cst_73 = arith.constant 5.000000e-01 : f32
    %152 = vector.broadcast %cst_73 : f32 to vector<1x12xf32>
    %153 = arith.mulf %152, %151 : vector<1x12xf32>
    %cst_74 = arith.constant 5.000000e-01 : f32
    %154 = vector.broadcast %cst_74 : f32 to vector<1x12xf32>
    %155 = arith.addf %153, %154 : vector<1x12xf32>
    %156 = vector.extract_strided_slice %139 {offsets = [0, 256], sizes = [1, 12], strides = [1, 1]} : vector<1x512xf32> to vector<1x12xf32>
    %157 = math.tanh %156 : vector<1x12xf32>
    %158 = vector.extract_strided_slice %139 {offsets = [0, 384], sizes = [1, 12], strides = [1, 1]} : vector<1x512xf32> to vector<1x12xf32>
    %cst_75 = arith.constant 5.000000e-01 : f32
    %159 = vector.broadcast %cst_75 : f32 to vector<1x12xf32>
    %160 = arith.mulf %159, %158 : vector<1x12xf32>
    %161 = math.tanh %160 : vector<1x12xf32>
    %cst_76 = arith.constant 5.000000e-01 : f32
    %162 = vector.broadcast %cst_76 : f32 to vector<1x12xf32>
    %163 = arith.mulf %162, %161 : vector<1x12xf32>
    %cst_77 = arith.constant 5.000000e-01 : f32
    %164 = vector.broadcast %cst_77 : f32 to vector<1x12xf32>
    %165 = arith.addf %163, %164 : vector<1x12xf32>
    %166 = arith.mulf %155, %96 : vector<1x12xf32>
    %167 = arith.mulf %147, %157 : vector<1x12xf32>
    %168 = arith.addf %166, %167 : vector<1x12xf32>
    %169 = math.tanh %168 : vector<1x12xf32>
    %170 = arith.mulf %165, %169 : vector<1x12xf32>
    %171 = arith.index_cast %c1_i32 : i32 to index
    %c0_78 = arith.constant 0 : index
    %172 = vector.load %arg14[%171, %c0_78] : memref<8x12xf32, #tpu.memory_space<vmem>>, vector<1x12xf32>
    tpu.vector_store %arg14[%171, %c0_78], %170 {strides = array<i32>} : memref<8x12xf32, #tpu.memory_space<vmem>>, vector<1x12xf32>,
    %cst_79 = arith.constant dense<0.000000e+00> : vector<1x512xf32>
    %173 = tpu.matmul %170, %23, %cst_79 {dimension_numbers = #tpu.dot_dimension_numbers<[1], [0], [0], [1], [0, 0, 1, 1], [], []>} : vector<1x12xf32>, vector<12x512xf32>, vector<1x512xf32> -> vector<1x512xf32>
    %174 = arith.addf %173, %24 : vector<1x512xf32>
    %c2_i32 = arith.constant 2 : i32
    %175 = arith.index_cast %c2_i32 : i32 to index
    %c0_80 = arith.constant 0 : index
    %176 = vector.load %arg13[%175, %c0_80] : memref<8x512xf32, #tpu.memory_space<vmem>>, vector<1x512xf32>
    %cst_81 = arith.constant dense<0.000000e+00> : vector<1x512xf32>
    %177 = tpu.matmul %137, %21, %cst_81 {dimension_numbers = #tpu.dot_dimension_numbers<[1], [0], [0], [1], [0, 0, 1, 1], [], []>} : vector<1x12xf32>, vector<12x512xf32>, vector<1x512xf32> -> vector<1x512xf32>
    %178 = arith.addf %176, %177 : vector<1x512xf32>
    %179 = vector.extract_strided_slice %178 {offsets = [0, 0], sizes = [1, 12], strides = [1, 1]} : vector<1x512xf32> to vector<1x12xf32>
    %cst_82 = arith.constant 5.000000e-01 : f32
    %180 = vector.broadcast %cst_82 : f32 to vector<1x12xf32>
    %181 = arith.mulf %180, %179 : vector<1x12xf32>
    %182 = math.tanh %181 : vector<1x12xf32>
    %cst_83 = arith.constant 5.000000e-01 : f32
    %183 = vector.broadcast %cst_83 : f32 to vector<1x12xf32>
    %184 = arith.mulf %183, %182 : vector<1x12xf32>
    %cst_84 = arith.constant 5.000000e-01 : f32
    %185 = vector.broadcast %cst_84 : f32 to vector<1x12xf32>
    %186 = arith.addf %184, %185 : vector<1x12xf32>
    %187 = vector.extract_strided_slice %178 {offsets = [0, 128], sizes = [1, 12], strides = [1, 1]} : vector<1x512xf32> to vector<1x12xf32>
    %cst_85 = arith.constant 5.000000e-01 : f32
    %188 = vector.broadcast %cst_85 : f32 to vector<1x12xf32>
    %189 = arith.mulf %188, %187 : vector<1x12xf32>
    %190 = math.tanh %189 : vector<1x12xf32>
    %cst_86 = arith.constant 5.000000e-01 : f32
    %191 = vector.broadcast %cst_86 : f32 to vector<1x12xf32>
    %192 = arith.mulf %191, %190 : vector<1x12xf32>
    %cst_87 = arith.constant 5.000000e-01 : f32
    %193 = vector.broadcast %cst_87 : f32 to vector<1x12xf32>
    %194 = arith.addf %192, %193 : vector<1x12xf32>
    %195 = vector.extract_strided_slice %178 {offsets = [0, 256], sizes = [1, 12], strides = [1, 1]} : vector<1x512xf32> to vector<1x12xf32>
    %196 = math.tanh %195 : vector<1x12xf32>
    %197 = vector.extract_strided_slice %178 {offsets = [0, 384], sizes = [1, 12], strides = [1, 1]} : vector<1x512xf32> to vector<1x12xf32>
    %cst_88 = arith.constant 5.000000e-01 : f32
    %198 = vector.broadcast %cst_88 : f32 to vector<1x12xf32>
    %199 = arith.mulf %198, %197 : vector<1x12xf32>
    %200 = math.tanh %199 : vector<1x12xf32>
    %cst_89 = arith.constant 5.000000e-01 : f32
    %201 = vector.broadcast %cst_89 : f32 to vector<1x12xf32>
    %202 = arith.mulf %201, %200 : vector<1x12xf32>
    %cst_90 = arith.constant 5.000000e-01 : f32
    %203 = vector.broadcast %cst_90 : f32 to vector<1x12xf32>
    %204 = arith.addf %202, %203 : vector<1x12xf32>
    %205 = arith.mulf %194, %135 : vector<1x12xf32>
    %206 = arith.mulf %186, %196 : vector<1x12xf32>
    %207 = arith.addf %205, %206 : vector<1x12xf32>
    %208 = math.tanh %207 : vector<1x12xf32>
    %209 = arith.mulf %204, %208 : vector<1x12xf32>
    %cst_91 = arith.constant dense<0.000000e+00> : vector<1x512xf32>
    %210 = tpu.matmul %209, %22, %cst_91 {dimension_numbers = #tpu.dot_dimension_numbers<[1], [0], [0], [1], [0, 0, 1, 1], [], []>} : vector<1x12xf32>, vector<12x512xf32>, vector<1x512xf32> -> vector<1x512xf32>
    %211 = arith.addf %210, %174 : vector<1x512xf32>
    %212 = vector.extract_strided_slice %211 {offsets = [0, 0], sizes = [1, 12], strides = [1, 1]} : vector<1x512xf32> to vector<1x12xf32>
    %cst_92 = arith.constant 5.000000e-01 : f32
    %213 = vector.broadcast %cst_92 : f32 to vector<1x12xf32>
    %214 = arith.mulf %213, %212 : vector<1x12xf32>
    %215 = math.tanh %214 : vector<1x12xf32>
    %cst_93 = arith.constant 5.000000e-01 : f32
    %216 = vector.broadcast %cst_93 : f32 to vector<1x12xf32>
    %217 = arith.mulf %216, %215 : vector<1x12xf32>
    %cst_94 = arith.constant 5.000000e-01 : f32
    %218 = vector.broadcast %cst_94 : f32 to vector<1x12xf32>
    %219 = arith.addf %217, %218 : vector<1x12xf32>
    %220 = vector.extract_strided_slice %211 {offsets = [0, 128], sizes = [1, 12], strides = [1, 1]} : vector<1x512xf32> to vector<1x12xf32>
    %cst_95 = arith.constant 5.000000e-01 : f32
    %221 = vector.broadcast %cst_95 : f32 to vector<1x12xf32>
    %222 = arith.mulf %221, %220 : vector<1x12xf32>
    %223 = math.tanh %222 : vector<1x12xf32>
    %cst_96 = arith.constant 5.000000e-01 : f32
    %224 = vector.broadcast %cst_96 : f32 to vector<1x12xf32>
    %225 = arith.mulf %224, %223 : vector<1x12xf32>
    %cst_97 = arith.constant 5.000000e-01 : f32
    %226 = vector.broadcast %cst_97 : f32 to vector<1x12xf32>
    %227 = arith.addf %225, %226 : vector<1x12xf32>
    %228 = vector.extract_strided_slice %211 {offsets = [0, 256], sizes = [1, 12], strides = [1, 1]} : vector<1x512xf32> to vector<1x12xf32>
    %229 = math.tanh %228 : vector<1x12xf32>
    %230 = vector.extract_strided_slice %211 {offsets = [0, 384], sizes = [1, 12], strides = [1, 1]} : vector<1x512xf32> to vector<1x12xf32>
    %cst_98 = arith.constant 5.000000e-01 : f32
    %231 = vector.broadcast %cst_98 : f32 to vector<1x12xf32>
    %232 = arith.mulf %231, %230 : vector<1x12xf32>
    %233 = math.tanh %232 : vector<1x12xf32>
    %cst_99 = arith.constant 5.000000e-01 : f32
    %234 = vector.broadcast %cst_99 : f32 to vector<1x12xf32>
    %235 = arith.mulf %234, %233 : vector<1x12xf32>
    %cst_100 = arith.constant 5.000000e-01 : f32
    %236 = vector.broadcast %cst_100 : f32 to vector<1x12xf32>
    %237 = arith.addf %235, %236 : vector<1x12xf32>
    %238 = arith.mulf %227, %168 : vector<1x12xf32>
    %239 = arith.mulf %219, %229 : vector<1x12xf32>
    %240 = arith.addf %238, %239 : vector<1x12xf32>
    %241 = math.tanh %240 : vector<1x12xf32>
    %242 = arith.mulf %237, %241 : vector<1x12xf32>
    %243 = arith.index_cast %c2_i32 : i32 to index
    %c0_101 = arith.constant 0 : index
    %244 = vector.load %arg14[%243, %c0_101] : memref<8x12xf32, #tpu.memory_space<vmem>>, vector<1x12xf32>
    tpu.vector_store %arg14[%243, %c0_101], %242 {strides = array<i32>} : memref<8x12xf32, #tpu.memory_space<vmem>>, vector<1x12xf32>,
    %cst_102 = arith.constant dense<0.000000e+00> : vector<1x512xf32>
    %245 = tpu.matmul %242, %23, %cst_102 {dimension_numbers = #tpu.dot_dimension_numbers<[1], [0], [0], [1], [0, 0, 1, 1], [], []>} : vector<1x12xf32>, vector<12x512xf32>, vector<1x512xf32> -> vector<1x512xf32>
    %246 = arith.addf %245, %24 : vector<1x512xf32>
    %c3_i32 = arith.constant 3 : i32
    %247 = arith.index_cast %c3_i32 : i32 to index
    %c0_103 = arith.constant 0 : index
    %248 = vector.load %arg13[%247, %c0_103] : memref<8x512xf32, #tpu.memory_space<vmem>>, vector<1x512xf32>
    %cst_104 = arith.constant dense<0.000000e+00> : vector<1x512xf32>
    %249 = tpu.matmul %209, %21, %cst_104 {dimension_numbers = #tpu.dot_dimension_numbers<[1], [0], [0], [1], [0, 0, 1, 1], [], []>} : vector<1x12xf32>, vector<12x512xf32>, vector<1x512xf32> -> vector<1x512xf32>
    %250 = arith.addf %248, %249 : vector<1x512xf32>
    %251 = vector.extract_strided_slice %250 {offsets = [0, 0], sizes = [1, 12], strides = [1, 1]} : vector<1x512xf32> to vector<1x12xf32>
    %cst_105 = arith.constant 5.000000e-01 : f32
    %252 = vector.broadcast %cst_105 : f32 to vector<1x12xf32>
    %253 = arith.mulf %252, %251 : vector<1x12xf32>
    %254 = math.tanh %253 : vector<1x12xf32>
    %cst_106 = arith.constant 5.000000e-01 : f32
    %255 = vector.broadcast %cst_106 : f32 to vector<1x12xf32>
    %256 = arith.mulf %255, %254 : vector<1x12xf32>
    %cst_107 = arith.constant 5.000000e-01 : f32
    %257 = vector.broadcast %cst_107 : f32 to vector<1x12xf32>
    %258 = arith.addf %256, %257 : vector<1x12xf32>
    %259 = vector.extract_strided_slice %250 {offsets = [0, 128], sizes = [1, 12], strides = [1, 1]} : vector<1x512xf32> to vector<1x12xf32>
    %cst_108 = arith.constant 5.000000e-01 : f32
    %260 = vector.broadcast %cst_108 : f32 to vector<1x12xf32>
    %261 = arith.mulf %260, %259 : vector<1x12xf32>
    %262 = math.tanh %261 : vector<1x12xf32>
    %cst_109 = arith.constant 5.000000e-01 : f32
    %263 = vector.broadcast %cst_109 : f32 to vector<1x12xf32>
    %264 = arith.mulf %263, %262 : vector<1x12xf32>
    %cst_110 = arith.constant 5.000000e-01 : f32
    %265 = vector.broadcast %cst_110 : f32 to vector<1x12xf32>
    %266 = arith.addf %264, %265 : vector<1x12xf32>
    %267 = vector.extract_strided_slice %250 {offsets = [0, 256], sizes = [1, 12], strides = [1, 1]} : vector<1x512xf32> to vector<1x12xf32>
    %268 = math.tanh %267 : vector<1x12xf32>
    %269 = vector.extract_strided_slice %250 {offsets = [0, 384], sizes = [1, 12], strides = [1, 1]} : vector<1x512xf32> to vector<1x12xf32>
    %cst_111 = arith.constant 5.000000e-01 : f32
    %270 = vector.broadcast %cst_111 : f32 to vector<1x12xf32>
    %271 = arith.mulf %270, %269 : vector<1x12xf32>
    %272 = math.tanh %271 : vector<1x12xf32>
    %cst_112 = arith.constant 5.000000e-01 : f32
    %273 = vector.broadcast %cst_112 : f32 to vector<1x12xf32>
    %274 = arith.mulf %273, %272 : vector<1x12xf32>
    %cst_113 = arith.constant 5.000000e-01 : f32
    %275 = vector.broadcast %cst_113 : f32 to vector<1x12xf32>
    %276 = arith.addf %274, %275 : vector<1x12xf32>
    %277 = arith.mulf %266, %207 : vector<1x12xf32>
    %278 = arith.mulf %258, %268 : vector<1x12xf32>
    %279 = arith.addf %277, %278 : vector<1x12xf32>
    %280 = math.tanh %279 : vector<1x12xf32>
    %281 = arith.mulf %276, %280 : vector<1x12xf32>
    %cst_114 = arith.constant dense<0.000000e+00> : vector<1x512xf32>
    %282 = tpu.matmul %281, %22, %cst_114 {dimension_numbers = #tpu.dot_dimension_numbers<[1], [0], [0], [1], [0, 0, 1, 1], [], []>} : vector<1x12xf32>, vector<12x512xf32>, vector<1x512xf32> -> vector<1x512xf32>
    %283 = arith.addf %282, %246 : vector<1x512xf32>
    %284 = vector.extract_strided_slice %283 {offsets = [0, 0], sizes = [1, 12], strides = [1, 1]} : vector<1x512xf32> to vector<1x12xf32>
    %cst_115 = arith.constant 5.000000e-01 : f32
    %285 = vector.broadcast %cst_115 : f32 to vector<1x12xf32>
    %286 = arith.mulf %285, %284 : vector<1x12xf32>
    %287 = math.tanh %286 : vector<1x12xf32>
    %cst_116 = arith.constant 5.000000e-01 : f32
    %288 = vector.broadcast %cst_116 : f32 to vector<1x12xf32>
    %289 = arith.mulf %288, %287 : vector<1x12xf32>
    %cst_117 = arith.constant 5.000000e-01 : f32
    %290 = vector.broadcast %cst_117 : f32 to vector<1x12xf32>
    %291 = arith.addf %289, %290 : vector<1x12xf32>
    %292 = vector.extract_strided_slice %283 {offsets = [0, 128], sizes = [1, 12], strides = [1, 1]} : vector<1x512xf32> to vector<1x12xf32>
    %cst_118 = arith.constant 5.000000e-01 : f32
    %293 = vector.broadcast %cst_118 : f32 to vector<1x12xf32>
    %294 = arith.mulf %293, %292 : vector<1x12xf32>
    %295 = math.tanh %294 : vector<1x12xf32>
    %cst_119 = arith.constant 5.000000e-01 : f32
    %296 = vector.broadcast %cst_119 : f32 to vector<1x12xf32>
    %297 = arith.mulf %296, %295 : vector<1x12xf32>
    %cst_120 = arith.constant 5.000000e-01 : f32
    %298 = vector.broadcast %cst_120 : f32 to vector<1x12xf32>
    %299 = arith.addf %297, %298 : vector<1x12xf32>
    %300 = vector.extract_strided_slice %283 {offsets = [0, 256], sizes = [1, 12], strides = [1, 1]} : vector<1x512xf32> to vector<1x12xf32>
    %301 = math.tanh %300 : vector<1x12xf32>
    %302 = vector.extract_strided_slice %283 {offsets = [0, 384], sizes = [1, 12], strides = [1, 1]} : vector<1x512xf32> to vector<1x12xf32>
    %cst_121 = arith.constant 5.000000e-01 : f32
    %303 = vector.broadcast %cst_121 : f32 to vector<1x12xf32>
    %304 = arith.mulf %303, %302 : vector<1x12xf32>
    %305 = math.tanh %304 : vector<1x12xf32>
    %cst_122 = arith.constant 5.000000e-01 : f32
    %306 = vector.broadcast %cst_122 : f32 to vector<1x12xf32>
    %307 = arith.mulf %306, %305 : vector<1x12xf32>
    %cst_123 = arith.constant 5.000000e-01 : f32
    %308 = vector.broadcast %cst_123 : f32 to vector<1x12xf32>
    %309 = arith.addf %307, %308 : vector<1x12xf32>
    %310 = arith.mulf %299, %240 : vector<1x12xf32>
    %311 = arith.mulf %291, %301 : vector<1x12xf32>
    %312 = arith.addf %310, %311 : vector<1x12xf32>
    %313 = math.tanh %312 : vector<1x12xf32>
    %314 = arith.mulf %309, %313 : vector<1x12xf32>
    %315 = arith.index_cast %c3_i32 : i32 to index
    %c0_124 = arith.constant 0 : index
    %316 = vector.load %arg14[%315, %c0_124] : memref<8x12xf32, #tpu.memory_space<vmem>>, vector<1x12xf32>
    tpu.vector_store %arg14[%315, %c0_124], %314 {strides = array<i32>} : memref<8x12xf32, #tpu.memory_space<vmem>>, vector<1x12xf32>,
    %cst_125 = arith.constant dense<0.000000e+00> : vector<1x512xf32>
    %317 = tpu.matmul %314, %23, %cst_125 {dimension_numbers = #tpu.dot_dimension_numbers<[1], [0], [0], [1], [0, 0, 1, 1], [], []>} : vector<1x12xf32>, vector<12x512xf32>, vector<1x512xf32> -> vector<1x512xf32>
    %318 = arith.addf %317, %24 : vector<1x512xf32>
    %c4_i32 = arith.constant 4 : i32
    %319 = arith.index_cast %c4_i32 : i32 to index
    %c0_126 = arith.constant 0 : index
    %320 = vector.load %arg13[%319, %c0_126] : memref<8x512xf32, #tpu.memory_space<vmem>>, vector<1x512xf32>
    %cst_127 = arith.constant dense<0.000000e+00> : vector<1x512xf32>
    %321 = tpu.matmul %281, %21, %cst_127 {dimension_numbers = #tpu.dot_dimension_numbers<[1], [0], [0], [1], [0, 0, 1, 1], [], []>} : vector<1x12xf32>, vector<12x512xf32>, vector<1x512xf32> -> vector<1x512xf32>
    %322 = arith.addf %320, %321 : vector<1x512xf32>
    %323 = vector.extract_strided_slice %322 {offsets = [0, 0], sizes = [1, 12], strides = [1, 1]} : vector<1x512xf32> to vector<1x12xf32>
    %cst_128 = arith.constant 5.000000e-01 : f32
    %324 = vector.broadcast %cst_128 : f32 to vector<1x12xf32>
    %325 = arith.mulf %324, %323 : vector<1x12xf32>
    %326 = math.tanh %325 : vector<1x12xf32>
    %cst_129 = arith.constant 5.000000e-01 : f32
    %327 = vector.broadcast %cst_129 : f32 to vector<1x12xf32>
    %328 = arith.mulf %327, %326 : vector<1x12xf32>
    %cst_130 = arith.constant 5.000000e-01 : f32
    %329 = vector.broadcast %cst_130 : f32 to vector<1x12xf32>
    %330 = arith.addf %328, %329 : vector<1x12xf32>
    %331 = vector.extract_strided_slice %322 {offsets = [0, 128], sizes = [1, 12], strides = [1, 1]} : vector<1x512xf32> to vector<1x12xf32>
    %cst_131 = arith.constant 5.000000e-01 : f32
    %332 = vector.broadcast %cst_131 : f32 to vector<1x12xf32>
    %333 = arith.mulf %332, %331 : vector<1x12xf32>
    %334 = math.tanh %333 : vector<1x12xf32>
    %cst_132 = arith.constant 5.000000e-01 : f32
    %335 = vector.broadcast %cst_132 : f32 to vector<1x12xf32>
    %336 = arith.mulf %335, %334 : vector<1x12xf32>
    %cst_133 = arith.constant 5.000000e-01 : f32
    %337 = vector.broadcast %cst_133 : f32 to vector<1x12xf32>
    %338 = arith.addf %336, %337 : vector<1x12xf32>
    %339 = vector.extract_strided_slice %322 {offsets = [0, 256], sizes = [1, 12], strides = [1, 1]} : vector<1x512xf32> to vector<1x12xf32>
    %340 = math.tanh %339 : vector<1x12xf32>
    %341 = vector.extract_strided_slice %322 {offsets = [0, 384], sizes = [1, 12], strides = [1, 1]} : vector<1x512xf32> to vector<1x12xf32>
    %cst_134 = arith.constant 5.000000e-01 : f32
    %342 = vector.broadcast %cst_134 : f32 to vector<1x12xf32>
    %343 = arith.mulf %342, %341 : vector<1x12xf32>
    %344 = math.tanh %343 : vector<1x12xf32>
    %cst_135 = arith.constant 5.000000e-01 : f32
    %345 = vector.broadcast %cst_135 : f32 to vector<1x12xf32>
    %346 = arith.mulf %345, %344 : vector<1x12xf32>
    %cst_136 = arith.constant 5.000000e-01 : f32
    %347 = vector.broadcast %cst_136 : f32 to vector<1x12xf32>
    %348 = arith.addf %346, %347 : vector<1x12xf32>
    %349 = arith.mulf %338, %279 : vector<1x12xf32>
    %350 = arith.mulf %330, %340 : vector<1x12xf32>
    %351 = arith.addf %349, %350 : vector<1x12xf32>
    %352 = math.tanh %351 : vector<1x12xf32>
    %353 = arith.mulf %348, %352 : vector<1x12xf32>
    %cst_137 = arith.constant dense<0.000000e+00> : vector<1x512xf32>
    %354 = tpu.matmul %353, %22, %cst_137 {dimension_numbers = #tpu.dot_dimension_numbers<[1], [0], [0], [1], [0, 0, 1, 1], [], []>} : vector<1x12xf32>, vector<12x512xf32>, vector<1x512xf32> -> vector<1x512xf32>
    %355 = arith.addf %354, %318 : vector<1x512xf32>
    %356 = vector.extract_strided_slice %355 {offsets = [0, 0], sizes = [1, 12], strides = [1, 1]} : vector<1x512xf32> to vector<1x12xf32>
    %cst_138 = arith.constant 5.000000e-01 : f32
    %357 = vector.broadcast %cst_138 : f32 to vector<1x12xf32>
    %358 = arith.mulf %357, %356 : vector<1x12xf32>
    %359 = math.tanh %358 : vector<1x12xf32>
    %cst_139 = arith.constant 5.000000e-01 : f32
    %360 = vector.broadcast %cst_139 : f32 to vector<1x12xf32>
    %361 = arith.mulf %360, %359 : vector<1x12xf32>
    %cst_140 = arith.constant 5.000000e-01 : f32
    %362 = vector.broadcast %cst_140 : f32 to vector<1x12xf32>
    %363 = arith.addf %361, %362 : vector<1x12xf32>
    %364 = vector.extract_strided_slice %355 {offsets = [0, 128], sizes = [1, 12], strides = [1, 1]} : vector<1x512xf32> to vector<1x12xf32>
    %cst_141 = arith.constant 5.000000e-01 : f32
    %365 = vector.broadcast %cst_141 : f32 to vector<1x12xf32>
    %366 = arith.mulf %365, %364 : vector<1x12xf32>
    %367 = math.tanh %366 : vector<1x12xf32>
    %cst_142 = arith.constant 5.000000e-01 : f32
    %368 = vector.broadcast %cst_142 : f32 to vector<1x12xf32>
    %369 = arith.mulf %368, %367 : vector<1x12xf32>
    %cst_143 = arith.constant 5.000000e-01 : f32
    %370 = vector.broadcast %cst_143 : f32 to vector<1x12xf32>
    %371 = arith.addf %369, %370 : vector<1x12xf32>
    %372 = vector.extract_strided_slice %355 {offsets = [0, 256], sizes = [1, 12], strides = [1, 1]} : vector<1x512xf32> to vector<1x12xf32>
    %373 = math.tanh %372 : vector<1x12xf32>
    %374 = vector.extract_strided_slice %355 {offsets = [0, 384], sizes = [1, 12], strides = [1, 1]} : vector<1x512xf32> to vector<1x12xf32>
    %cst_144 = arith.constant 5.000000e-01 : f32
    %375 = vector.broadcast %cst_144 : f32 to vector<1x12xf32>
    %376 = arith.mulf %375, %374 : vector<1x12xf32>
    %377 = math.tanh %376 : vector<1x12xf32>
    %cst_145 = arith.constant 5.000000e-01 : f32
    %378 = vector.broadcast %cst_145 : f32 to vector<1x12xf32>
    %379 = arith.mulf %378, %377 : vector<1x12xf32>
    %cst_146 = arith.constant 5.000000e-01 : f32
    %380 = vector.broadcast %cst_146 : f32 to vector<1x12xf32>
    %381 = arith.addf %379, %380 : vector<1x12xf32>
    %382 = arith.mulf %371, %312 : vector<1x12xf32>
    %383 = arith.mulf %363, %373 : vector<1x12xf32>
    %384 = arith.addf %382, %383 : vector<1x12xf32>
    %385 = math.tanh %384 : vector<1x12xf32>
    %386 = arith.mulf %381, %385 : vector<1x12xf32>
    %387 = arith.index_cast %c4_i32 : i32 to index
    %c0_147 = arith.constant 0 : index
    %388 = vector.load %arg14[%387, %c0_147] : memref<8x12xf32, #tpu.memory_space<vmem>>, vector<1x12xf32>
    tpu.vector_store %arg14[%387, %c0_147], %386 {strides = array<i32>} : memref<8x12xf32, #tpu.memory_space<vmem>>, vector<1x12xf32>,
    %cst_148 = arith.constant dense<0.000000e+00> : vector<1x512xf32>
    %389 = tpu.matmul %386, %23, %cst_148 {dimension_numbers = #tpu.dot_dimension_numbers<[1], [0], [0], [1], [0, 0, 1, 1], [], []>} : vector<1x12xf32>, vector<12x512xf32>, vector<1x512xf32> -> vector<1x512xf32>
    %390 = arith.addf %389, %24 : vector<1x512xf32>
    %c5_i32 = arith.constant 5 : i32
    %391 = arith.index_cast %c5_i32 : i32 to index
    %c0_149 = arith.constant 0 : index
    %392 = vector.load %arg13[%391, %c0_149] : memref<8x512xf32, #tpu.memory_space<vmem>>, vector<1x512xf32>
    %cst_150 = arith.constant dense<0.000000e+00> : vector<1x512xf32>
    %393 = tpu.matmul %353, %21, %cst_150 {dimension_numbers = #tpu.dot_dimension_numbers<[1], [0], [0], [1], [0, 0, 1, 1], [], []>} : vector<1x12xf32>, vector<12x512xf32>, vector<1x512xf32> -> vector<1x512xf32>
    %394 = arith.addf %392, %393 : vector<1x512xf32>
    %395 = vector.extract_strided_slice %394 {offsets = [0, 0], sizes = [1, 12], strides = [1, 1]} : vector<1x512xf32> to vector<1x12xf32>
    %cst_151 = arith.constant 5.000000e-01 : f32
    %396 = vector.broadcast %cst_151 : f32 to vector<1x12xf32>
    %397 = arith.mulf %396, %395 : vector<1x12xf32>
    %398 = math.tanh %397 : vector<1x12xf32>
    %cst_152 = arith.constant 5.000000e-01 : f32
    %399 = vector.broadcast %cst_152 : f32 to vector<1x12xf32>
    %400 = arith.mulf %399, %398 : vector<1x12xf32>
    %cst_153 = arith.constant 5.000000e-01 : f32
    %401 = vector.broadcast %cst_153 : f32 to vector<1x12xf32>
    %402 = arith.addf %400, %401 : vector<1x12xf32>
    %403 = vector.extract_strided_slice %394 {offsets = [0, 128], sizes = [1, 12], strides = [1, 1]} : vector<1x512xf32> to vector<1x12xf32>
    %cst_154 = arith.constant 5.000000e-01 : f32
    %404 = vector.broadcast %cst_154 : f32 to vector<1x12xf32>
    %405 = arith.mulf %404, %403 : vector<1x12xf32>
    %406 = math.tanh %405 : vector<1x12xf32>
    %cst_155 = arith.constant 5.000000e-01 : f32
    %407 = vector.broadcast %cst_155 : f32 to vector<1x12xf32>
    %408 = arith.mulf %407, %406 : vector<1x12xf32>
    %cst_156 = arith.constant 5.000000e-01 : f32
    %409 = vector.broadcast %cst_156 : f32 to vector<1x12xf32>
    %410 = arith.addf %408, %409 : vector<1x12xf32>
    %411 = vector.extract_strided_slice %394 {offsets = [0, 256], sizes = [1, 12], strides = [1, 1]} : vector<1x512xf32> to vector<1x12xf32>
    %412 = math.tanh %411 : vector<1x12xf32>
    %413 = vector.extract_strided_slice %394 {offsets = [0, 384], sizes = [1, 12], strides = [1, 1]} : vector<1x512xf32> to vector<1x12xf32>
    %cst_157 = arith.constant 5.000000e-01 : f32
    %414 = vector.broadcast %cst_157 : f32 to vector<1x12xf32>
    %415 = arith.mulf %414, %413 : vector<1x12xf32>
    %416 = math.tanh %415 : vector<1x12xf32>
    %cst_158 = arith.constant 5.000000e-01 : f32
    %417 = vector.broadcast %cst_158 : f32 to vector<1x12xf32>
    %418 = arith.mulf %417, %416 : vector<1x12xf32>
    %cst_159 = arith.constant 5.000000e-01 : f32
    %419 = vector.broadcast %cst_159 : f32 to vector<1x12xf32>
    %420 = arith.addf %418, %419 : vector<1x12xf32>
    %421 = arith.mulf %410, %351 : vector<1x12xf32>
    %422 = arith.mulf %402, %412 : vector<1x12xf32>
    %423 = arith.addf %421, %422 : vector<1x12xf32>
    %424 = math.tanh %423 : vector<1x12xf32>
    %425 = arith.mulf %420, %424 : vector<1x12xf32>
    %cst_160 = arith.constant dense<0.000000e+00> : vector<1x512xf32>
    %426 = tpu.matmul %425, %22, %cst_160 {dimension_numbers = #tpu.dot_dimension_numbers<[1], [0], [0], [1], [0, 0, 1, 1], [], []>} : vector<1x12xf32>, vector<12x512xf32>, vector<1x512xf32> -> vector<1x512xf32>
    %427 = arith.addf %426, %390 : vector<1x512xf32>
    %428 = vector.extract_strided_slice %427 {offsets = [0, 0], sizes = [1, 12], strides = [1, 1]} : vector<1x512xf32> to vector<1x12xf32>
    %cst_161 = arith.constant 5.000000e-01 : f32
    %429 = vector.broadcast %cst_161 : f32 to vector<1x12xf32>
    %430 = arith.mulf %429, %428 : vector<1x12xf32>
    %431 = math.tanh %430 : vector<1x12xf32>
    %cst_162 = arith.constant 5.000000e-01 : f32
    %432 = vector.broadcast %cst_162 : f32 to vector<1x12xf32>
    %433 = arith.mulf %432, %431 : vector<1x12xf32>
    %cst_163 = arith.constant 5.000000e-01 : f32
    %434 = vector.broadcast %cst_163 : f32 to vector<1x12xf32>
    %435 = arith.addf %433, %434 : vector<1x12xf32>
    %436 = vector.extract_strided_slice %427 {offsets = [0, 128], sizes = [1, 12], strides = [1, 1]} : vector<1x512xf32> to vector<1x12xf32>
    %cst_164 = arith.constant 5.000000e-01 : f32
    %437 = vector.broadcast %cst_164 : f32 to vector<1x12xf32>
    %438 = arith.mulf %437, %436 : vector<1x12xf32>
    %439 = math.tanh %438 : vector<1x12xf32>
    %cst_165 = arith.constant 5.000000e-01 : f32
    %440 = vector.broadcast %cst_165 : f32 to vector<1x12xf32>
    %441 = arith.mulf %440, %439 : vector<1x12xf32>
    %cst_166 = arith.constant 5.000000e-01 : f32
    %442 = vector.broadcast %cst_166 : f32 to vector<1x12xf32>
    %443 = arith.addf %441, %442 : vector<1x12xf32>
    %444 = vector.extract_strided_slice %427 {offsets = [0, 256], sizes = [1, 12], strides = [1, 1]} : vector<1x512xf32> to vector<1x12xf32>
    %445 = math.tanh %444 : vector<1x12xf32>
    %446 = vector.extract_strided_slice %427 {offsets = [0, 384], sizes = [1, 12], strides = [1, 1]} : vector<1x512xf32> to vector<1x12xf32>
    %cst_167 = arith.constant 5.000000e-01 : f32
    %447 = vector.broadcast %cst_167 : f32 to vector<1x12xf32>
    %448 = arith.mulf %447, %446 : vector<1x12xf32>
    %449 = math.tanh %448 : vector<1x12xf32>
    %cst_168 = arith.constant 5.000000e-01 : f32
    %450 = vector.broadcast %cst_168 : f32 to vector<1x12xf32>
    %451 = arith.mulf %450, %449 : vector<1x12xf32>
    %cst_169 = arith.constant 5.000000e-01 : f32
    %452 = vector.broadcast %cst_169 : f32 to vector<1x12xf32>
    %453 = arith.addf %451, %452 : vector<1x12xf32>
    %454 = arith.mulf %443, %384 : vector<1x12xf32>
    %455 = arith.mulf %435, %445 : vector<1x12xf32>
    %456 = arith.addf %454, %455 : vector<1x12xf32>
    %457 = math.tanh %456 : vector<1x12xf32>
    %458 = arith.mulf %453, %457 : vector<1x12xf32>
    %459 = arith.index_cast %c5_i32 : i32 to index
    %c0_170 = arith.constant 0 : index
    %460 = vector.load %arg14[%459, %c0_170] : memref<8x12xf32, #tpu.memory_space<vmem>>, vector<1x12xf32>
    tpu.vector_store %arg14[%459, %c0_170], %458 {strides = array<i32>} : memref<8x12xf32, #tpu.memory_space<vmem>>, vector<1x12xf32>,
    %cst_171 = arith.constant dense<0.000000e+00> : vector<1x512xf32>
    %461 = tpu.matmul %458, %23, %cst_171 {dimension_numbers = #tpu.dot_dimension_numbers<[1], [0], [0], [1], [0, 0, 1, 1], [], []>} : vector<1x12xf32>, vector<12x512xf32>, vector<1x512xf32> -> vector<1x512xf32>
    %462 = arith.addf %461, %24 : vector<1x512xf32>
    %c6_i32 = arith.constant 6 : i32
    %463 = arith.index_cast %c6_i32 : i32 to index
    %c0_172 = arith.constant 0 : index
    %464 = vector.load %arg13[%463, %c0_172] : memref<8x512xf32, #tpu.memory_space<vmem>>, vector<1x512xf32>
    %cst_173 = arith.constant dense<0.000000e+00> : vector<1x512xf32>
    %465 = tpu.matmul %425, %21, %cst_173 {dimension_numbers = #tpu.dot_dimension_numbers<[1], [0], [0], [1], [0, 0, 1, 1], [], []>} : vector<1x12xf32>, vector<12x512xf32>, vector<1x512xf32> -> vector<1x512xf32>
    %466 = arith.addf %464, %465 : vector<1x512xf32>
    %467 = vector.extract_strided_slice %466 {offsets = [0, 0], sizes = [1, 12], strides = [1, 1]} : vector<1x512xf32> to vector<1x12xf32>
    %cst_174 = arith.constant 5.000000e-01 : f32
    %468 = vector.broadcast %cst_174 : f32 to vector<1x12xf32>
    %469 = arith.mulf %468, %467 : vector<1x12xf32>
    %470 = math.tanh %469 : vector<1x12xf32>
    %cst_175 = arith.constant 5.000000e-01 : f32
    %471 = vector.broadcast %cst_175 : f32 to vector<1x12xf32>
    %472 = arith.mulf %471, %470 : vector<1x12xf32>
    %cst_176 = arith.constant 5.000000e-01 : f32
    %473 = vector.broadcast %cst_176 : f32 to vector<1x12xf32>
    %474 = arith.addf %472, %473 : vector<1x12xf32>
    %475 = vector.extract_strided_slice %466 {offsets = [0, 128], sizes = [1, 12], strides = [1, 1]} : vector<1x512xf32> to vector<1x12xf32>
    %cst_177 = arith.constant 5.000000e-01 : f32
    %476 = vector.broadcast %cst_177 : f32 to vector<1x12xf32>
    %477 = arith.mulf %476, %475 : vector<1x12xf32>
    %478 = math.tanh %477 : vector<1x12xf32>
    %cst_178 = arith.constant 5.000000e-01 : f32
    %479 = vector.broadcast %cst_178 : f32 to vector<1x12xf32>
    %480 = arith.mulf %479, %478 : vector<1x12xf32>
    %cst_179 = arith.constant 5.000000e-01 : f32
    %481 = vector.broadcast %cst_179 : f32 to vector<1x12xf32>
    %482 = arith.addf %480, %481 : vector<1x12xf32>
    %483 = vector.extract_strided_slice %466 {offsets = [0, 256], sizes = [1, 12], strides = [1, 1]} : vector<1x512xf32> to vector<1x12xf32>
    %484 = math.tanh %483 : vector<1x12xf32>
    %485 = vector.extract_strided_slice %466 {offsets = [0, 384], sizes = [1, 12], strides = [1, 1]} : vector<1x512xf32> to vector<1x12xf32>
    %cst_180 = arith.constant 5.000000e-01 : f32
    %486 = vector.broadcast %cst_180 : f32 to vector<1x12xf32>
    %487 = arith.mulf %486, %485 : vector<1x12xf32>
    %488 = math.tanh %487 : vector<1x12xf32>
    %cst_181 = arith.constant 5.000000e-01 : f32
    %489 = vector.broadcast %cst_181 : f32 to vector<1x12xf32>
    %490 = arith.mulf %489, %488 : vector<1x12xf32>
    %cst_182 = arith.constant 5.000000e-01 : f32
    %491 = vector.broadcast %cst_182 : f32 to vector<1x12xf32>
    %492 = arith.addf %490, %491 : vector<1x12xf32>
    %493 = arith.mulf %482, %423 : vector<1x12xf32>
    %494 = arith.mulf %474, %484 : vector<1x12xf32>
    %495 = arith.addf %493, %494 : vector<1x12xf32>
    %496 = math.tanh %495 : vector<1x12xf32>
    %497 = arith.mulf %492, %496 : vector<1x12xf32>
    %cst_183 = arith.constant dense<0.000000e+00> : vector<1x512xf32>
    %498 = tpu.matmul %497, %22, %cst_183 {dimension_numbers = #tpu.dot_dimension_numbers<[1], [0], [0], [1], [0, 0, 1, 1], [], []>} : vector<1x12xf32>, vector<12x512xf32>, vector<1x512xf32> -> vector<1x512xf32>
    %499 = arith.addf %498, %462 : vector<1x512xf32>
    %500 = vector.extract_strided_slice %499 {offsets = [0, 0], sizes = [1, 12], strides = [1, 1]} : vector<1x512xf32> to vector<1x12xf32>
    %cst_184 = arith.constant 5.000000e-01 : f32
    %501 = vector.broadcast %cst_184 : f32 to vector<1x12xf32>
    %502 = arith.mulf %501, %500 : vector<1x12xf32>
    %503 = math.tanh %502 : vector<1x12xf32>
    %cst_185 = arith.constant 5.000000e-01 : f32
    %504 = vector.broadcast %cst_185 : f32 to vector<1x12xf32>
    %505 = arith.mulf %504, %503 : vector<1x12xf32>
    %cst_186 = arith.constant 5.000000e-01 : f32
    %506 = vector.broadcast %cst_186 : f32 to vector<1x12xf32>
    %507 = arith.addf %505, %506 : vector<1x12xf32>
    %508 = vector.extract_strided_slice %499 {offsets = [0, 128], sizes = [1, 12], strides = [1, 1]} : vector<1x512xf32> to vector<1x12xf32>
    %cst_187 = arith.constant 5.000000e-01 : f32
    %509 = vector.broadcast %cst_187 : f32 to vector<1x12xf32>
    %510 = arith.mulf %509, %508 : vector<1x12xf32>
    %511 = math.tanh %510 : vector<1x12xf32>
    %cst_188 = arith.constant 5.000000e-01 : f32
    %512 = vector.broadcast %cst_188 : f32 to vector<1x12xf32>
    %513 = arith.mulf %512, %511 : vector<1x12xf32>
    %cst_189 = arith.constant 5.000000e-01 : f32
    %514 = vector.broadcast %cst_189 : f32 to vector<1x12xf32>
    %515 = arith.addf %513, %514 : vector<1x12xf32>
    %516 = vector.extract_strided_slice %499 {offsets = [0, 256], sizes = [1, 12], strides = [1, 1]} : vector<1x512xf32> to vector<1x12xf32>
    %517 = math.tanh %516 : vector<1x12xf32>
    %518 = vector.extract_strided_slice %499 {offsets = [0, 384], sizes = [1, 12], strides = [1, 1]} : vector<1x512xf32> to vector<1x12xf32>
    %cst_190 = arith.constant 5.000000e-01 : f32
    %519 = vector.broadcast %cst_190 : f32 to vector<1x12xf32>
    %520 = arith.mulf %519, %518 : vector<1x12xf32>
    %521 = math.tanh %520 : vector<1x12xf32>
    %cst_191 = arith.constant 5.000000e-01 : f32
    %522 = vector.broadcast %cst_191 : f32 to vector<1x12xf32>
    %523 = arith.mulf %522, %521 : vector<1x12xf32>
    %cst_192 = arith.constant 5.000000e-01 : f32
    %524 = vector.broadcast %cst_192 : f32 to vector<1x12xf32>
    %525 = arith.addf %523, %524 : vector<1x12xf32>
    %526 = arith.mulf %515, %456 : vector<1x12xf32>
    %527 = arith.mulf %507, %517 : vector<1x12xf32>
    %528 = arith.addf %526, %527 : vector<1x12xf32>
    %529 = math.tanh %528 : vector<1x12xf32>
    %530 = arith.mulf %525, %529 : vector<1x12xf32>
    %531 = arith.index_cast %c6_i32 : i32 to index
    %c0_193 = arith.constant 0 : index
    %532 = vector.load %arg14[%531, %c0_193] : memref<8x12xf32, #tpu.memory_space<vmem>>, vector<1x12xf32>
    tpu.vector_store %arg14[%531, %c0_193], %530 {strides = array<i32>} : memref<8x12xf32, #tpu.memory_space<vmem>>, vector<1x12xf32>,
    %cst_194 = arith.constant dense<0.000000e+00> : vector<1x512xf32>
    %533 = tpu.matmul %530, %23, %cst_194 {dimension_numbers = #tpu.dot_dimension_numbers<[1], [0], [0], [1], [0, 0, 1, 1], [], []>} : vector<1x12xf32>, vector<12x512xf32>, vector<1x512xf32> -> vector<1x512xf32>
    %534 = arith.addf %533, %24 : vector<1x512xf32>
    %c7_i32 = arith.constant 7 : i32
    %535 = arith.index_cast %c7_i32 : i32 to index
    %c0_195 = arith.constant 0 : index
    %536 = vector.load %arg13[%535, %c0_195] : memref<8x512xf32, #tpu.memory_space<vmem>>, vector<1x512xf32>
    %cst_196 = arith.constant dense<0.000000e+00> : vector<1x512xf32>
    %537 = tpu.matmul %497, %21, %cst_196 {dimension_numbers = #tpu.dot_dimension_numbers<[1], [0], [0], [1], [0, 0, 1, 1], [], []>} : vector<1x12xf32>, vector<12x512xf32>, vector<1x512xf32> -> vector<1x512xf32>
    %538 = arith.addf %536, %537 : vector<1x512xf32>
    %539 = vector.extract_strided_slice %538 {offsets = [0, 0], sizes = [1, 12], strides = [1, 1]} : vector<1x512xf32> to vector<1x12xf32>
    %cst_197 = arith.constant 5.000000e-01 : f32
    %540 = vector.broadcast %cst_197 : f32 to vector<1x12xf32>
    %541 = arith.mulf %540, %539 : vector<1x12xf32>
    %542 = math.tanh %541 : vector<1x12xf32>
    %cst_198 = arith.constant 5.000000e-01 : f32
    %543 = vector.broadcast %cst_198 : f32 to vector<1x12xf32>
    %544 = arith.mulf %543, %542 : vector<1x12xf32>
    %cst_199 = arith.constant 5.000000e-01 : f32
    %545 = vector.broadcast %cst_199 : f32 to vector<1x12xf32>
    %546 = arith.addf %544, %545 : vector<1x12xf32>
    %547 = vector.extract_strided_slice %538 {offsets = [0, 128], sizes = [1, 12], strides = [1, 1]} : vector<1x512xf32> to vector<1x12xf32>
    %cst_200 = arith.constant 5.000000e-01 : f32
    %548 = vector.broadcast %cst_200 : f32 to vector<1x12xf32>
    %549 = arith.mulf %548, %547 : vector<1x12xf32>
    %550 = math.tanh %549 : vector<1x12xf32>
    %cst_201 = arith.constant 5.000000e-01 : f32
    %551 = vector.broadcast %cst_201 : f32 to vector<1x12xf32>
    %552 = arith.mulf %551, %550 : vector<1x12xf32>
    %cst_202 = arith.constant 5.000000e-01 : f32
    %553 = vector.broadcast %cst_202 : f32 to vector<1x12xf32>
    %554 = arith.addf %552, %553 : vector<1x12xf32>
    %555 = vector.extract_strided_slice %538 {offsets = [0, 256], sizes = [1, 12], strides = [1, 1]} : vector<1x512xf32> to vector<1x12xf32>
    %556 = math.tanh %555 : vector<1x12xf32>
    %557 = vector.extract_strided_slice %538 {offsets = [0, 384], sizes = [1, 12], strides = [1, 1]} : vector<1x512xf32> to vector<1x12xf32>
    %cst_203 = arith.constant 5.000000e-01 : f32
    %558 = vector.broadcast %cst_203 : f32 to vector<1x12xf32>
    %559 = arith.mulf %558, %557 : vector<1x12xf32>
    %560 = math.tanh %559 : vector<1x12xf32>
    %cst_204 = arith.constant 5.000000e-01 : f32
    %561 = vector.broadcast %cst_204 : f32 to vector<1x12xf32>
    %562 = arith.mulf %561, %560 : vector<1x12xf32>
    %cst_205 = arith.constant 5.000000e-01 : f32
    %563 = vector.broadcast %cst_205 : f32 to vector<1x12xf32>
    %564 = arith.addf %562, %563 : vector<1x12xf32>
    %565 = arith.mulf %554, %495 : vector<1x12xf32>
    %566 = arith.mulf %546, %556 : vector<1x12xf32>
    %567 = arith.addf %565, %566 : vector<1x12xf32>
    %568 = math.tanh %567 : vector<1x12xf32>
    %569 = arith.mulf %564, %568 : vector<1x12xf32>
    %cst_206 = arith.constant dense<0.000000e+00> : vector<1x512xf32>
    %570 = tpu.matmul %569, %22, %cst_206 {dimension_numbers = #tpu.dot_dimension_numbers<[1], [0], [0], [1], [0, 0, 1, 1], [], []>} : vector<1x12xf32>, vector<12x512xf32>, vector<1x512xf32> -> vector<1x512xf32>
    %571 = arith.addf %570, %534 : vector<1x512xf32>
    %572 = vector.extract_strided_slice %571 {offsets = [0, 0], sizes = [1, 12], strides = [1, 1]} : vector<1x512xf32> to vector<1x12xf32>
    %cst_207 = arith.constant 5.000000e-01 : f32
    %573 = vector.broadcast %cst_207 : f32 to vector<1x12xf32>
    %574 = arith.mulf %573, %572 : vector<1x12xf32>
    %575 = math.tanh %574 : vector<1x12xf32>
    %cst_208 = arith.constant 5.000000e-01 : f32
    %576 = vector.broadcast %cst_208 : f32 to vector<1x12xf32>
    %577 = arith.mulf %576, %575 : vector<1x12xf32>
    %cst_209 = arith.constant 5.000000e-01 : f32
    %578 = vector.broadcast %cst_209 : f32 to vector<1x12xf32>
    %579 = arith.addf %577, %578 : vector<1x12xf32>
    %580 = vector.extract_strided_slice %571 {offsets = [0, 128], sizes = [1, 12], strides = [1, 1]} : vector<1x512xf32> to vector<1x12xf32>
    %cst_210 = arith.constant 5.000000e-01 : f32
    %581 = vector.broadcast %cst_210 : f32 to vector<1x12xf32>
    %582 = arith.mulf %581, %580 : vector<1x12xf32>
    %583 = math.tanh %582 : vector<1x12xf32>
    %cst_211 = arith.constant 5.000000e-01 : f32
    %584 = vector.broadcast %cst_211 : f32 to vector<1x12xf32>
    %585 = arith.mulf %584, %583 : vector<1x12xf32>
    %cst_212 = arith.constant 5.000000e-01 : f32
    %586 = vector.broadcast %cst_212 : f32 to vector<1x12xf32>
    %587 = arith.addf %585, %586 : vector<1x12xf32>
    %588 = vector.extract_strided_slice %571 {offsets = [0, 256], sizes = [1, 12], strides = [1, 1]} : vector<1x512xf32> to vector<1x12xf32>
    %589 = math.tanh %588 : vector<1x12xf32>
    %590 = vector.extract_strided_slice %571 {offsets = [0, 384], sizes = [1, 12], strides = [1, 1]} : vector<1x512xf32> to vector<1x12xf32>
    %cst_213 = arith.constant 5.000000e-01 : f32
    %591 = vector.broadcast %cst_213 : f32 to vector<1x12xf32>
    %592 = arith.mulf %591, %590 : vector<1x12xf32>
    %593 = math.tanh %592 : vector<1x12xf32>
    %cst_214 = arith.constant 5.000000e-01 : f32
    %594 = vector.broadcast %cst_214 : f32 to vector<1x12xf32>
    %595 = arith.mulf %594, %593 : vector<1x12xf32>
    %cst_215 = arith.constant 5.000000e-01 : f32
    %596 = vector.broadcast %cst_215 : f32 to vector<1x12xf32>
    %597 = arith.addf %595, %596 : vector<1x12xf32>
    %598 = arith.mulf %587, %528 : vector<1x12xf32>
    %599 = arith.mulf %579, %589 : vector<1x12xf32>
    %600 = arith.addf %598, %599 : vector<1x12xf32>
    %601 = math.tanh %600 : vector<1x12xf32>
    %602 = arith.mulf %597, %601 : vector<1x12xf32>
    %603 = arith.index_cast %c7_i32 : i32 to index
    %c0_216 = arith.constant 0 : index
    %604 = vector.load %arg14[%603, %c0_216] : memref<8x12xf32, #tpu.memory_space<vmem>>, vector<1x12xf32>
    tpu.vector_store %arg14[%603, %c0_216], %602 {strides = array<i32>} : memref<8x12xf32, #tpu.memory_space<vmem>>, vector<1x12xf32>,
    %cst_217 = arith.constant dense<0.000000e+00> : vector<1x512xf32>
    %605 = tpu.matmul %602, %23, %cst_217 {dimension_numbers = #tpu.dot_dimension_numbers<[1], [0], [0], [1], [0, 0, 1, 1], [], []>} : vector<1x12xf32>, vector<12x512xf32>, vector<1x512xf32> -> vector<1x512xf32>
    %606 = arith.addf %605, %24 : vector<1x512xf32>
    %c8_i32 = arith.constant 8 : i32
    %c0_218 = arith.constant 0 : index
    %c0_219 = arith.constant 0 : index
    %607 = vector.load %arg15[%c0_218, %c0_219] : memref<1x12xf32, #tpu.memory_space<vmem>>, vector<1x12xf32>
    tpu.vector_store %arg15[%c0_218, %c0_219], %569 {strides = array<i32>} : memref<1x12xf32, #tpu.memory_space<vmem>>, vector<1x12xf32>,
    %c0_220 = arith.constant 0 : index
    %c0_221 = arith.constant 0 : index
    %608 = vector.load %arg16[%c0_220, %c0_221] : memref<1x12xf32, #tpu.memory_space<vmem>>, vector<1x12xf32>
    tpu.vector_store %arg16[%c0_220, %c0_221], %567 {strides = array<i32>} : memref<1x12xf32, #tpu.memory_space<vmem>>, vector<1x12xf32>,
    %c0_222 = arith.constant 0 : index
    %c0_223 = arith.constant 0 : index
    %609 = vector.load %arg17[%c0_222, %c0_223] : memref<1x12xf32, #tpu.memory_space<vmem>>, vector<1x12xf32>
    tpu.vector_store %arg17[%c0_222, %c0_223], %602 {strides = array<i32>} : memref<1x12xf32, #tpu.memory_space<vmem>>, vector<1x12xf32>,
    %c0_224 = arith.constant 0 : index
    %c0_225 = arith.constant 0 : index
    %610 = vector.load %arg18[%c0_224, %c0_225] : memref<1x12xf32, #tpu.memory_space<vmem>>, vector<1x12xf32>
    tpu.vector_store %arg18[%c0_224, %c0_225], %600 {strides = array<i32>} : memref<1x12xf32, #tpu.memory_space<vmem>>, vector<1x12xf32>,
    %c0_226 = arith.constant 0 : index
    %c0_227 = arith.constant 0 : index
    %611 = vector.load %arg14[%c0_226, %c0_227] : memref<8x12xf32, #tpu.memory_space<vmem>>, vector<8x12xf32>
    %c0_228 = arith.constant 0 : index
    %c0_229 = arith.constant 0 : index
    %612 = vector.load %arg10[%c0_228, %c0_229] : memref<12x6xf32, #tpu.memory_space<vmem>>, vector<12x6xf32>
    %cst_230 = arith.constant dense<0.000000e+00> : vector<8x6xf32>
    %613 = tpu.matmul %611, %612, %cst_230 {dimension_numbers = #tpu.dot_dimension_numbers<[1], [0], [0], [1], [0, 0, 1, 1], [], []>} : vector<8x12xf32>, vector<12x6xf32>, vector<8x6xf32> -> vector<8x6xf32>
    %c0_231 = arith.constant 0 : index
    %c0_232 = arith.constant 0 : index
    %614 = vector.load %arg11[%c0_231, %c0_232] : memref<1x6xf32, #tpu.memory_space<vmem>>, vector<1x6xf32>
    %615 = vector.broadcast %614 : vector<1x6xf32> to vector<8x6xf32>
    %616 = arith.addf %613, %615 : vector<8x6xf32>
    %c8_i32_233 = arith.constant 8 : i32
    %617 = arith.muli %arg0, %c8_i32_233 : i32
    %618 = tpu.iota {dimensions = array<i32: 0>} : vector<8x6xi32>
    %619 = vector.broadcast %617 : i32 to vector<8x6xi32>
    %620 = arith.addi %619, %618 : vector<8x6xi32>
    %c0_234 = arith.constant 0 : index
    %c0_235 = arith.constant 0 : index
    %621 = vector.load %arg2[%c0_234, %c0_235] : memref<8x6xf32, #tpu.memory_space<vmem>>, vector<8x6xf32>
    %c2_i32_236 = arith.constant 2 : i32
    %622 = vector.broadcast %c2_i32_236 : i32 to vector<8x6xi32>
    %623 = arith.cmpi sge, %620, %622 : vector<8x6xi32>
    %cst_237 = arith.constant 0.000000e+00 : f32
    %624 = vector.broadcast %cst_237 : f32 to vector<8x6xf32>
    %625 = arith.select %623, %616, %624 : vector<8x6xi1>, vector<8x6xf32>
    %626 = arith.addf %621, %625 : vector<8x6xf32>
    %627 = tpu.concatenate %616, %626 in 1 : vector<8x6xf32>, vector<8x6xf32> -> vector<8x12xf32>
    %c0_238 = arith.constant 0 : index
    %c0_239 = arith.constant 0 : index
    %628 = vector.load %arg12[%c0_238, %c0_239] : memref<8x12xf32, #tpu.memory_space<vmem>>, vector<8x12xf32>
    tpu.vector_store %arg12[%c0_238, %c0_239], %627 {strides = array<i32>} : memref<8x12xf32, #tpu.memory_space<vmem>>, vector<8x12xf32>,
    return
  }
  func.func @transform_0(%arg0: i32) -> (i32, i32) {
    %c0_i32 = arith.constant 0 : i32
    %c0_i32_0 = arith.constant 0 : i32
    return %arg0, %c0_i32 : i32, i32
  }
  func.func @transform_1(%arg0: i32) -> (i32, i32) {
    %c0_i32 = arith.constant 0 : i32
    %c0_i32_0 = arith.constant 0 : i32
    return %arg0, %c0_i32 : i32, i32
  }
  func.func @transform_2(%arg0: i32) -> (i32, i32) {
    %c0_i32 = arith.constant 0 : i32
    %c0_i32_0 = arith.constant 0 : i32
    %c0_i32_1 = arith.constant 0 : i32
    return %c0_i32, %c0_i32_0 : i32, i32
  }
  func.func @transform_3(%arg0: i32) -> (i32, i32) {
    %c0_i32 = arith.constant 0 : i32
    %c0_i32_0 = arith.constant 0 : i32
    %c0_i32_1 = arith.constant 0 : i32
    return %c0_i32, %c0_i32_0 : i32, i32
  }
  func.func @transform_4(%arg0: i32) -> (i32, i32) {
    %c0_i32 = arith.constant 0 : i32
    %c0_i32_0 = arith.constant 0 : i32
    %c0_i32_1 = arith.constant 0 : i32
    return %c0_i32, %c0_i32_0 : i32, i32
  }
  func.func @transform_5(%arg0: i32) -> (i32, i32) {
    %c0_i32 = arith.constant 0 : i32
    %c0_i32_0 = arith.constant 0 : i32
    %c0_i32_1 = arith.constant 0 : i32
    return %c0_i32, %c0_i32_0 : i32, i32
  }
  func.func @transform_6(%arg0: i32) -> (i32, i32) {
    %c0_i32 = arith.constant 0 : i32
    %c0_i32_0 = arith.constant 0 : i32
    %c0_i32_1 = arith.constant 0 : i32
    return %c0_i32, %c0_i32_0 : i32, i32
  }
  func.func @transform_7(%arg0: i32) -> (i32, i32) {
    %c0_i32 = arith.constant 0 : i32
    %c0_i32_0 = arith.constant 0 : i32
    %c0_i32_1 = arith.constant 0 : i32
    return %c0_i32, %c0_i32_0 : i32, i32
  }
  func.func @transform_8(%arg0: i32) -> (i32, i32) {
    %c0_i32 = arith.constant 0 : i32
    %c0_i32_0 = arith.constant 0 : i32
    %c0_i32_1 = arith.constant 0 : i32
    return %c0_i32, %c0_i32_0 : i32, i32
  }
  func.func @transform_9(%arg0: i32) -> (i32, i32) {
    %c0_i32 = arith.constant 0 : i32
    %c0_i32_0 = arith.constant 0 : i32
    %c0_i32_1 = arith.constant 0 : i32
    return %c0_i32, %c0_i32_0 : i32, i32
  }
  func.func @transform_10(%arg0: i32) -> (i32, i32) {
    %c0_i32 = arith.constant 0 : i32
    %c0_i32_0 = arith.constant 0 : i32
    %c0_i32_1 = arith.constant 0 : i32
    return %c0_i32, %c0_i32_0 : i32, i32
  }
  func.func @transform_11(%arg0: i32) -> (i32, i32) {
    %c0_i32 = arith.constant 0 : i32
    %c0_i32_0 = arith.constant 0 : i32
    return %arg0, %c0_i32 : i32, i32
  }
}

</mosaic_0001>

<bundles_post_ra>
// kernel: tpu_custom_call.1
= control target key start
LH: loop header
LB: loop body
LE: loop exit
PB: predicated region body
PF: predicated region fallthrough
CT: control target
= control target key end

     0   :  { %16 = vsyncpa [#allocation9], 0  ;;  %s7033_s0 = inlined_call_operand.hbm [shape: bf16[8,1024], index: 0, kind: input, shape index: {}]   ;;  %s7034_s1 = inlined_call_operand.vmem [shape: f32[8,6], index: 1, kind: input, shape index: {}]   ;;  %s7035_s2 = inlined_call_operand.vmem [shape: f32[6,128], index: 2, kind: input, shape index: {}]   ;;  %s7036_s3 = inlined_call_operand.hbm [shape: bf16[1024,128], index: 3, kind: input, shape index: {}]   ;;  %s7037_s4 = inlined_call_operand.vmem [shape: f32[1,128], index: 4, kind: input, shape index: {}]   ;;  %s7038_s5 = inlined_call_operand.hbm [shape: f32[12,512], index: 5, kind: input, shape index: {}]   ;;  %s7039_s6 = inlined_call_operand.hbm [shape: f32[12,512], index: 6, kind: input, shape index: {}]   ;;  %s7040_s7 = inlined_call_operand.hbm [shape: f32[12,512], index: 7, kind: input, shape index: {}]   ;;  %s7041_s8 = inlined_call_operand.vmem [shape: f32[1,512], index: 8, kind: input, shape index: {}]   ;;  %s7042_s9 = inlined_call_operand.vmem [shape: f32[12,6], index: 9, kind: input, shape index: {}]   ;;  %s7043_s10 = inlined_call_operand.vmem [shape: f32[1,6], index: 10, kind: input, shape index: {}]   ;;  %s7044_s11 = inlined_call_operand.hbm [shape: f32[8,12], index: 11, kind: output, shape index: {}]  }
   0x1   :  { %17 = vsyncpa [#allocation12], 0 }
   0x2   :  { %18 = vsyncpa [#allocation15], 0 }
   0x3   :  { %19 = vsyncpa [#allocation10], 0  ;;  %s6272_s17 = smov [#allocation11]   ;;  %s6132_s21 = scalar_lea.hbm %s7036_s3, 8192 }
   0x4   :  { %s39_s18 = sshll.u32 %s6272_s17, 4  ;;  %p6133_p0 = scmp.ne.s32.totalorder %s7036_s3, %s6132_s21  ;;  %s40_s18 = int_to_ptr.vmem [resolvable:$true] %s39_s18 }
   0x5   :  { %p6136_p1 = scmp.lt.u32.totalorder %s6132_s21, %s7036_s3 }
   0x7   :  { %p6138_p2 = pnand %p6136_p1, %p6133_p0 }
   0x9   :  { %6141 = shalt.err (!%p6138_p2)
}
   0xa   :  { %s6142_s26 = scalar_lea.vmem %s40_s18, 8192  ;;  %p6147_p4 = scmp.lt.s32.totalorder %s40_s18, %s40_s18 }
   0xb   :  { %p6143_p3 = scmp.ne.s32.totalorder %s40_s18, %s6142_s26  ;;  %p6148_p5 = scmp.lt.s32.totalorder %s6142_s26, %s6142_s26 }
   0xd   :  { %p6149_p6 = por %p6148_p5, %p6147_p4 }
   0xf   :  { %p6150_p7 = pnand %p6149_p6, %p6143_p3 }
  0x11   :  { %6153 = shalt.err (!%p6150_p7)
}
  0x12   :  { %s6273_s27 = smov 64   ;;  %s6274_s28 = smov 4  }
  0x13   :  { %45 = dma.hbm_to_vmem [thread:$0]  %s7036_s3, 8192, %s40_s18, [#allocation12], %s6273_s27, %s6273_s27, %s6274_s28  }
  0x14   :  { %s6275_s12 = smov [#allocation14]   ;;  %s6276_s14 = smov [#allocation8]  }
  0x15   :  { %s65_s13 = sshll.u32 %s6275_s12, 4  ;;  %s26_s15 = sshll.u32 %s6276_s14, 4  ;;  %s66_s13 = int_to_ptr.vmem [resolvable:$true] %s65_s13  ;;  %s27_s15 = int_to_ptr.vmem [resolvable:$true] %s26_s15 }
  0x16   :  { %s6154_s19 = scalar_lea.hbm %s7039_s6, 1024 }
  0x17   :  { %p6155_p8 = scmp.ne.s32.totalorder %s7039_s6, %s6154_s19  ;;  %p6158_p9 = scmp.lt.u32.totalorder %s6154_s19, %s7039_s6 }
  0x19   :  { %p6160_p10 = pnand %p6158_p9, %p6155_p8 }
  0x1b   :  { %6163 = shalt.err (!%p6160_p10)
}
  0x1c   :  { %s6164_s3 = scalar_lea.vmem %s66_s13, 1024  ;;  %p6169_p12 = scmp.lt.s32.totalorder %s66_s13, %s66_s13 }
  0x1d   :  { %p6165_p11 = scmp.ne.s32.totalorder %s66_s13, %s6164_s3  ;;  %p6170_p13 = scmp.lt.s32.totalorder %s6164_s3, %s6164_s3 }
  0x1f   :  { %p6171_p0 = por %p6170_p13, %p6169_p12 }
  0x21   :  { %p6172_p1 = pnand %p6171_p0, %p6165_p11 }
  0x23   :  { %6175 = shalt.err (!%p6172_p1)
}
  0x24   :  { %s6277_s18 = smov 512   ;;  %s6278_s24 = smov 32  }
  0x25   :  { %71 = dma.hbm_to_vmem [thread:$0]  %s7039_s6, 1024, %s66_s13, [#allocation15], %s6277_s18, %s6277_s18, %s6278_s24  }
  0x26   :  { %s6176_s29 = scalar_lea.hbm %s7033_s0, 512 }
  0x27   :  { %p6177_p2 = scmp.ne.s32.totalorder %s7033_s0, %s6176_s29  ;;  %p6180_p3 = scmp.lt.u32.totalorder %s6176_s29, %s7033_s0 }
  0x29   :  { %p6182_p4 = pnand %p6180_p3, %p6177_p2 }
  0x2b   :  { %6185 = shalt.err (!%p6182_p4)
}
  0x2c   :  { %s6186_s17 = scalar_lea.vmem %s27_s15, 512  ;;  %p6191_p6 = scmp.lt.s32.totalorder %s27_s15, %s27_s15 }
  0x2d   :  { %p6187_p5 = scmp.ne.s32.totalorder %s27_s15, %s6186_s17  ;;  %p6192_p7 = scmp.lt.s32.totalorder %s6186_s17, %s6186_s17 }
  0x2f   :  { %p6193_p8 = por %p6192_p7, %p6191_p6 }
  0x31   :  { %p6194_p9 = pnand %p6193_p8, %p6187_p5 }
  0x33   :  { %6197 = shalt.err (!%p6194_p9)
}
  0x34   :  { %29 = dma.hbm_to_vmem [thread:$0]  %s7033_s0, 512, %s27_s15, [#allocation9]  }
  0x35   :  { %s6279_s19 = smov [#allocation13]   ;;  %s6280_s21 = smov [#allocation16]  }
  0x36   :  { %s53_s20 = sshll.u32 %s6279_s19, 4  ;;  %s77_s22 = sshll.u32 %s6280_s21, 4  ;;  %s54_s20 = int_to_ptr.vmem [resolvable:$true] %s53_s20  ;;  %s78_s22 = int_to_ptr.vmem [resolvable:$true] %s77_s22 }
  0x37   :  { %s6198_s25 = scalar_lea.hbm %s7038_s5, 1024 }
  0x38   :  { %p6199_p10 = scmp.ne.s32.totalorder %s7038_s5, %s6198_s25  ;;  %p6202_p11 = scmp.lt.u32.totalorder %s6198_s25, %s7038_s5 }
  0x3a   :  { %p6204_p12 = pnand %p6202_p11, %p6199_p10 }
  0x3c   :  { %6207 = shalt.err (!%p6204_p12)
}
  0x3d   :  { %s6208_s0 = scalar_lea.vmem %s54_s20, 1024  ;;  %p6213_p0 = scmp.lt.s32.totalorder %s54_s20, %s54_s20 }
  0x3e   :  { %p6209_p13 = scmp.ne.s32.totalorder %s54_s20, %s6208_s0  ;;  %p6214_p1 = scmp.lt.s32.totalorder %s6208_s0, %s6208_s0 }
  0x40   :  { %p6215_p2 = por %p6214_p1, %p6213_p0 }
  0x42   :  { %p6216_p3 = pnand %p6215_p2, %p6209_p13 }
  0x44   :  { %6219 = shalt.err (!%p6216_p3)
}
  0x45   :  { %59 = dma.hbm_to_vmem [thread:$0]  %s7038_s5, 1024, %s54_s20, [#allocation12], %s6277_s18, %s6277_s18, %s6278_s24  }
  0x46   :  { %s6220_s16 = scalar_lea.hbm %s7040_s7, 1024 }
  0x47   :  { %p6221_p4 = scmp.ne.s32.totalorder %s7040_s7, %s6220_s16  ;;  %p6224_p5 = scmp.lt.u32.totalorder %s6220_s16, %s7040_s7 }
  0x49   :  { %p6226_p6 = pnand %p6224_p5, %p6221_p4 }
  0x4b   :  { %6229 = shalt.err (!%p6226_p6)
}
  0x4c   :  { %s6230_s21 = scalar_lea.vmem %s78_s22, 1024  ;;  %p6235_p8 = scmp.lt.s32.totalorder %s78_s22, %s78_s22 }
  0x4d   :  { %p6231_p7 = scmp.ne.s32.totalorder %s78_s22, %s6230_s21  ;;  %p6236_p9 = scmp.lt.s32.totalorder %s6230_s21, %s6230_s21 }
  0x4f   :  { %p6237_p10 = por %p6236_p9, %p6235_p8 }
  0x51   :  { %p6238_p11 = pnand %p6237_p10, %p6231_p7 }
  0x53   :  { %6241 = shalt.err (!%p6238_p11)
}
  0x54   :  { %83 = dma.hbm_to_vmem [thread:$0]  %s7040_s7, 1024, %s78_s22, [#allocation15], %s6277_s18, %s6277_s18, %s6278_s24  }
  0x55   :  { %6264 = dma.done.wait [#allocation9], 512  }
  0x56   :  { %6265 = vsyncadd [#allocation9], 4294966784 }
  0x57   :  { %6266 = dma.done.wait [#allocation12], 9216  }
  0x58   :  { %6267 = vsyncadd [#allocation12], 4294958080 }
  0x59   :  { %6268 = dma.done.wait [#allocation15], 2048  }
  0x5a   :  { %6269 = vsyncadd [#allocation15], 4294965248  ;;  %v6281_v0 = vmov 0.0   ;;  %vm6282_vm0 = vmmov 0   ;;  %vm110_vm1 = vcmask 90112   ;;  %vm253_vm2 = vcmask 1045504  }
  0x5b   :  { %5513 = vmatprep.subr.mxu0 %v6281_v0  ;;  %5515 = vmatprep.mubr.msk.f32.mxu0 %vm6282_vm0, %v6281_v0  ;;  %113 = vst.msk [vmem:[#allocation6] sm:$0x1] %vm110_vm1, %v6281_v0  ;;  %111 = vst.msk [vmem:[#allocation4] sm:$0x1] %vm110_vm1, %v6281_v0  ;;  %vm249_vm3 = vcmask 48128   ;;  %v5900_v2 = vld [vmem:[#allocation11 + $0x40] sm:$0xff]  }
  0x5c   :  { %112 = vst.msk [vmem:[#allocation5] sm:$0x1] %vm110_vm1, %v6281_v0  ;;  %114 = vst.msk [vmem:[#allocation7] sm:$0x1] %vm110_vm1, %v6281_v0  ;;  %v248_v1 = vld [vmem:[%s7035_s2] sm:$0x3f]  ;;  %5422 = vmatprep.subr.bf16.mxu1 %v5900_v2 }
  0x5d   :  { %5514 = vmatpush3.msk.msra.mxu0 %vm253_vm2, %v248_v1  ;;  %v5901_v3 = vld [vmem:[#allocation11 + $0xc0] sm:$0xff]   ;;  %v247_v4 = vld [vmem:[%s7034_s1] sm:$0xff]  ;;  %v5904_v7 = vld [vmem:[#allocation11 + $0x48] sm:$0xff]   ;;  %vm972_vm4 = vcmask 1043456   ;;  %vm6283_vm5 = vmmov 1   ;;  %vm907_vm7 = vcmask 97280  }
  0x5e   :  { %5516 = vmatmul.mubr.msk.f32.vlgmr.msra.gmra.mrb[0].mxu0 %vm249_vm3, %v247_v4  ;;  %v5902_v5 = vld [vmem:[#allocation11] sm:$0xff]   ;;  %5444 = vmatprep.subr.bf16.mxu0 %v5901_v3  ;;  %v5905_v8 = vld [vmem:[#allocation11 + $0xc8] sm:$0xff]   ;;  %v5908_v11 = vld [vmem:[#allocation11 + $0x50] sm:$0xff]   ;;  %s6286_s3 = smov 116   ;;  %s6287_s25 = smov 104  }
  0x5f   :  { %v5903_v6 = vld [vmem:[#allocation11 + $0x80] sm:$0xff]   ;;  %5423 = vmatpush3.bf16.msra.mxu1 %v5902_v5  ;;  %v5906_v9 = vld [vmem:[#allocation11 + $0x8] sm:$0xff]   ;;  %v5909_v12 = vld [vmem:[#allocation11 + $0xd0] sm:$0xff]   ;;  %s6289_s14 = smov 6   ;;  %s6290_s16 = smov [#allocation17]  }
  0x60   :  { %5445 = vmatpush3.bf16.msra.mxu0 %v5903_v6  ;;  %5424 = vmatprep.subr.bf16.mxu1 %v5904_v7  ;;  %v5907_v10 = vld [vmem:[#allocation11 + $0x88] sm:$0xff]   ;;  %v5910_v13 = vld [vmem:[#allocation11 + $0x10] sm:$0xff]   ;;  %v5912_v15 = vld [vmem:[#allocation11 + $0x58] sm:$0xff]   ;;  %s5187_s17 = sshll.u32 %s6290_s16, 4  ;;  %s5188_s17 = int_to_ptr.vmem [resolvable:$true] %s5187_s17 }
  0x61   :  { %5446 = vmatprep.subr.bf16.mxu0 %v5905_v8  ;;  %v5911_v14 = vld [vmem:[#allocation11 + $0x90] sm:$0xff]   ;;  %v5913_v16 = vld [vmem:[#allocation11 + $0xd8] sm:$0xff]   ;;  %v5916_v19 = vld [vmem:[#allocation11 + $0x60] sm:$0xff]   ;;  %p6247_p13 = scmp.lt.s32.totalorder %s5188_s17, %s5188_s17 }
  0x62   :  { %v5914_v17 = vld [vmem:[#allocation11 + $0x18] sm:$0xff]   ;;  %v5917_v20 = vld [vmem:[#allocation11 + $0xe0] sm:$0xff]   ;;  %v5920_v23 = vld [vmem:[#allocation11 + $0x68] sm:$0xff]  }
  0x63   :  { %5425 = vmatpush3.bf16.msra.mxu1 %v5906_v9  ;;  %v5915_v18 = vld [vmem:[#allocation11 + $0x98] sm:$0xff]   ;;  %v5918_v21 = vld [vmem:[#allocation11 + $0x20] sm:$0xff]   ;;  %v5921_v24 = vld [vmem:[#allocation11 + $0xe8] sm:$0xff]  }
  0x64   :  { %5447 = vmatpush3.bf16.msra.mxu0 %v5907_v10  ;;  %5426 = vmatprep.subr.bf16.mxu1 %v5908_v11  ;;  %v5919_v22 = vld [vmem:[#allocation11 + $0xa0] sm:$0xff]   ;;  %v5922_v25 = vld [vmem:[#allocation11 + $0x28] sm:$0xff]   ;;  %v5924_v27 = vld [vmem:[#allocation11 + $0x70] sm:$0xff]  }
  0x65   :  { %5448 = vmatprep.subr.bf16.mxu0 %v5909_v12  ;;  %v5923_v26 = vld [vmem:[#allocation11 + $0xa8] sm:$0xff]   ;;  %v5925_v28 = vld [vmem:[#allocation11 + $0xf0] sm:$0xff]   ;;  %v5928_v31 = vld [vmem:[#allocation11 + $0x78] sm:$0xff]  }
  0x66   :  { %v5926_v29 = vld [vmem:[#allocation11 + $0x30] sm:$0xff]   ;;  %v5929_v32 = vld [vmem:[#allocation11 + $0xf8] sm:$0xff]   ;;  %v115_v35 = vld [vmem:[#allocation8] sm:$0xff] }
  0x67   :  { %5427 = vmatpush3.bf16.msra.mxu1 %v5910_v13  ;;  %v5927_v30 = vld [vmem:[#allocation11 + $0xb0] sm:$0xff]   ;;  %v5930_v33 = vld [vmem:[#allocation11 + $0x38] sm:$0xff]   ;;  %v5200_v36 = vcombine.low %v115_v35, %v115_v35  ;;  %v5201_v37 = vcombine.high %v115_v35, %v115_v35  ;;  %v116_v38 = vld [vmem:[#allocation8 + $0x8] sm:$0xff] }
  0x68   :  { %5449 = vmatpush3.bf16.msra.mxu0 %v5911_v14  ;;  %5428 = vmatprep.subr.bf16.mxu1 %v5912_v15  ;;  %v5931_v34 = vld [vmem:[#allocation11 + $0xb8] sm:$0xff]   ;;  %v5202_v39 = vcombine.low %v116_v38, %v116_v38  ;;  %v5203_v40 = vcombine.high %v116_v38, %v116_v38  ;;  %v5936_v41 = vld [vmem:[#allocation11 + $0x140] sm:$0xff]   ;;  %v5940_v45 = vld [vmem:[#allocation11 + $0x148] sm:$0xff]  }
  0x69   :  { %5450 = vmatprep.subr.bf16.mxu0 %v5913_v16  ;;  %771 = vmatprep.mubr.bf16.mxu1 %v5201_v37  ;;  %v5937_v42 = vld [vmem:[#allocation11 + $0x1c0] sm:$0xff]   ;;  %v5941_v46 = vld [vmem:[#allocation11 + $0x1c8] sm:$0xff]   ;;  %v5944_v49 = vld [vmem:[#allocation11 + $0x150] sm:$0xff]  }
  0x6a   :  { %811 = vmatprep.mubr.bf16.mxu0 %v5203_v40  ;;  %v5938_v43 = vld [vmem:[#allocation11 + $0x100] sm:$0xff]   ;;  %v5942_v47 = vld [vmem:[#allocation11 + $0x108] sm:$0xff]   ;;  %v5945_v50 = vld [vmem:[#allocation11 + $0x1d0] sm:$0xff]  }
  0x6b   :  { %5429 = vmatpush3.bf16.msra.mxu1 %v5914_v17  ;;  %v5939_v44 = vld [vmem:[#allocation11 + $0x180] sm:$0xff]   ;;  %v5943_v48 = vld [vmem:[#allocation11 + $0x188] sm:$0xff]   ;;  %v5946_v51 = vld [vmem:[#allocation11 + $0x110] sm:$0xff]  }
  0x6c   :  { %5451 = vmatpush3.bf16.msra.mxu0 %v5915_v18  ;;  %5430 = vmatprep.subr.bf16.mxu1 %v5916_v19  ;;  %v5947_v52 = vld [vmem:[#allocation11 + $0x190] sm:$0xff]   ;;  %v5948_v53 = vld [vmem:[#allocation11 + $0x158] sm:$0xff]   ;;  %v5952_v57 = vld [vmem:[#allocation11 + $0x160] sm:$0xff]  }
  0x6d   :  { %5452 = vmatprep.subr.bf16.mxu0 %v5917_v20  ;;  %v5949_v54 = vld [vmem:[#allocation11 + $0x1d8] sm:$0xff]   ;;  %v5953_v58 = vld [vmem:[#allocation11 + $0x1e0] sm:$0xff]   ;;  %v5956_v61 = vld [vmem:[#allocation11 + $0x168] sm:$0xff]  }
  0x6e   :  { %v5950_v55 = vld [vmem:[#allocation11 + $0x118] sm:$0xff]   ;;  %v5954_v59 = vld [vmem:[#allocation11 + $0x120] sm:$0xff]   ;;  %v5957_v62 = vld [vmem:[#allocation11 + $0x1e8] sm:$0xff]  }
  0x6f   :  { %5431 = vmatpush3.bf16.msra.mxu1 %v5918_v21  ;;  %v5951_v56 = vld [vmem:[#allocation11 + $0x198] sm:$0xff]   ;;  %v5955_v60 = vld [vmem:[#allocation11 + $0x1a0] sm:$0xff]   ;;  %v5958_v63 = vld [vmem:[#allocation11 + $0x128] sm:$0xff]  }
  0x70   :  { %5453 = vmatpush3.bf16.msra.mxu0 %v5919_v22  ;;  %5432 = vmatprep.subr.bf16.mxu1 %v5920_v23  ;;  %v5959_v1 = vld [vmem:[#allocation11 + $0x1a8] sm:$0xff]   ;;  %v5960_v2 = vld [vmem:[#allocation11 + $0x170] sm:$0xff]   ;;  %vm6438_vm6 = vmpackc.low %vm972_vm4, %vm6283_vm5 }
  0x71   :  { %5454 = vmatprep.subr.bf16.mxu0 %v5921_v24  ;;  %v5961_v4 = vld [vmem:[#allocation11 + $0x1f0] sm:$0xff]   ;;  %v5964_v7 = vld [vmem:[#allocation11 + $0x178] sm:$0xff]   ;;  %v939_v17 = vld [vmem:[#allocation16 + $0x8] sm:$0xff] }
  0x72   :  { %v5962_v5 = vld [vmem:[#allocation11 + $0x130] sm:$0xff]   ;;  %v5965_v8 = vld [vmem:[#allocation11 + $0x1f8] sm:$0xff]   ;;  %v943_v18 = vld [vmem:[#allocation16 + $0x28] sm:$0xf] }
  0x73   :  { %5433 = vmatpush3.bf16.msra.mxu1 %v5922_v25  ;;  %v5963_v6 = vld [vmem:[#allocation11 + $0x1b0] sm:$0xff]   ;;  %v5966_v9 = vld [vmem:[#allocation11 + $0x138] sm:$0xff]   ;;  %v6442_v20 = vpack.c.bf16 %v943_v18, %v939_v17  ;;  %v938_v22 = vld [vmem:[#allocation16] sm:$0xff]  ;;  %v6284_v17 = vmov 1966171168  }
  0x74   :  { %5455 = vmatpush3.bf16.msra.mxu0 %v5923_v26  ;;  %5434 = vmatprep.subr.bf16.mxu1 %v5924_v27  ;;  %v5967_v10 = vld [vmem:[#allocation11 + $0x1b8] sm:$0xff]   ;;  %v117_v11 = vld [vmem:[#allocation8 + $0x10] sm:$0xff]  ;;  %v942_v23 = vld [vmem:[#allocation16 + $0x20] sm:$0xf]  ;;  %v1295_v18 = vunpack.c.l.s4 %v6284_v17 }
  0x75   :  { %5456 = vmatprep.subr.bf16.mxu0 %v5925_v28  ;;  %v118_v12 = vld [vmem:[#allocation8 + $0x18] sm:$0xff]  ;;  %v5204_v13 = vcombine.low %v117_v11, %v117_v11  ;;  %v5205_v14 = vcombine.high %v117_v11, %v117_v11  ;;  %v6446_v25 = vpack.c.bf16 %v942_v23, %v938_v22  ;;  %v940_v26 = vld [vmem:[#allocation16 + $0x10] sm:$0xff]  ;;  %v922_v35 = vld [vmem:[#allocation13] sm:$0xff]  ;;  %v949_v11 = vlaneseq }
  0x76   :  { %v5206_v15 = vcombine.low %v118_v12, %v118_v12  ;;  %v5207_v16 = vcombine.high %v118_v12, %v118_v12  ;;  %v941_v19 = vld [vmem:[#allocation16 + $0x18] sm:$0xff]  ;;  %v944_v27 = vld [vmem:[#allocation16 + $0x30] sm:$0xf]  ;;  %v5272_v22 = vld [vmem:[%s7037_s4] ss:$0 sm:$0xff]  ;;  %s6285_s4 = smov 92  }
  0x77   :  { %5435 = vmatpush3.bf16.msra.mxu1 %v5926_v29  ;;  %v945_v21 = vld [vmem:[#allocation16 + $0x38] sm:$0xf]  ;;  %v6451_v28 = vpack.c.bf16 %v944_v27, %v940_v26  ;;  %v923_v29 = vld [vmem:[#allocation13 + $0x8] sm:$0xff]  ;;  %v924_v37 = vld [vmem:[#allocation13 + $0x10] sm:$0xff]  ;;  %v6518_v27 = vshrl.u32 %v949_v11, 7 }
  0x78   :  { %5457 = vmatpush3.bf16.msra.mxu0 %v5927_v30  ;;  %5436 = vmatprep.subr.bf16.mxu1 %v5928_v31  ;;  %v6444_v24 = vpack.c.bf16 %v945_v21, %v941_v19  ;;  %v927_v30 = vld [vmem:[#allocation13 + $0x28] sm:$0xf]  ;;  %v925_v31 = vld [vmem:[#allocation13 + $0x18] sm:$0xff]  ;;  %v928_v38 = vld [vmem:[#allocation13 + $0x30] sm:$0xf] }
  0x79   :  { %5458 = vmatprep.subr.bf16.mxu0 %v5929_v32  ;;  %v6456_v32 = vpack.c.bf16 %v927_v30, %v923_v29  ;;  %v1296_v29 = vunpack.c.0.s8 %v1295_v18  ;;  %v951_v11 = vsub.s32 0, %v6518_v27  ;;  %vm5172_vm8 = vcmp.ge.s32.totalorder %v6518_v27, 2 }
  0x7b   :  { %5437 = vmatpush3.bf16.msra.mxu1 %v5930_v33  ;;  %v929_v33 = vld [vmem:[#allocation13 + $0x38] sm:$0xf] }
  0x7c   :  { %5459 = vmatpush3.bf16.msra.mxu0 %v5931_v34  ;;  %5466 = vmatprep.subr.bf16.mxu1 %v5936_v41  ;;  %v6464_v34 = vpack.c.bf16 %v929_v33, %v925_v31  ;;  %v6476_v41 = vpack.c.bf16 %v928_v38, %v924_v37  ;;  %v6525_v31 = vsub.s32 %v1296_v29, %v6518_v27 }
  0x7d   :  { %5488 = vmatprep.subr.bf16.mxu0 %v5937_v42  ;;  %v1127_v42 = vld [vmem:[#allocation4] sm:$0x1] }
  0x7e   :  { %772 = vmatmul.mubr.bf16.vlgmr.msra.gmra.mrb[0].mxu1 %v5200_v36  ;;  %v926_v36 = vld [vmem:[#allocation13 + $0x20] sm:$0xf] }
  0x7f   :  { %812 = vmatmul.mubr.bf16.vlgmr.msra.gmra.mrb[4].mxu0 %v5202_v39  ;;  %5467 = vmatpush3.bf16.msra.mxu1 %v5938_v43  ;;  %v947_v39 = vld [vmem:[#allocation6] sm:$0x1]  ;;  %v6474_v40 = vpack.c.bf16 %v926_v36, %v922_v35 }
  0x80   :  { %5489 = vmatpush3.bf16.msra.mxu0 %v5939_v44  ;;  %5468 = vmatprep.subr.bf16.mxu1 %v5940_v45 }
  0x81   :  { %5490 = vmatprep.subr.bf16.mxu0 %v5941_v46  ;;  %851 = vmatprep.mubr.bf16.mxu1 %v5205_v14  ;;  %v936_v14 = vld [vmem:[#allocation14 + $0x30] sm:$0xf] }
  0x82   :  { %891 = vmatprep.mubr.bf16.mxu0 %v5207_v16 }
  0x83   :  { %5469 = vmatpush3.bf16.msra.mxu1 %v5942_v47 }
  0x84   :  { %5491 = vmatpush3.bf16.msra.mxu0 %v5943_v48  ;;  %5470 = vmatprep.subr.bf16.mxu1 %v5944_v49 }
  0x85   :  { %5492 = vmatprep.subr.bf16.mxu0 %v5945_v50 }
  0x87   :  { %5471 = vmatpush3.bf16.msra.mxu1 %v5946_v51 }
  0x88   :  { %5493 = vmatpush3.bf16.msra.mxu0 %v5947_v52  ;;  %5472 = vmatprep.subr.bf16.mxu1 %v5948_v53 }
  0x89   :  { %5494 = vmatprep.subr.bf16.mxu0 %v5949_v54 }
  0x8b   :  { %5473 = vmatpush3.bf16.msra.mxu1 %v5950_v55 }
  0x8c   :  { %5495 = vmatpush3.bf16.msra.mxu0 %v5951_v56  ;;  %5474 = vmatprep.subr.bf16.mxu1 %v5952_v57 }
  0x8d   :  { %5496 = vmatprep.subr.bf16.mxu0 %v5953_v58 }
  0x8f   :  { %5475 = vmatpush3.bf16.msra.mxu1 %v5954_v59 }
  0x90   :  { %5497 = vmatpush3.bf16.msra.mxu0 %v5955_v60  ;;  %5476 = vmatprep.subr.bf16.mxu1 %v5956_v61  ;;  %v931_v60 = vld [vmem:[#allocation14 + $0x8] sm:$0xff] }
  0x91   :  { %5498 = vmatprep.subr.bf16.mxu0 %v5957_v62  ;;  %v935_v61 = vld [vmem:[#allocation14 + $0x28] sm:$0xf]  ;;  %v930_v62 = vld [vmem:[#allocation14] sm:$0xff] }
  0x93   :  { %5477 = vmatpush3.bf16.msra.mxu1 %v5958_v63 }
  0x94   :  { %5499 = vmatpush3.bf16.msra.mxu0 %v5959_v1  ;;  %5478 = vmatprep.subr.bf16.mxu1 %v5960_v2 }
  0x95   :  { %5500 = vmatprep.subr.bf16.mxu0 %v5961_v4  ;;  %v6492_v4 = vpack.c.bf16 %v935_v61, %v931_v60  ;;  %v1128_v61 = vld [vmem:[#allocation5] sm:$0x1] }
  0x97   :  { %5479 = vmatpush3.bf16.msra.mxu1 %v5962_v5  ;;  %v934_v5 = vld [vmem:[#allocation14 + $0x20] sm:$0xf] }
  0x98   :  { %5501 = vmatpush3.bf16.msra.mxu0 %v5963_v6  ;;  %5480 = vmatprep.subr.bf16.mxu1 %v5964_v7  ;;  %v933_v6 = vld [vmem:[#allocation14 + $0x18] sm:$0xff]  ;;  %v932_v7 = vld [vmem:[#allocation14 + $0x10] sm:$0xff]  ;;  %v6494_v12 = vpack.c.bf16 %v934_v5, %v930_v62 }
  0x99   :  { %5502 = vmatprep.subr.bf16.mxu0 %v5965_v8  ;;  %v6501_v21 = vpack.c.bf16 %v936_v14, %v932_v7  ;;  %v955_v14 = vsub.s32 1, %v6518_v27 }
  0x9b   :  { %5481 = vmatpush3.bf16.msra.mxu1 %v5966_v9 }
  0x9c   :  { %5503 = vmatpush3.bf16.msra.mxu0 %v5967_v10  ;;  %5527 = vmatprep.subr.msk.bf16.mxu1 %vm6438_vm6, %v6442_v20 }
  0x9d   :  { %5533 = vmatprep.subr.msk.bf16.mxu0 %vm6438_vm6, %v6444_v24 }
  0x9e   :  { %852 = vmatmul.mubr.bf16.vlgmr.msra.gmra.mrb[4].mxu1 %v5204_v13  ;;  %v937_v13 = vld [vmem:[#allocation14 + $0x38] sm:$0xf] }
  0x9f   :  { %892 = vmatmul.mubr.bf16.vlgmr.msra.gmra.mrb[8].mxu0 %v5206_v15  ;;  %5530 = vmatpush1.bf16.msk.msra.mxu1 %vm6438_vm6, %v6446_v25  ;;  %v6499_v19 = vpack.c.bf16 %v937_v13, %v933_v6  ;;  %v946_v13 = vld [vmem:[%s7041_s8] sm:$0xf] }
  0xa0   :  { %5536 = vmatpush1.bf16.msk.msra.mxu0 %vm6438_vm6, %v6451_v28  ;;  %1049 = vmatprep.mubr.f32.mxu1 %v6281_v0  ;;  %v6560_v17 = vrot.slane %v946_v13, %v955_v14 }
  0xa1   :  { %1120 = vmatprep.mubr.f32.mxu0 %v6281_v0  ;;  %5539 = vmatprep.subr.msk.bf16.mxu1 %vm6438_vm6, %v6456_v32 }
  0xa2   :  { %5545 = vmatprep.subr.msk.bf16.mxu0 %vm6438_vm6, %v6464_v34 }
  0xa6   :  { %5275 = vmatmul.mubr.msk.f32.vlgmr.msra.gmra.mrb[8].mxu1 %vm907_vm7, %v947_v39 }
  0xa7   :  { %5278 = vmatmul.mubr.msk.f32.vlgmr.msra.gmra.mrb[2].mxu0 %vm907_vm7, %v947_v39  ;;  %5542 = vmatpush1.bf16.msk.msra.mxu1 %vm6438_vm6, %v6474_v40 }
  0xa8   :  { %5548 = vmatpush1.bf16.msk.msra.mxu0 %vm6438_vm6, %v6476_v41  ;;  %1210 = vmatprep.mubr.f32.mxu1 %v6281_v0 }
  0xa9   :  { %1281 = vmatprep.mubr.f32.mxu0 %v6281_v0  ;;  %5551 = vmatprep.subr.msk.bf16.mxu1 %vm6438_vm6, %v6492_v4 }
  0xaa   :  { %5281 = vmatmul.mubr.msk.f32.vlgmr.msra.gmra.mrb[10].mxu1 %vm907_vm7, %v1127_v42  ;;  %5557 = vmatprep.subr.msk.bf16.mxu0 %vm6438_vm6, %v6499_v19 }
  0xab   :  { %5284 = vmatmul.mubr.msk.f32.vlgmr.msra.gmra.mrb[12].mxu0 %vm907_vm7, %v1127_v42  ;;  %1422 = vmatprep.mubr.f32.mxu1 %v6281_v0 }
  0xac   :  { %1493 = vmatprep.mubr.f32.mxu0 %v6281_v0  ;;  %5554 = vmatpush1.bf16.msk.msra.mxu1 %vm6438_vm6, %v6494_v12 }
  0xad   :  { %5563 = vmatprep.subr.msk.bf16.mxu1 %vm6438_vm6, %v6442_v20  ;;  %5560 = vmatpush1.bf16.msk.msra.mxu0 %vm6438_vm6, %v6501_v21 }
  0xae   :  { %5569 = vmatprep.subr.msk.bf16.mxu0 %vm6438_vm6, %v6444_v24 }
 0x131   :  { %v323_v43 = vpop.f32.mrb[0].mxu0 }
 0x132   :  { %v5517_v44 = vpop.f32.mrb[1].mxu0 }
 0x151   :  { %v5438_v45 = vpop.f32.mrb[0].mxu1 }
 0x152   :  { %v5460_v46 = vpop.f32.mrb[4].mxu0  ;;  %v5439_v47 = vpop.f32.mrb[1].mxu1 }
 0x153   :  { %v5440_v48 = vadd.f32 %v5439_v47, %v5438_v45  ;;  %v5461_v49 = vpop.f32.mrb[5].mxu0  ;;  %v5441_v50 = vpop.f32.mrb[2].mxu1 }
 0x154   :  { %v5462_v51 = vadd.f32 %v5461_v49, %v5460_v46  ;;  %v5463_v52 = vpop.f32.mrb[6].mxu0  ;;  %v5442_v53 = vpop.f32.mrb[3].mxu1 }
 0x155   :  { %v774_v54 = vadd.f32 %v5440_v48, %v323_v43  ;;  %v5464_v55 = vpop.f32.mrb[7].mxu0 }
 0x157   :  { %v814_v56 = vadd.f32 %v5462_v51, %v774_v54 }
 0x171   :  { %v5482_v57 = vpop.f32.mrb[4].mxu1 }
 0x172   :  { %v5504_v58 = vpop.f32.mrb[8].mxu0  ;;  %v5483_v59 = vpop.f32.mrb[5].mxu1 }
 0x173   :  { %v5484_v63 = vadd.f32 %v5483_v59, %v5482_v57  ;;  %v5505_v1 = vpop.f32.mrb[9].mxu0  ;;  %v5485_v2 = vpop.f32.mrb[6].mxu1 }
 0x174   :  { %v5506_v8 = vadd.f32 %v5505_v1, %v5504_v58  ;;  %v5507_v9 = vpop.f32.mrb[10].mxu0  ;;  %v5486_v10 = vpop.f32.mrb[7].mxu1 }
 0x175   :  { %v854_v15 = vadd.f32 %v5484_v63, %v814_v56  ;;  %v5508_v16 = vpop.f32.mrb[11].mxu0 }
 0x176   :  { %v959_v16 = vsub.s32 2, %v6518_v27 }
 0x177   :  { %v894_v23 = vadd.f32 %v5506_v8, %v854_v15  ;;  %v6557_v15 = vrot.slane %v946_v13, %v951_v11 }
 0x179   :  { %v906_v26 = vadd.f32 %v5272_v22, %v894_v23 }
 0x17b   :  { %908 = vst.msk [vmem:[#allocation2] sm:$0xff] %vm907_vm7, %v906_v26  ;;  %918 = vrot.lane.b32.xlu1 %v906_v26, %s6285_s4  ;;  %910 = vrot.lane.b32.xlu0 %v906_v26, %s6286_s3 }
 0x17d   :  { %v1212_v30 = vpop.f32.mrb[10].mxu1 }
 0x17e   :  { %v1283_v33 = vpop.f32.mrb[12].mxu0  ;;  %v1214_v35 = vpop.f32.mrb[11].mxu1 }
 0x17f   :  { %914 = vrot.lane.b32.xlu0 %v906_v26, %s6287_s25  ;;  %v1292_v36 = vcombine.low %v1212_v30, %v1214_v35  ;;  %v1285_v37 = vpop.f32.mrb[13].mxu0  ;;  %v6563_v26 = vrot.slane %v946_v13, %v959_v16  ;;  %v963_v30 = vsub.s32 3, %v6518_v27 }
 0x180   :  { %v1293_v38 = vcombine.low %v1283_v33, %v1285_v37 }
 0x181   :  { %v1300_v39 = vrot.slane %v1292_v36, %v6525_v31 }
 0x182   :  { %v1307_v42 = vrot.slane %v1293_v38, %v6525_v31 }
 0x184   :  { %v1308_v43 = vcombine.low %v1300_v39, %v1307_v42  ;;  %v6568_v39 = vrot.slane %v946_v13, %v963_v30 }
 0x186   :  { %v1315_v47 = vrot.slane %v1308_v43, %v6525_v31 }
 0x1ed   :  { %v919_v44 = vpop.permute.xlu1 %918  ;;  %v911_v45 = vpop.permute.xlu0 %910 }
 0x1ee   :  { %921 = vst.msk [vmem:[#allocation2 + $0x18] sm:$0xff] %vm907_vm7, %v919_v44  ;;  %913 = vst.msk [vmem:[#allocation2 + $0x8] sm:$0xff] %vm907_vm7, %v911_v45 }
 0x1f1   :  { %v915_v46 = vpop.permute.xlu0 %914 }
 0x1f2   :  { %917 = vst.msk [vmem:[#allocation2 + $0x10] sm:$0xff] %vm907_vm7, %v915_v46 }
 0x1f9   :  { %v1130_v48 = vld [vmem:[#allocation2] ss:$8 sm:$0xf] }
 0x1fa   :  { %v1317_v49 = vadd.f32 %v1315_v47, %v1130_v48 }
 0x1fc   :  { %v1318_v50 = vmul.f32 0.5, %v1317_v49  ;;  %v1323_v51 = vrot.slane %v1317_v49, 1  ;;  %v1329_v53 = vrot.slane %v1317_v49, 2  ;;  %v1332_v54 = vrot.slane %v1317_v49, 3  ;;  %v1129_v49 = vld [vmem:[#allocation7] sm:$0x1] }
 0x1fe   :  { %5972 = vtanh.f32 %v1318_v50  ;;  %v1325_v52 = vmul.f32 0.5, %v1323_v51  ;;  %v1334_v55 = vmul.f32 0.5, %v1332_v54 }
 0x200   :  { %5974 = vtanh.f32 %v1325_v52 }
 0x201   :  { %5976 = vtanh.f32 %v1329_v53 }
 0x202   :  { %5978 = vtanh.f32 %v1334_v55 }
 0x208   :  { %v5973_v56 = vpop.eup %5972 }
 0x209   :  { %v1320_v57 = vmul.f32 0.5, %v5973_v56 }
 0x20a   :  { %v5975_v58 = vpop.eup %5974 }
 0x20b   :  { %v1321_v59 = vadd.f32 0.5, %v1320_v57  ;;  %v1327_v60 = vmul.f32 0.5, %v5975_v58  ;;  %v5977_v63 = vpop.eup %5976 }
 0x20c   :  { %v5979_v6 = vpop.eup %5978 }
 0x20d   :  { %v1328_v62 = vadd.f32 0.5, %v1327_v60  ;;  %v1339_v2 = vmul.f32 %v5977_v63, %v1321_v59  ;;  %v1336_v7 = vmul.f32 0.5, %v5979_v6 }
 0x20f   :  { %v1338_v1 = vmul.f32 %v1328_v62, %v1128_v61  ;;  %v1337_v8 = vadd.f32 0.5, %v1336_v7 }
 0x211   :  { %v6533_v5 = vadd.f32 %v1339_v2, %v1338_v1 }
 0x213   :  { %5980 = vtanh.f32 %v6533_v5 }
 0x21d   :  { %v5981_v9 = vpop.eup %5980 }
 0x21e   :  { %v1342_v10 = vmul.f32 %v5981_v9, %v1337_v8 }
 0x220   :  { %5287 = vmatmul.mubr.msk.f32.vlgmr.msra.gmra.mrb[8].mxu1 %vm907_vm7, %v1342_v10  ;;  %5290 = vmatmul.mubr.msk.f32.vlgmr.msra.gmra.mrb[2].mxu0 %vm907_vm7, %v1342_v10 }
 0x221   :  { %5566 = vmatpush1.bf16.msk.msra.mxu1 %vm6438_vm6, %v6446_v25  ;;  %5572 = vmatpush1.bf16.msk.msra.mxu0 %vm6438_vm6, %v6451_v28 }
 0x222   :  { %1587 = vmatprep.mubr.f32.mxu1 %v6281_v0  ;;  %1658 = vmatprep.mubr.f32.mxu0 %v6281_v0 }
 0x223   :  { %5575 = vmatprep.subr.msk.bf16.mxu1 %vm6438_vm6, %v6456_v32  ;;  %5581 = vmatprep.subr.msk.bf16.mxu0 %vm6438_vm6, %v6464_v34 }
 0x2f3   :  { %v1424_v18 = vpop.f32.mrb[8].mxu1  ;;  %v1495_v22 = vpop.f32.mrb[2].mxu0 }
 0x2f4   :  { %v5817_v23 = vadd.f32 %v1424_v18, %v6557_v15  ;;  %v1426_v29 = vpop.f32.mrb[9].mxu1  ;;  %v1497_v33 = vpop.f32.mrb[3].mxu0  ;;  %v5819_v38 = vadd.f32 %v1495_v22, %v6563_v26 }
 0x2f5   :  { %v5818_v35 = vadd.f32 %v1426_v29, %v6560_v17  ;;  %v5820_v42 = vadd.f32 %v1497_v33, %v6568_v39 }
 0x2f6   :  { %v1500_v36 = vmul.f32 0.5, %v5817_v23 }
 0x2f7   :  { %v1504_v37 = vmul.f32 0.5, %v5818_v35  ;;  %v1509_v43 = vmul.f32 0.5, %v5820_v42 }
 0x2f8   :  { %5982 = vtanh.f32 %v1500_v36 }
 0x2f9   :  { %5984 = vtanh.f32 %v1504_v37 }
 0x2fa   :  { %5986 = vtanh.f32 %v5819_v38 }
 0x2fb   :  { %5988 = vtanh.f32 %v1509_v43 }
 0x302   :  { %v5983_v44 = vpop.eup %5982 }
 0x303   :  { %v5985_v45 = vpop.eup %5984  ;;  %v1502_v46 = vmul.f32 0.5, %v5983_v44 }
 0x304   :  { %v1506_v47 = vmul.f32 0.5, %v5985_v45  ;;  %v5987_v50 = vpop.eup %5986 }
 0x305   :  { %v1503_v48 = vadd.f32 0.5, %v1502_v46  ;;  %v5989_v55 = vpop.eup %5988 }
 0x306   :  { %v1507_v51 = vadd.f32 0.5, %v1506_v47  ;;  %v1511_v56 = vmul.f32 0.5, %v5989_v55 }
 0x307   :  { %v1514_v52 = vmul.f32 %v5987_v50, %v1503_v48 }
 0x308   :  { %v1513_v53 = vmul.f32 %v1507_v51, %v1129_v49  ;;  %v1512_v57 = vadd.f32 0.5, %v1511_v56 }
 0x30a   :  { %v6571_v54 = vadd.f32 %v1514_v52, %v1513_v53 }
 0x30c   :  { %5990 = vtanh.f32 %v6571_v54 }
 0x316   :  { %v5991_v58 = vpop.eup %5990 }
 0x317   :  { %v1517_v59 = vmul.f32 %v5991_v58, %v1512_v57 }
 0x319   :  { %1519 = vst.msk [vmem:[#allocation3] sm:$0x1] %vm110_vm1, %v1517_v59  ;;  %5293 = vmatmul.mubr.msk.f32.vlgmr.msra.gmra.mrb[12].mxu1 %vm907_vm7, %v1517_v59  ;;  %5296 = vmatmul.mubr.msk.f32.vlgmr.msra.gmra.mrb[14].mxu0 %vm907_vm7, %v1517_v59 }
 0x31a   :  { %5578 = vmatpush1.bf16.msk.msra.mxu1 %vm6438_vm6, %v6474_v40  ;;  %5584 = vmatpush1.bf16.msk.msra.mxu0 %vm6438_vm6, %v6476_v41 }
 0x31b   :  { %1731 = vmatprep.mubr.f32.mxu1 %v6281_v0  ;;  %1802 = vmatprep.mubr.f32.mxu0 %v6281_v0 }
 0x31c   :  { %5587 = vmatprep.subr.msk.bf16.mxu1 %vm6438_vm6, %v6492_v4  ;;  %5593 = vmatprep.subr.msk.bf16.mxu0 %vm6438_vm6, %v6499_v19 }
 0x31d   :  { %5299 = vmatmul.mubr.msk.f32.vlgmr.msra.gmra.mrb[14].mxu1 %vm907_vm7, %v1342_v10  ;;  %5302 = vmatmul.mubr.msk.f32.vlgmr.msra.gmra.mrb[16].mxu0 %vm907_vm7, %v1342_v10  ;;  %v1666_v10 = vld [vmem:[#allocation2 + $0x1] ss:$8 sm:$0xf] }
 0x31e   :  { %5590 = vmatpush1.bf16.msk.msra.mxu1 %vm6438_vm6, %v6494_v12  ;;  %5596 = vmatpush1.bf16.msk.msra.mxu0 %vm6438_vm6, %v6501_v21 }
 0x31f   :  { %1931 = vmatprep.mubr.f32.mxu1 %v6281_v0  ;;  %2002 = vmatprep.mubr.f32.mxu0 %v6281_v0 }
 0x320   :  { %5599 = vmatprep.subr.msk.bf16.mxu1 %vm6438_vm6, %v6442_v20  ;;  %5605 = vmatprep.subr.msk.bf16.mxu0 %vm6438_vm6, %v6444_v24 }
 0x3f0   :  { %v1733_v60 = vpop.f32.mrb[14].mxu1  ;;  %v1804_v61 = vpop.f32.mrb[16].mxu0 }
 0x3f1   :  { %v1735_v62 = vpop.f32.mrb[15].mxu1  ;;  %v1806_v63 = vpop.f32.mrb[17].mxu0 }
 0x3f2   :  { %v1813_v1 = vcombine.low %v1733_v60, %v1735_v62  ;;  %v1814_v2 = vcombine.low %v1804_v61, %v1806_v63 }
 0x3f4   :  { %v1821_v6 = vrot.slane %v1813_v1, %v6525_v31  ;;  %v1828_v7 = vrot.slane %v1814_v2, %v6525_v31 }
 0x3f6   :  { %v1829_v8 = vcombine.low %v1821_v6, %v1828_v7 }
 0x3f8   :  { %v1836_v9 = vrot.slane %v1829_v8, %v6525_v31 }
 0x3fa   :  { %v1838_v11 = vadd.f32 %v1836_v9, %v1666_v10 }
 0x3fc   :  { %v1839_v13 = vmul.f32 0.5, %v1838_v11  ;;  %v1844_v14 = vrot.slane %v1838_v11, 1  ;;  %v1850_v18 = vrot.slane %v1838_v11, 2  ;;  %v1853_v22 = vrot.slane %v1838_v11, 3 }
 0x3fe   :  { %5992 = vtanh.f32 %v1839_v13  ;;  %v1846_v16 = vmul.f32 0.5, %v1844_v14  ;;  %v1855_v23 = vmul.f32 0.5, %v1853_v22 }
 0x400   :  { %5994 = vtanh.f32 %v1846_v16 }
 0x401   :  { %5996 = vtanh.f32 %v1850_v18 }
 0x402   :  { %5998 = vtanh.f32 %v1855_v23 }
 0x408   :  { %v5993_v29 = vpop.eup %5992 }
 0x409   :  { %v1841_v30 = vmul.f32 0.5, %v5993_v29 }
 0x40a   :  { %v5995_v33 = vpop.eup %5994 }
 0x40b   :  { %v1842_v35 = vadd.f32 0.5, %v1841_v30  ;;  %v1848_v36 = vmul.f32 0.5, %v5995_v33  ;;  %v5997_v38 = vpop.eup %5996 }
 0x40c   :  { %v5999_v45 = vpop.eup %5998 }
 0x40d   :  { %v1849_v37 = vadd.f32 0.5, %v1848_v36  ;;  %v1860_v43 = vmul.f32 %v5997_v38, %v1842_v35  ;;  %v1857_v46 = vmul.f32 0.5, %v5999_v45 }
 0x40f   :  { %v1859_v42 = vmul.f32 %v1849_v37, %v6533_v5  ;;  %v1858_v47 = vadd.f32 0.5, %v1857_v46 }
 0x411   :  { %v6611_v44 = vadd.f32 %v1860_v43, %v1859_v42  ;;  %v2174_v42 = vld [vmem:[#allocation2 + $0x2] ss:$8 sm:$0xf] }
 0x413   :  { %6000 = vtanh.f32 %v6611_v44 }
 0x41d   :  { %v6001_v48 = vpop.eup %6000 }
 0x41e   :  { %v1863_v49 = vmul.f32 %v6001_v48, %v1858_v47 }
 0x420   :  { %5305 = vmatmul.mubr.msk.f32.vlgmr.msra.gmra.mrb[12].mxu1 %vm907_vm7, %v1863_v49  ;;  %5308 = vmatmul.mubr.msk.f32.vlgmr.msra.gmra.mrb[14].mxu0 %vm907_vm7, %v1863_v49 }
 0x421   :  { %5602 = vmatpush1.bf16.msk.msra.mxu1 %vm6438_vm6, %v6446_v25  ;;  %5608 = vmatpush1.bf16.msk.msra.mxu0 %vm6438_vm6, %v6451_v28 }
 0x422   :  { %2095 = vmatprep.mubr.f32.mxu1 %v6281_v0  ;;  %2166 = vmatprep.mubr.f32.mxu0 %v6281_v0 }
 0x423   :  { %5611 = vmatprep.subr.msk.bf16.mxu1 %vm6438_vm6, %v6456_v32  ;;  %5617 = vmatprep.subr.msk.bf16.mxu0 %vm6438_vm6, %v6464_v34 }
 0x4f3   :  { %v1933_v5 = vpop.f32.mrb[12].mxu1  ;;  %v2004_v50 = vpop.f32.mrb[14].mxu0 }
 0x4f4   :  { %v5821_v51 = vadd.f32 %v1933_v5, %v6557_v15  ;;  %v1935_v52 = vpop.f32.mrb[13].mxu1  ;;  %v2006_v53 = vpop.f32.mrb[15].mxu0  ;;  %v5823_v58 = vadd.f32 %v2004_v50, %v6563_v26 }
 0x4f5   :  { %v5822_v55 = vadd.f32 %v1935_v52, %v6560_v17  ;;  %v5824_v59 = vadd.f32 %v2006_v53, %v6568_v39 }
 0x4f6   :  { %v2009_v56 = vmul.f32 0.5, %v5821_v51 }
 0x4f7   :  { %v2013_v57 = vmul.f32 0.5, %v5822_v55  ;;  %v2018_v60 = vmul.f32 0.5, %v5824_v59 }
 0x4f8   :  { %6002 = vtanh.f32 %v2009_v56 }
 0x4f9   :  { %6004 = vtanh.f32 %v2013_v57 }
 0x4fa   :  { %6006 = vtanh.f32 %v5823_v58 }
 0x4fb   :  { %6008 = vtanh.f32 %v2018_v60 }
 0x502   :  { %v6003_v61 = vpop.eup %6002 }
 0x503   :  { %v6005_v62 = vpop.eup %6004  ;;  %v2011_v63 = vmul.f32 0.5, %v6003_v61 }
 0x504   :  { %v2015_v1 = vmul.f32 0.5, %v6005_v62  ;;  %v6007_v6 = vpop.eup %6006 }
 0x505   :  { %v2012_v2 = vadd.f32 0.5, %v2011_v63  ;;  %v6009_v11 = vpop.eup %6008 }
 0x506   :  { %v2016_v7 = vadd.f32 0.5, %v2015_v1  ;;  %v2020_v13 = vmul.f32 0.5, %v6009_v11 }
 0x507   :  { %v2023_v8 = vmul.f32 %v6007_v6, %v2012_v2 }
 0x508   :  { %v2022_v9 = vmul.f32 %v2016_v7, %v6571_v54  ;;  %v2021_v14 = vadd.f32 0.5, %v2020_v13 }
 0x50a   :  { %v6635_v10 = vadd.f32 %v2023_v8, %v2022_v9 }
 0x50c   :  { %6010 = vtanh.f32 %v6635_v10 }
 0x516   :  { %v6011_v16 = vpop.eup %6010 }
 0x517   :  { %v2026_v18 = vmul.f32 %v6011_v16, %v2021_v14 }
 0x519   :  { %2027 = vst.msk [vmem:[#allocation3 + $0x1] sm:$0x1] %vm110_vm1, %v2026_v18  ;;  %5311 = vmatmul.mubr.msk.f32.vlgmr.msra.gmra.mrb[16].mxu1 %vm907_vm7, %v2026_v18  ;;  %5314 = vmatmul.mubr.msk.f32.vlgmr.msra.gmra.mrb[18].mxu0 %vm907_vm7, %v2026_v18 }
 0x51a   :  { %5614 = vmatpush1.bf16.msk.msra.mxu1 %vm6438_vm6, %v6474_v40  ;;  %5620 = vmatpush1.bf16.msk.msra.mxu0 %vm6438_vm6, %v6476_v41 }
 0x51b   :  { %2239 = vmatprep.mubr.f32.mxu1 %v6281_v0  ;;  %2310 = vmatprep.mubr.f32.mxu0 %v6281_v0 }
 0x51c   :  { %5623 = vmatprep.subr.msk.bf16.mxu1 %vm6438_vm6, %v6492_v4  ;;  %5629 = vmatprep.subr.msk.bf16.mxu0 %vm6438_vm6, %v6499_v19 }
 0x51d   :  { %5317 = vmatmul.mubr.msk.f32.vlgmr.msra.gmra.mrb[18].mxu1 %vm907_vm7, %v1863_v49  ;;  %5320 = vmatmul.mubr.msk.f32.vlgmr.msra.gmra.mrb[20].mxu0 %vm907_vm7, %v1863_v49 }
 0x51e   :  { %5626 = vmatpush1.bf16.msk.msra.mxu1 %vm6438_vm6, %v6494_v12  ;;  %5632 = vmatpush1.bf16.msk.msra.mxu0 %vm6438_vm6, %v6501_v21 }
 0x51f   :  { %2439 = vmatprep.mubr.f32.mxu1 %v6281_v0  ;;  %2510 = vmatprep.mubr.f32.mxu0 %v6281_v0 }
 0x520   :  { %5635 = vmatprep.subr.msk.bf16.mxu1 %vm6438_vm6, %v6442_v20  ;;  %5641 = vmatprep.subr.msk.bf16.mxu0 %vm6438_vm6, %v6444_v24 }
 0x5f0   :  { %v2241_v54 = vpop.f32.mrb[18].mxu1  ;;  %v2312_v22 = vpop.f32.mrb[20].mxu0 }
 0x5f1   :  { %v2243_v23 = vpop.f32.mrb[19].mxu1  ;;  %v2314_v29 = vpop.f32.mrb[21].mxu0 }
 0x5f2   :  { %v2321_v30 = vcombine.low %v2241_v54, %v2243_v23  ;;  %v2322_v33 = vcombine.low %v2312_v22, %v2314_v29 }
 0x5f4   :  { %v2329_v35 = vrot.slane %v2321_v30, %v6525_v31  ;;  %v2336_v36 = vrot.slane %v2322_v33, %v6525_v31 }
 0x5f6   :  { %v2337_v37 = vcombine.low %v2329_v35, %v2336_v36 }
 0x5f8   :  { %v2344_v38 = vrot.slane %v2337_v37, %v6525_v31 }
 0x5fa   :  { %v2346_v43 = vadd.f32 %v2344_v38, %v2174_v42 }
 0x5fc   :  { %v2347_v45 = vmul.f32 0.5, %v2346_v43  ;;  %v2352_v46 = vrot.slane %v2346_v43, 1  ;;  %v2358_v48 = vrot.slane %v2346_v43, 2  ;;  %v2361_v49 = vrot.slane %v2346_v43, 3 }
 0x5fe   :  { %6012 = vtanh.f32 %v2347_v45  ;;  %v2354_v47 = vmul.f32 0.5, %v2352_v46  ;;  %v2363_v5 = vmul.f32 0.5, %v2361_v49 }
 0x600   :  { %6014 = vtanh.f32 %v2354_v47 }
 0x601   :  { %6016 = vtanh.f32 %v2358_v48 }
 0x602   :  { %6018 = vtanh.f32 %v2363_v5 }
 0x608   :  { %v6013_v50 = vpop.eup %6012 }
 0x609   :  { %v2349_v51 = vmul.f32 0.5, %v6013_v50 }
 0x60a   :  { %v6015_v52 = vpop.eup %6014 }
 0x60b   :  { %v2350_v53 = vadd.f32 0.5, %v2349_v51  ;;  %v2356_v55 = vmul.f32 0.5, %v6015_v52  ;;  %v6017_v57 = vpop.eup %6016 }
 0x60c   :  { %v6019_v61 = vpop.eup %6018 }
 0x60d   :  { %v2357_v56 = vadd.f32 0.5, %v2356_v55  ;;  %v2368_v59 = vmul.f32 %v6017_v57, %v2350_v53  ;;  %v2365_v62 = vmul.f32 0.5, %v6019_v61 }
 0x60f   :  { %v2367_v58 = vmul.f32 %v2357_v56, %v6611_v44  ;;  %v2366_v63 = vadd.f32 0.5, %v2365_v62 }
 0x611   :  { %v6675_v60 = vadd.f32 %v2368_v59, %v2367_v58  ;;  %v2682_v58 = vld [vmem:[#allocation2 + $0x3] ss:$8 sm:$0xf] }
 0x613   :  { %6020 = vtanh.f32 %v6675_v60 }
 0x61d   :  { %v6021_v1 = vpop.eup %6020 }
 0x61e   :  { %v2371_v2 = vmul.f32 %v6021_v1, %v2366_v63 }
 0x620   :  { %5323 = vmatmul.mubr.msk.f32.vlgmr.msra.gmra.mrb[16].mxu1 %vm907_vm7, %v2371_v2  ;;  %5326 = vmatmul.mubr.msk.f32.vlgmr.msra.gmra.mrb[18].mxu0 %vm907_vm7, %v2371_v2 }
 0x621   :  { %5638 = vmatpush1.bf16.msk.msra.mxu1 %vm6438_vm6, %v6446_v25  ;;  %5644 = vmatpush1.bf16.msk.msra.mxu0 %vm6438_vm6, %v6451_v28 }
 0x622   :  { %2603 = vmatprep.mubr.f32.mxu1 %v6281_v0  ;;  %2674 = vmatprep.mubr.f32.mxu0 %v6281_v0 }
 0x623   :  { %5647 = vmatprep.subr.msk.bf16.mxu1 %vm6438_vm6, %v6456_v32  ;;  %5653 = vmatprep.subr.msk.bf16.mxu0 %vm6438_vm6, %v6464_v34 }
 0x6f3   :  { %v2441_v44 = vpop.f32.mrb[16].mxu1  ;;  %v2512_v6 = vpop.f32.mrb[18].mxu0 }
 0x6f4   :  { %v5825_v7 = vadd.f32 %v2441_v44, %v6557_v15  ;;  %v2443_v8 = vpop.f32.mrb[17].mxu1  ;;  %v2514_v9 = vpop.f32.mrb[19].mxu0  ;;  %v5827_v16 = vadd.f32 %v2512_v6, %v6563_v26 }
 0x6f5   :  { %v5826_v11 = vadd.f32 %v2443_v8, %v6560_v17  ;;  %v5828_v18 = vadd.f32 %v2514_v9, %v6568_v39 }
 0x6f6   :  { %v2517_v13 = vmul.f32 0.5, %v5825_v7 }
 0x6f7   :  { %v2521_v14 = vmul.f32 0.5, %v5826_v11  ;;  %v2526_v54 = vmul.f32 0.5, %v5828_v18 }
 0x6f8   :  { %6022 = vtanh.f32 %v2517_v13 }
 0x6f9   :  { %6024 = vtanh.f32 %v2521_v14 }
 0x6fa   :  { %6026 = vtanh.f32 %v5827_v16 }
 0x6fb   :  { %6028 = vtanh.f32 %v2526_v54 }
 0x702   :  { %v6023_v22 = vpop.eup %6022 }
 0x703   :  { %v6025_v23 = vpop.eup %6024  ;;  %v2519_v29 = vmul.f32 0.5, %v6023_v22 }
 0x704   :  { %v2523_v30 = vmul.f32 0.5, %v6025_v23  ;;  %v6027_v35 = vpop.eup %6026 }
 0x705   :  { %v2520_v33 = vadd.f32 0.5, %v2519_v29  ;;  %v6029_v43 = vpop.eup %6028 }
 0x706   :  { %v2524_v36 = vadd.f32 0.5, %v2523_v30  ;;  %v2528_v45 = vmul.f32 0.5, %v6029_v43 }
 0x707   :  { %v2531_v37 = vmul.f32 %v6027_v35, %v2520_v33 }
 0x708   :  { %v2530_v38 = vmul.f32 %v2524_v36, %v6635_v10  ;;  %v2529_v46 = vadd.f32 0.5, %v2528_v45 }
 0x70a   :  { %v6699_v42 = vadd.f32 %v2531_v37, %v2530_v38 }
 0x70c   :  { %6030 = vtanh.f32 %v6699_v42 }
 0x716   :  { %v6031_v47 = vpop.eup %6030 }
 0x717   :  { %v2534_v48 = vmul.f32 %v6031_v47, %v2529_v46 }
 0x719   :  { %2535 = vst.msk [vmem:[#allocation3 + $0x2] sm:$0x1] %vm110_vm1, %v2534_v48  ;;  %5329 = vmatmul.mubr.msk.f32.vlgmr.msra.gmra.mrb[20].mxu1 %vm907_vm7, %v2534_v48  ;;  %5332 = vmatmul.mubr.msk.f32.vlgmr.msra.gmra.mrb[22].mxu0 %vm907_vm7, %v2534_v48 }
 0x71a   :  { %5650 = vmatpush1.bf16.msk.msra.mxu1 %vm6438_vm6, %v6474_v40  ;;  %5656 = vmatpush1.bf16.msk.msra.mxu0 %vm6438_vm6, %v6476_v41 }
 0x71b   :  { %2747 = vmatprep.mubr.f32.mxu1 %v6281_v0  ;;  %2818 = vmatprep.mubr.f32.mxu0 %v6281_v0 }
 0x71c   :  { %5659 = vmatprep.subr.msk.bf16.mxu1 %vm6438_vm6, %v6492_v4  ;;  %5665 = vmatprep.subr.msk.bf16.mxu0 %vm6438_vm6, %v6499_v19 }
 0x71d   :  { %5335 = vmatmul.mubr.msk.f32.vlgmr.msra.gmra.mrb[22].mxu1 %vm907_vm7, %v2371_v2  ;;  %5338 = vmatmul.mubr.msk.f32.vlgmr.msra.gmra.mrb[24].mxu0 %vm907_vm7, %v2371_v2 }
 0x71e   :  { %5662 = vmatpush1.bf16.msk.msra.mxu1 %vm6438_vm6, %v6494_v12  ;;  %5668 = vmatpush1.bf16.msk.msra.mxu0 %vm6438_vm6, %v6501_v21 }
 0x71f   :  { %2947 = vmatprep.mubr.f32.mxu1 %v6281_v0  ;;  %3018 = vmatprep.mubr.f32.mxu0 %v6281_v0 }
 0x720   :  { %5671 = vmatprep.subr.msk.bf16.mxu1 %vm6438_vm6, %v6442_v20  ;;  %5677 = vmatprep.subr.msk.bf16.mxu0 %vm6438_vm6, %v6444_v24 }
 0x7f0   :  { %v2749_v10 = vpop.f32.mrb[22].mxu1  ;;  %v2820_v49 = vpop.f32.mrb[24].mxu0 }
 0x7f1   :  { %v2751_v5 = vpop.f32.mrb[23].mxu1  ;;  %v2822_v50 = vpop.f32.mrb[25].mxu0 }
 0x7f2   :  { %v2829_v51 = vcombine.low %v2749_v10, %v2751_v5  ;;  %v2830_v52 = vcombine.low %v2820_v49, %v2822_v50 }
 0x7f4   :  { %v2837_v53 = vrot.slane %v2829_v51, %v6525_v31  ;;  %v2844_v55 = vrot.slane %v2830_v52, %v6525_v31 }
 0x7f6   :  { %v2845_v56 = vcombine.low %v2837_v53, %v2844_v55 }
 0x7f8   :  { %v2852_v57 = vrot.slane %v2845_v56, %v6525_v31 }
 0x7fa   :  { %v2854_v59 = vadd.f32 %v2852_v57, %v2682_v58 }
 0x7fc   :  { %v2855_v61 = vmul.f32 0.5, %v2854_v59  ;;  %v2860_v62 = vrot.slane %v2854_v59, 1  ;;  %v2866_v1 = vrot.slane %v2854_v59, 2  ;;  %v2869_v2 = vrot.slane %v2854_v59, 3 }
 0x7fe   :  { %6032 = vtanh.f32 %v2855_v61  ;;  %v2862_v63 = vmul.f32 0.5, %v2860_v62  ;;  %v2871_v44 = vmul.f32 0.5, %v2869_v2 }
 0x800   :  { %6034 = vtanh.f32 %v2862_v63 }
 0x801   :  { %6036 = vtanh.f32 %v2866_v1 }
 0x802   :  { %6038 = vtanh.f32 %v2871_v44 }
 0x808   :  { %v6033_v6 = vpop.eup %6032 }
 0x809   :  { %v2857_v7 = vmul.f32 0.5, %v6033_v6 }
 0x80a   :  { %v6035_v8 = vpop.eup %6034 }
 0x80b   :  { %v2858_v9 = vadd.f32 0.5, %v2857_v7  ;;  %v2864_v11 = vmul.f32 0.5, %v6035_v8  ;;  %v6037_v14 = vpop.eup %6036 }
 0x80c   :  { %v6039_v22 = vpop.eup %6038 }
 0x80d   :  { %v2865_v13 = vadd.f32 0.5, %v2864_v11  ;;  %v2876_v18 = vmul.f32 %v6037_v14, %v2858_v9  ;;  %v2873_v23 = vmul.f32 0.5, %v6039_v22 }
 0x80f   :  { %v2875_v16 = vmul.f32 %v2865_v13, %v6675_v60  ;;  %v2874_v29 = vadd.f32 0.5, %v2873_v23 }
 0x811   :  { %v6739_v54 = vadd.f32 %v2876_v18, %v2875_v16  ;;  %v3190_v16 = vld [vmem:[#allocation2 + $0x4] ss:$8 sm:$0xf] }
 0x813   :  { %6040 = vtanh.f32 %v6739_v54 }
 0x81d   :  { %v6041_v30 = vpop.eup %6040 }
 0x81e   :  { %v2879_v33 = vmul.f32 %v6041_v30, %v2874_v29 }
 0x820   :  { %5341 = vmatmul.mubr.msk.f32.vlgmr.msra.gmra.mrb[20].mxu1 %vm907_vm7, %v2879_v33  ;;  %5344 = vmatmul.mubr.msk.f32.vlgmr.msra.gmra.mrb[22].mxu0 %vm907_vm7, %v2879_v33 }
 0x821   :  { %5674 = vmatpush1.bf16.msk.msra.mxu1 %vm6438_vm6, %v6446_v25  ;;  %5680 = vmatpush1.bf16.msk.msra.mxu0 %vm6438_vm6, %v6451_v28 }
 0x822   :  { %3111 = vmatprep.mubr.f32.mxu1 %v6281_v0  ;;  %3182 = vmatprep.mubr.f32.mxu0 %v6281_v0 }
 0x823   :  { %5683 = vmatprep.subr.msk.bf16.mxu1 %vm6438_vm6, %v6456_v32  ;;  %5689 = vmatprep.subr.msk.bf16.mxu0 %vm6438_vm6, %v6464_v34 }
 0x8f3   :  { %v2949_v60 = vpop.f32.mrb[20].mxu1  ;;  %v3020_v35 = vpop.f32.mrb[22].mxu0 }
 0x8f4   :  { %v5829_v36 = vadd.f32 %v2949_v60, %v6557_v15  ;;  %v2951_v37 = vpop.f32.mrb[21].mxu1  ;;  %v3022_v38 = vpop.f32.mrb[23].mxu0  ;;  %v5831_v47 = vadd.f32 %v3020_v35, %v6563_v26 }
 0x8f5   :  { %v5830_v43 = vadd.f32 %v2951_v37, %v6560_v17  ;;  %v5832_v48 = vadd.f32 %v3022_v38, %v6568_v39 }
 0x8f6   :  { %v3025_v45 = vmul.f32 0.5, %v5829_v36 }
 0x8f7   :  { %v3029_v46 = vmul.f32 0.5, %v5830_v43  ;;  %v3034_v10 = vmul.f32 0.5, %v5832_v48 }
 0x8f8   :  { %6042 = vtanh.f32 %v3025_v45 }
 0x8f9   :  { %6044 = vtanh.f32 %v3029_v46 }
 0x8fa   :  { %6046 = vtanh.f32 %v5831_v47 }
 0x8fb   :  { %6048 = vtanh.f32 %v3034_v10 }
 0x902   :  { %v6043_v49 = vpop.eup %6042 }
 0x903   :  { %v6045_v5 = vpop.eup %6044  ;;  %v3027_v50 = vmul.f32 0.5, %v6043_v49 }
 0x904   :  { %v3031_v51 = vmul.f32 0.5, %v6045_v5  ;;  %v6047_v53 = vpop.eup %6046 }
 0x905   :  { %v3028_v52 = vadd.f32 0.5, %v3027_v50  ;;  %v6049_v59 = vpop.eup %6048 }
 0x906   :  { %v3032_v55 = vadd.f32 0.5, %v3031_v51  ;;  %v3036_v61 = vmul.f32 0.5, %v6049_v59 }
 0x907   :  { %v3039_v56 = vmul.f32 %v6047_v53, %v3028_v52 }
 0x908   :  { %v3038_v57 = vmul.f32 %v3032_v55, %v6699_v42  ;;  %v3037_v62 = vadd.f32 0.5, %v3036_v61 }
 0x90a   :  { %v6763_v58 = vadd.f32 %v3039_v56, %v3038_v57 }
 0x90c   :  { %6050 = vtanh.f32 %v6763_v58 }
 0x916   :  { %v6051_v63 = vpop.eup %6050 }
 0x917   :  { %v3042_v1 = vmul.f32 %v6051_v63, %v3037_v62 }
 0x919   :  { %3043 = vst.msk [vmem:[#allocation3 + $0x3] sm:$0x1] %vm110_vm1, %v3042_v1  ;;  %5347 = vmatmul.mubr.msk.f32.vlgmr.msra.gmra.mrb[24].mxu1 %vm907_vm7, %v3042_v1  ;;  %5350 = vmatmul.mubr.msk.f32.vlgmr.msra.gmra.mrb[26].mxu0 %vm907_vm7, %v3042_v1 }
 0x91a   :  { %5686 = vmatpush1.bf16.msk.msra.mxu1 %vm6438_vm6, %v6474_v40  ;;  %5692 = vmatpush1.bf16.msk.msra.mxu0 %vm6438_vm6, %v6476_v41 }
 0x91b   :  { %3255 = vmatprep.mubr.f32.mxu1 %v6281_v0  ;;  %3326 = vmatprep.mubr.f32.mxu0 %v6281_v0 }
 0x91c   :  { %5695 = vmatprep.subr.msk.bf16.mxu1 %vm6438_vm6, %v6492_v4  ;;  %5701 = vmatprep.subr.msk.bf16.mxu0 %vm6438_vm6, %v6499_v19 }
 0x91d   :  { %5353 = vmatmul.mubr.msk.f32.vlgmr.msra.gmra.mrb[26].mxu1 %vm907_vm7, %v2879_v33  ;;  %5356 = vmatmul.mubr.msk.f32.vlgmr.msra.gmra.mrb[28].mxu0 %vm907_vm7, %v2879_v33 }
 0x91e   :  { %5698 = vmatpush1.bf16.msk.msra.mxu1 %vm6438_vm6, %v6494_v12  ;;  %5704 = vmatpush1.bf16.msk.msra.mxu0 %vm6438_vm6, %v6501_v21 }
 0x91f   :  { %3455 = vmatprep.mubr.f32.mxu1 %v6281_v0  ;;  %3526 = vmatprep.mubr.f32.mxu0 %v6281_v0 }
 0x920   :  { %5707 = vmatprep.subr.msk.bf16.mxu1 %vm6438_vm6, %v6442_v20  ;;  %5713 = vmatprep.subr.msk.bf16.mxu0 %vm6438_vm6, %v6444_v24 }
 0x9f0   :  { %v3257_v42 = vpop.f32.mrb[26].mxu1  ;;  %v3328_v2 = vpop.f32.mrb[28].mxu0 }
 0x9f1   :  { %v3259_v44 = vpop.f32.mrb[27].mxu1  ;;  %v3330_v6 = vpop.f32.mrb[29].mxu0 }
 0x9f2   :  { %v3337_v7 = vcombine.low %v3257_v42, %v3259_v44  ;;  %v3338_v8 = vcombine.low %v3328_v2, %v3330_v6 }
 0x9f4   :  { %v3345_v9 = vrot.slane %v3337_v7, %v6525_v31  ;;  %v3352_v11 = vrot.slane %v3338_v8, %v6525_v31 }
 0x9f6   :  { %v3353_v13 = vcombine.low %v3345_v9, %v3352_v11 }
 0x9f8   :  { %v3360_v14 = vrot.slane %v3353_v13, %v6525_v31 }
 0x9fa   :  { %v3362_v18 = vadd.f32 %v3360_v14, %v3190_v16 }
 0x9fc   :  { %v3363_v22 = vmul.f32 0.5, %v3362_v18  ;;  %v3368_v23 = vrot.slane %v3362_v18, 1  ;;  %v3374_v30 = vrot.slane %v3362_v18, 2  ;;  %v3377_v33 = vrot.slane %v3362_v18, 3 }
 0x9fe   :  { %6052 = vtanh.f32 %v3363_v22  ;;  %v3370_v29 = vmul.f32 0.5, %v3368_v23  ;;  %v3379_v60 = vmul.f32 0.5, %v3377_v33 }
 0xa00   :  { %6054 = vtanh.f32 %v3370_v29 }
 0xa01   :  { %6056 = vtanh.f32 %v3374_v30 }
 0xa02   :  { %6058 = vtanh.f32 %v3379_v60 }
 0xa08   :  { %v6053_v35 = vpop.eup %6052 }
 0xa09   :  { %v3365_v36 = vmul.f32 0.5, %v6053_v35 }
 0xa0a   :  { %v6055_v37 = vpop.eup %6054 }
 0xa0b   :  { %v3366_v38 = vadd.f32 0.5, %v3365_v36  ;;  %v3372_v43 = vmul.f32 0.5, %v6055_v37  ;;  %v6057_v46 = vpop.eup %6056 }
 0xa0c   :  { %v6059_v49 = vpop.eup %6058 }
 0xa0d   :  { %v3373_v45 = vadd.f32 0.5, %v3372_v43  ;;  %v3384_v48 = vmul.f32 %v6057_v46, %v3366_v38  ;;  %v3381_v5 = vmul.f32 0.5, %v6059_v49 }
 0xa0f   :  { %v3383_v47 = vmul.f32 %v3373_v45, %v6739_v54  ;;  %v3382_v50 = vadd.f32 0.5, %v3381_v5 }
 0xa11   :  { %v6803_v10 = vadd.f32 %v3384_v48, %v3383_v47  ;;  %v3698_v47 = vld [vmem:[#allocation2 + $0x5] ss:$8 sm:$0xf] }
 0xa13   :  { %6060 = vtanh.f32 %v6803_v10 }
 0xa1d   :  { %v6061_v51 = vpop.eup %6060 }
 0xa1e   :  { %v3387_v52 = vmul.f32 %v6061_v51, %v3382_v50 }
 0xa20   :  { %5359 = vmatmul.mubr.msk.f32.vlgmr.msra.gmra.mrb[24].mxu1 %vm907_vm7, %v3387_v52  ;;  %5362 = vmatmul.mubr.msk.f32.vlgmr.msra.gmra.mrb[26].mxu0 %vm907_vm7, %v3387_v52 }
 0xa21   :  { %5710 = vmatpush1.bf16.msk.msra.mxu1 %vm6438_vm6, %v6446_v25  ;;  %5716 = vmatpush1.bf16.msk.msra.mxu0 %vm6438_vm6, %v6451_v28 }
 0xa22   :  { %3619 = vmatprep.mubr.f32.mxu1 %v6281_v0  ;;  %3690 = vmatprep.mubr.f32.mxu0 %v6281_v0 }
 0xa23   :  { %5719 = vmatprep.subr.msk.bf16.mxu1 %vm6438_vm6, %v6456_v32  ;;  %5725 = vmatprep.subr.msk.bf16.mxu0 %vm6438_vm6, %v6464_v34 }
 0xaf3   :  { %v3457_v54 = vpop.f32.mrb[24].mxu1  ;;  %v3528_v53 = vpop.f32.mrb[26].mxu0 }
 0xaf4   :  { %v5833_v55 = vadd.f32 %v3457_v54, %v6557_v15  ;;  %v3459_v56 = vpop.f32.mrb[25].mxu1  ;;  %v3530_v57 = vpop.f32.mrb[27].mxu0  ;;  %v5835_v63 = vadd.f32 %v3528_v53, %v6563_v26 }
 0xaf5   :  { %v5834_v59 = vadd.f32 %v3459_v56, %v6560_v17  ;;  %v5836_v1 = vadd.f32 %v3530_v57, %v6568_v39 }
 0xaf6   :  { %v3533_v61 = vmul.f32 0.5, %v5833_v55 }
 0xaf7   :  { %v3537_v62 = vmul.f32 0.5, %v5834_v59  ;;  %v3542_v42 = vmul.f32 0.5, %v5836_v1 }
 0xaf8   :  { %6062 = vtanh.f32 %v3533_v61 }
 0xaf9   :  { %6064 = vtanh.f32 %v3537_v62 }
 0xafa   :  { %6066 = vtanh.f32 %v5835_v63 }
 0xafb   :  { %6068 = vtanh.f32 %v3542_v42 }
 0xb02   :  { %v6063_v2 = vpop.eup %6062 }
 0xb03   :  { %v6065_v44 = vpop.eup %6064  ;;  %v3535_v6 = vmul.f32 0.5, %v6063_v2 }
 0xb04   :  { %v3539_v7 = vmul.f32 0.5, %v6065_v44  ;;  %v6067_v9 = vpop.eup %6066 }
 0xb05   :  { %v3536_v8 = vadd.f32 0.5, %v3535_v6  ;;  %v6069_v18 = vpop.eup %6068 }
 0xb06   :  { %v3540_v11 = vadd.f32 0.5, %v3539_v7  ;;  %v3544_v22 = vmul.f32 0.5, %v6069_v18 }
 0xb07   :  { %v3547_v13 = vmul.f32 %v6067_v9, %v3536_v8 }
 0xb08   :  { %v3546_v14 = vmul.f32 %v3540_v11, %v6763_v58  ;;  %v3545_v23 = vadd.f32 0.5, %v3544_v22 }
 0xb0a   :  { %v6827_v16 = vadd.f32 %v3547_v13, %v3546_v14 }
 0xb0c   :  { %6070 = vtanh.f32 %v6827_v16 }
 0xb16   :  { %v6071_v29 = vpop.eup %6070 }
 0xb17   :  { %v3550_v30 = vmul.f32 %v6071_v29, %v3545_v23 }
 0xb19   :  { %3551 = vst.msk [vmem:[#allocation3 + $0x4] sm:$0x1] %vm110_vm1, %v3550_v30  ;;  %5365 = vmatmul.mubr.msk.f32.vlgmr.msra.gmra.mrb[28].mxu1 %vm907_vm7, %v3550_v30  ;;  %5368 = vmatmul.mubr.msk.f32.vlgmr.msra.gmra.mrb[30].mxu0 %vm907_vm7, %v3550_v30 }
 0xb1a   :  { %5722 = vmatpush1.bf16.msk.msra.mxu1 %vm6438_vm6, %v6474_v40  ;;  %5728 = vmatpush1.bf16.msk.msra.mxu0 %vm6438_vm6, %v6476_v41 }
 0xb1b   :  { %3763 = vmatprep.mubr.f32.mxu1 %v6281_v0  ;;  %3834 = vmatprep.mubr.f32.mxu0 %v6281_v0 }
 0xb1c   :  { %5731 = vmatprep.subr.msk.bf16.mxu1 %vm6438_vm6, %v6492_v4  ;;  %5737 = vmatprep.subr.msk.bf16.mxu0 %vm6438_vm6, %v6499_v19 }
 0xb1d   :  { %5371 = vmatmul.mubr.msk.f32.vlgmr.msra.gmra.mrb[30].mxu1 %vm907_vm7, %v3387_v52  ;;  %5374 = vmatmul.mubr.msk.f32.vlgmr.msra.gmra.mrb[32].mxu0 %vm907_vm7, %v3387_v52 }
 0xb1e   :  { %5734 = vmatpush1.bf16.msk.msra.mxu1 %vm6438_vm6, %v6494_v12  ;;  %5740 = vmatpush1.bf16.msk.msra.mxu0 %vm6438_vm6, %v6501_v21 }
 0xb1f   :  { %3963 = vmatprep.mubr.f32.mxu1 %v6281_v0  ;;  %4034 = vmatprep.mubr.f32.mxu0 %v6281_v0 }
 0xb20   :  { %5743 = vmatprep.subr.msk.bf16.mxu1 %vm6438_vm6, %v6442_v20  ;;  %5749 = vmatprep.subr.msk.bf16.mxu0 %vm6438_vm6, %v6444_v24 }
 0xbf0   :  { %v3765_v58 = vpop.f32.mrb[30].mxu1  ;;  %v3836_v33 = vpop.f32.mrb[32].mxu0 }
 0xbf1   :  { %v3767_v60 = vpop.f32.mrb[31].mxu1  ;;  %v3838_v35 = vpop.f32.mrb[33].mxu0 }
 0xbf2   :  { %v3845_v36 = vcombine.low %v3765_v58, %v3767_v60  ;;  %v3846_v37 = vcombine.low %v3836_v33, %v3838_v35 }
 0xbf4   :  { %v3853_v38 = vrot.slane %v3845_v36, %v6525_v31  ;;  %v3860_v43 = vrot.slane %v3846_v37, %v6525_v31 }
 0xbf6   :  { %v3861_v45 = vcombine.low %v3853_v38, %v3860_v43 }
 0xbf8   :  { %v3868_v46 = vrot.slane %v3861_v45, %v6525_v31 }
 0xbfa   :  { %v3870_v48 = vadd.f32 %v3868_v46, %v3698_v47 }
 0xbfc   :  { %v3871_v49 = vmul.f32 0.5, %v3870_v48  ;;  %v3876_v5 = vrot.slane %v3870_v48, 1  ;;  %v3882_v51 = vrot.slane %v3870_v48, 2  ;;  %v3885_v52 = vrot.slane %v3870_v48, 3 }
 0xbfe   :  { %6072 = vtanh.f32 %v3871_v49  ;;  %v3878_v50 = vmul.f32 0.5, %v3876_v5  ;;  %v3887_v54 = vmul.f32 0.5, %v3885_v52 }
 0xc00   :  { %6074 = vtanh.f32 %v3878_v50 }
 0xc01   :  { %6076 = vtanh.f32 %v3882_v51 }
 0xc02   :  { %6078 = vtanh.f32 %v3887_v54 }
 0xc08   :  { %v6073_v53 = vpop.eup %6072 }
 0xc09   :  { %v3873_v55 = vmul.f32 0.5, %v6073_v53 }
 0xc0a   :  { %v6075_v56 = vpop.eup %6074 }
 0xc0b   :  { %v3874_v57 = vadd.f32 0.5, %v3873_v55  ;;  %v3880_v59 = vmul.f32 0.5, %v6075_v56  ;;  %v6077_v62 = vpop.eup %6076 }
 0xc0c   :  { %v6079_v2 = vpop.eup %6078 }
 0xc0d   :  { %v3881_v61 = vadd.f32 0.5, %v3880_v59  ;;  %v3892_v1 = vmul.f32 %v6077_v62, %v3874_v57  ;;  %v3889_v44 = vmul.f32 0.5, %v6079_v2 }
 0xc0f   :  { %v3891_v63 = vmul.f32 %v3881_v61, %v6803_v10  ;;  %v3890_v6 = vadd.f32 0.5, %v3889_v44 }
 0xc11   :  { %v6867_v42 = vadd.f32 %v3892_v1, %v3891_v63  ;;  %v4206_v63 = vld [vmem:[#allocation2 + $0x6] ss:$8 sm:$0xf] }
 0xc13   :  { %6080 = vtanh.f32 %v6867_v42 }
 0xc1d   :  { %v6081_v7 = vpop.eup %6080 }
 0xc1e   :  { %v3895_v8 = vmul.f32 %v6081_v7, %v3890_v6 }
 0xc20   :  { %5377 = vmatmul.mubr.msk.f32.vlgmr.msra.gmra.mrb[28].mxu1 %vm907_vm7, %v3895_v8  ;;  %5380 = vmatmul.mubr.msk.f32.vlgmr.msra.gmra.mrb[30].mxu0 %vm907_vm7, %v3895_v8 }
 0xc21   :  { %5746 = vmatpush1.bf16.msk.msra.mxu1 %vm6438_vm6, %v6446_v25  ;;  %5752 = vmatpush1.bf16.msk.msra.mxu0 %vm6438_vm6, %v6451_v28 }
 0xc22   :  { %4127 = vmatprep.mubr.f32.mxu1 %v6281_v0  ;;  %4198 = vmatprep.mubr.f32.mxu0 %v6281_v0 }
 0xc23   :  { %5755 = vmatprep.subr.msk.bf16.mxu1 %vm6438_vm6, %v6456_v32  ;;  %5761 = vmatprep.subr.msk.bf16.mxu0 %vm6438_vm6, %v6464_v34 }
 0xcf3   :  { %v3965_v10 = vpop.f32.mrb[28].mxu1  ;;  %v4036_v9 = vpop.f32.mrb[30].mxu0 }
 0xcf4   :  { %v5837_v11 = vadd.f32 %v3965_v10, %v6557_v15  ;;  %v3967_v13 = vpop.f32.mrb[29].mxu1  ;;  %v4038_v14 = vpop.f32.mrb[31].mxu0  ;;  %v5839_v29 = vadd.f32 %v4036_v9, %v6563_v26 }
 0xcf5   :  { %v5838_v18 = vadd.f32 %v3967_v13, %v6560_v17  ;;  %v5840_v30 = vadd.f32 %v4038_v14, %v6568_v39 }
 0xcf6   :  { %v4041_v22 = vmul.f32 0.5, %v5837_v11 }
 0xcf7   :  { %v4045_v23 = vmul.f32 0.5, %v5838_v18  ;;  %v4050_v58 = vmul.f32 0.5, %v5840_v30 }
 0xcf8   :  { %6082 = vtanh.f32 %v4041_v22 }
 0xcf9   :  { %6084 = vtanh.f32 %v4045_v23 }
 0xcfa   :  { %6086 = vtanh.f32 %v5839_v29 }
 0xcfb   :  { %6088 = vtanh.f32 %v4050_v58 }
 0xd02   :  { %v6083_v33 = vpop.eup %6082 }
 0xd03   :  { %v6085_v60 = vpop.eup %6084  ;;  %v4043_v35 = vmul.f32 0.5, %v6083_v33 }
 0xd04   :  { %v4047_v36 = vmul.f32 0.5, %v6085_v60  ;;  %v6087_v38 = vpop.eup %6086 }
 0xd05   :  { %v4044_v37 = vadd.f32 0.5, %v4043_v35  ;;  %v6089_v48 = vpop.eup %6088 }
 0xd06   :  { %v4048_v43 = vadd.f32 0.5, %v4047_v36  ;;  %v4052_v49 = vmul.f32 0.5, %v6089_v48 }
 0xd07   :  { %v4055_v45 = vmul.f32 %v6087_v38, %v4044_v37 }
 0xd08   :  { %v4054_v46 = vmul.f32 %v4048_v43, %v6827_v16  ;;  %v4053_v5 = vadd.f32 0.5, %v4052_v49 }
 0xd0a   :  { %v6891_v47 = vadd.f32 %v4055_v45, %v4054_v46 }
 0xd0c   :  { %6090 = vtanh.f32 %v6891_v47 }
 0xd16   :  { %v6091_v50 = vpop.eup %6090 }
 0xd17   :  { %v4058_v51 = vmul.f32 %v6091_v50, %v4053_v5 }
 0xd19   :  { %4059 = vst.msk [vmem:[#allocation3 + $0x5] sm:$0x1] %vm110_vm1, %v4058_v51  ;;  %5383 = vmatmul.mubr.msk.f32.vlgmr.msra.gmra.mrb[32].mxu1 %vm907_vm7, %v4058_v51  ;;  %5386 = vmatmul.mubr.msk.f32.vlgmr.msra.gmra.mrb[34].mxu0 %vm907_vm7, %v4058_v51 }
 0xd1a   :  { %5758 = vmatpush1.bf16.msk.msra.mxu1 %vm6438_vm6, %v6474_v40  ;;  %5764 = vmatpush1.bf16.msk.msra.mxu0 %vm6438_vm6, %v6476_v41 }
 0xd1b   :  { %4271 = vmatprep.mubr.f32.mxu1 %v6281_v0  ;;  %4342 = vmatprep.mubr.f32.mxu0 %v6281_v0 }
 0xd1c   :  { %5767 = vmatprep.subr.msk.bf16.mxu1 %vm6438_vm6, %v6492_v4  ;;  %5773 = vmatprep.subr.msk.bf16.mxu0 %vm6438_vm6, %v6499_v19 }
 0xd1d   :  { %5389 = vmatmul.mubr.msk.f32.vlgmr.msra.gmra.mrb[34].mxu1 %vm907_vm7, %v3895_v8  ;;  %5392 = vmatmul.mubr.msk.f32.vlgmr.msra.gmra.mrb[36].mxu0 %vm907_vm7, %v3895_v8 }
 0xd1e   :  { %5770 = vmatpush1.bf16.msk.msra.mxu1 %vm6438_vm6, %v6494_v12  ;;  %5776 = vmatpush1.bf16.msk.msra.mxu0 %vm6438_vm6, %v6501_v21 }
 0xd1f   :  { %4471 = vmatprep.mubr.f32.mxu1 %v6281_v0  ;;  %4542 = vmatprep.mubr.f32.mxu0 %v6281_v0 }
 0xd20   :  { %5779 = vmatprep.subr.msk.bf16.mxu1 %vm6438_vm6, %v6442_v20  ;;  %5785 = vmatprep.subr.msk.bf16.mxu0 %vm6438_vm6, %v6444_v24 }
 0xdf0   :  { %v4273_v16 = vpop.f32.mrb[34].mxu1  ;;  %v4344_v52 = vpop.f32.mrb[36].mxu0 }
 0xdf1   :  { %v4275_v54 = vpop.f32.mrb[35].mxu1  ;;  %v4346_v53 = vpop.f32.mrb[37].mxu0 }
 0xdf2   :  { %v4353_v55 = vcombine.low %v4273_v16, %v4275_v54  ;;  %v4354_v56 = vcombine.low %v4344_v52, %v4346_v53 }
 0xdf4   :  { %v4361_v57 = vrot.slane %v4353_v55, %v6525_v31  ;;  %v4368_v59 = vrot.slane %v4354_v56, %v6525_v31 }
 0xdf6   :  { %v4369_v61 = vcombine.low %v4361_v57, %v4368_v59 }
 0xdf8   :  { %v4376_v62 = vrot.slane %v4369_v61, %v6525_v31 }
 0xdfa   :  { %v4378_v1 = vadd.f32 %v4376_v62, %v4206_v63 }
 0xdfc   :  { %v4379_v20 = vmul.f32 0.5, %v4378_v1  ;;  %v4384_v2 = vrot.slane %v4378_v1, 1  ;;  %v4390_v24 = vrot.slane %v4378_v1, 2  ;;  %v4393_v6 = vrot.slane %v4378_v1, 3 }
 0xdfe   :  { %6092 = vtanh.f32 %v4379_v20  ;;  %v4386_v44 = vmul.f32 0.5, %v4384_v2  ;;  %v4395_v7 = vmul.f32 0.5, %v4393_v6 }
 0xe00   :  { %6094 = vtanh.f32 %v4386_v44  ;;  %v4714_v44 = vld [vmem:[#allocation2 + $0x7] ss:$8 sm:$0xf] }
 0xe01   :  { %6096 = vtanh.f32 %v4390_v24 }
 0xe02   :  { %6098 = vtanh.f32 %v4395_v7 }
 0xe08   :  { %v6093_v8 = vpop.eup %6092 }
 0xe09   :  { %v4381_v10 = vmul.f32 0.5, %v6093_v8 }
 0xe0a   :  { %v6095_v9 = vpop.eup %6094 }
 0xe0b   :  { %v4382_v11 = vadd.f32 0.5, %v4381_v10  ;;  %v4388_v13 = vmul.f32 0.5, %v6095_v9  ;;  %v6097_v18 = vpop.eup %6096 }
 0xe0c   :  { %v6099_v30 = vpop.eup %6098 }
 0xe0d   :  { %v4389_v14 = vadd.f32 0.5, %v4388_v13  ;;  %v4400_v23 = vmul.f32 %v6097_v18, %v4382_v11  ;;  %v4397_v58 = vmul.f32 0.5, %v6099_v30 }
 0xe0f   :  { %v4399_v22 = vmul.f32 %v4389_v14, %v6867_v42  ;;  %v4398_v33 = vadd.f32 0.5, %v4397_v58 }
 0xe11   :  { %v6931_v29 = vadd.f32 %v4400_v23, %v4399_v22 }
 0xe13   :  { %6100 = vtanh.f32 %v6931_v29 }
 0xe1d   :  { %v6101_v60 = vpop.eup %6100 }
 0xe1e   :  { %v4403_v35 = vmul.f32 %v6101_v60, %v4398_v33 }
 0xe20   :  { %5395 = vmatmul.mubr.msk.f32.vlgmr.msra.gmra.mrb[32].mxu1 %vm907_vm7, %v4403_v35  ;;  %5398 = vmatmul.mubr.msk.f32.vlgmr.msra.gmra.mrb[34].mxu0 %vm907_vm7, %v4403_v35 }
 0xe21   :  { %5782 = vmatpush1.bf16.msk.msra.mxu1 %vm6438_vm6, %v6446_v25  ;;  %5788 = vmatpush1.bf16.msk.msra.mxu0 %vm6438_vm6, %v6451_v28 }
 0xe22   :  { %4635 = vmatprep.mubr.f32.mxu1 %v6281_v0  ;;  %4706 = vmatprep.mubr.f32.mxu0 %v6281_v0 }
 0xe23   :  { %5791 = vmatprep.subr.msk.bf16.mxu1 %vm6438_vm6, %v6456_v32  ;;  %5797 = vmatprep.subr.msk.bf16.mxu0 %vm6438_vm6, %v6464_v34 }
 0xef3   :  { %v4473_v42 = vpop.f32.mrb[32].mxu1  ;;  %v4544_v36 = vpop.f32.mrb[34].mxu0 }
 0xef4   :  { %v5841_v25 = vadd.f32 %v4473_v42, %v6557_v15  ;;  %v4475_v37 = vpop.f32.mrb[33].mxu1  ;;  %v4546_v38 = vpop.f32.mrb[35].mxu0  ;;  %v5843_v46 = vadd.f32 %v4544_v36, %v6563_v26 }
 0xef5   :  { %v5842_v28 = vadd.f32 %v4475_v37, %v6560_v17  ;;  %v5844_v32 = vadd.f32 %v4546_v38, %v6568_v39  ;;  %v5082_v37 = vld [vmem:[%s7042_s9 + $0x8] sm:$0xf]  ;;  %v6288_v38 = vmov 0.0|0.0  }
 0xef6   :  { %v4549_v43 = vmul.f32 0.5, %v5841_v25 }
 0xef7   :  { %v4553_v45 = vmul.f32 0.5, %v5842_v28  ;;  %v4558_v48 = vmul.f32 0.5, %v5844_v32 }
 0xef8   :  { %6102 = vtanh.f32 %v4549_v43 }
 0xef9   :  { %6104 = vtanh.f32 %v4553_v45 }
 0xefa   :  { %6106 = vtanh.f32 %v5843_v46 }
 0xefb   :  { %6108 = vtanh.f32 %v4558_v48 }
 0xf02   :  { %v6103_v49 = vpop.eup %6102 }
 0xf03   :  { %v6105_v34 = vpop.eup %6104  ;;  %v4551_v5 = vmul.f32 0.5, %v6103_v49 }
 0xf04   :  { %v4555_v50 = vmul.f32 0.5, %v6105_v34  ;;  %v6107_v16 = vpop.eup %6106 }
 0xf05   :  { %v4552_v51 = vadd.f32 0.5, %v4551_v5  ;;  %v6109_v56 = vpop.eup %6108 }
 0xf06   :  { %v4556_v52 = vadd.f32 0.5, %v4555_v50  ;;  %v4560_v57 = vmul.f32 0.5, %v6109_v56 }
 0xf07   :  { %v4563_v54 = vmul.f32 %v6107_v16, %v4552_v51 }
 0xf08   :  { %v4562_v53 = vmul.f32 %v4556_v52, %v6891_v47  ;;  %v4561_v59 = vadd.f32 0.5, %v4560_v57 }
 0xf0a   :  { %v6955_v55 = vadd.f32 %v4563_v54, %v4562_v53 }
 0xf0c   :  { %6110 = vtanh.f32 %v6955_v55 }
 0xf16   :  { %v6111_v61 = vpop.eup %6110 }
 0xf17   :  { %v4566_v62 = vmul.f32 %v6111_v61, %v4561_v59 }
 0xf19   :  { %4567 = vst.msk [vmem:[#allocation3 + $0x6] sm:$0x1] %vm110_vm1, %v4566_v62  ;;  %5401 = vmatmul.mubr.msk.f32.vlgmr.msra.gmra.mrb[36].mxu1 %vm907_vm7, %v4566_v62  ;;  %5404 = vmatmul.mubr.msk.f32.vlgmr.msra.gmra.mrb[38].mxu0 %vm907_vm7, %v4566_v62 }
 0xf1a   :  { %5794 = vmatpush1.bf16.msk.msra.mxu1 %vm6438_vm6, %v6474_v40  ;;  %5800 = vmatpush1.bf16.msk.msra.mxu0 %vm6438_vm6, %v6476_v41 }
 0xf1b   :  { %4779 = vmatprep.mubr.f32.mxu1 %v6281_v0  ;;  %4850 = vmatprep.mubr.f32.mxu0 %v6281_v0 }
 0xf1c   :  { %5803 = vmatprep.subr.msk.bf16.mxu1 %vm6438_vm6, %v6492_v4  ;;  %5809 = vmatprep.subr.msk.bf16.mxu0 %vm6438_vm6, %v6499_v19 }
 0xf1d   :  { %5407 = vmatmul.mubr.msk.f32.vlgmr.msra.gmra.mrb[38].mxu1 %vm907_vm7, %v4403_v35  ;;  %5410 = vmatmul.mubr.msk.f32.vlgmr.msra.gmra.mrb[40].mxu0 %vm907_vm7, %v4403_v35 }
 0xf1e   :  { %5806 = vmatpush1.bf16.msk.msra.mxu1 %vm6438_vm6, %v6494_v12  ;;  %5812 = vmatpush1.bf16.msk.msra.mxu0 %vm6438_vm6, %v6501_v21 }
 0xf1f   :  { %4979 = vmatprep.mubr.f32.mxu1 %v6281_v0  ;;  %5050 = vmatprep.mubr.f32.mxu0 %v6281_v0 }
 0xf20   :  { %5813 = vmatprep.subr.bf16.mxu1 %v6288_v38 }
 0xff0   :  { %v4781_v40 = vpop.f32.mrb[38].mxu1  ;;  %v4852_v41 = vpop.f32.mrb[40].mxu0 }
 0xff1   :  { %v4783_v4 = vpop.f32.mrb[39].mxu1  ;;  %v4854_v19 = vpop.f32.mrb[41].mxu0 }
 0xff2   :  { %v4861_v47 = vcombine.low %v4781_v40, %v4783_v4  ;;  %v4862_v63 = vcombine.low %v4852_v41, %v4854_v19 }
 0xff4   :  { %v4869_v1 = vrot.slane %v4861_v47, %v6525_v31  ;;  %v4876_v20 = vrot.slane %v4862_v63, %v6525_v31  ;;  %v5171_v47 = vld [vmem:[%s7034_s1] sm:$0xff] }
 0xff6   :  { %v4877_v2 = vcombine.low %v4869_v1, %v4876_v20 }
 0xff8   :  { %v4884_v12 = vrot.slane %v4877_v2, %v6525_v31 }
 0xffa   :  { %v4886_v24 = vadd.f32 %v4884_v12, %v4714_v44 }
 0xffc   :  { %v4887_v21 = vmul.f32 0.5, %v4886_v24  ;;  %v4892_v6 = vrot.slane %v4886_v24, 1  ;;  %v4898_v8 = vrot.slane %v4886_v24, 2  ;;  %v4901_v10 = vrot.slane %v4886_v24, 3 }
 0xffe   :  { %6112 = vtanh.f32 %v4887_v21  ;;  %v4894_v7 = vmul.f32 0.5, %v4892_v6  ;;  %v4903_v9 = vmul.f32 0.5, %v4901_v10 }
0x1000   :  { %6114 = vtanh.f32 %v4894_v7 }
0x1001   :  { %6116 = vtanh.f32 %v4898_v8 }
0x1002   :  { %6118 = vtanh.f32 %v4903_v9 }
0x1008   :  { %v6113_v11 = vpop.eup %6112 }
0x1009   :  { %v4889_v13 = vmul.f32 0.5, %v6113_v11 }
0x100a   :  { %v6115_v14 = vpop.eup %6114 }
0x100b   :  { %v4890_v18 = vadd.f32 0.5, %v4889_v13  ;;  %v4896_v22 = vmul.f32 0.5, %v6115_v14  ;;  %v6117_v30 = vpop.eup %6116 }
0x100c   :  { %v6119_v60 = vpop.eup %6118 }
0x100d   :  { %v4897_v23 = vadd.f32 0.5, %v4896_v22  ;;  %v4908_v58 = vmul.f32 %v6117_v30, %v4890_v18  ;;  %v4905_v35 = vmul.f32 0.5, %v6119_v60 }
0x100f   :  { %v4907_v31 = vmul.f32 %v4897_v23, %v6931_v29  ;;  %v4906_v42 = vadd.f32 0.5, %v4905_v35  ;;  %v5081_v29 = vld [vmem:[%s7042_s9] sm:$0xff] }
0x1010   :  { %v5814_v28 = vpack.c.bf16 %v5082_v37, %v5081_v29 }
0x1011   :  { %v4909_v33 = vadd.f32 %v4908_v58, %v4907_v31 }
0x1013   :  { %5077 = vst.msk [vmem:[#allocation5] sm:$0x1] %vm110_vm1, %v4909_v33  ;;  %6120 = vtanh.f32 %v4909_v33 }
0x101d   :  { %v6121_v36 = vpop.eup %6120 }
0x101e   :  { %v4911_v25 = vmul.f32 %v6121_v36, %v4906_v42 }
0x1020   :  { %5413 = vmatmul.mubr.msk.f32.vlgmr.msra.gmra.mrb[36].mxu1 %vm907_vm7, %v4911_v25  ;;  %5076 = vst.msk [vmem:[#allocation4] sm:$0x1] %vm110_vm1, %v4911_v25  ;;  %5416 = vmatmul.mubr.msk.f32.vlgmr.msra.gmra.mrb[38].mxu0 %vm907_vm7, %v4911_v25 }
0x1021   :  { %5522 = vmatprep.mubr.msk.f32.mxu1 %vm6282_vm0, %v6281_v0  ;;  %5816 = vmatpush3.bf16.msk.msra.mxu1 %vm6438_vm6, %v5814_v28 }
0x10f3   :  { %v4981_v43 = vpop.f32.mrb[36].mxu1  ;;  %v5052_v45 = vpop.f32.mrb[38].mxu0 }
0x10f4   :  { %v5845_v46 = vadd.f32 %v4981_v43, %v6557_v15  ;;  %v4983_v32 = vpop.f32.mrb[37].mxu1  ;;  %v5054_v0 = vpop.f32.mrb[39].mxu0  ;;  %v5847_v5 = vadd.f32 %v5052_v45, %v6563_v26 }
0x10f5   :  { %v5846_v48 = vadd.f32 %v4983_v32, %v6560_v17  ;;  %v5848_v50 = vadd.f32 %v5054_v0, %v6568_v39 }
0x10f6   :  { %v5057_v49 = vmul.f32 0.5, %v5845_v46 }
0x10f7   :  { %v5061_v34 = vmul.f32 0.5, %v5846_v48  ;;  %v5066_v51 = vmul.f32 0.5, %v5848_v50 }
0x10f8   :  { %6122 = vtanh.f32 %v5057_v49 }
0x10f9   :  { %6124 = vtanh.f32 %v5061_v34 }
0x10fa   :  { %6126 = vtanh.f32 %v5847_v5 }
0x10fb   :  { %6128 = vtanh.f32 %v5066_v51 }
0x1102   :  { %v6123_v3 = vpop.eup %6122 }
0x1103   :  { %v6125_v16 = vpop.eup %6124  ;;  %v5059_v52 = vmul.f32 0.5, %v6123_v3 }
0x1104   :  { %v5063_v54 = vmul.f32 0.5, %v6125_v16  ;;  %v6127_v53 = vpop.eup %6126 }
0x1105   :  { %v5060_v15 = vadd.f32 0.5, %v5059_v52  ;;  %v6129_v26 = vpop.eup %6128 }
0x1106   :  { %v5064_v56 = vadd.f32 0.5, %v5063_v54  ;;  %v5068_v61 = vmul.f32 0.5, %v6129_v26 }
0x1107   :  { %v5071_v57 = vmul.f32 %v6127_v53, %v5060_v15 }
0x1108   :  { %v5070_v17 = vmul.f32 %v5064_v56, %v6955_v55  ;;  %v5069_v62 = vadd.f32 0.5, %v5068_v61  ;;  %v5417_v55 = vld [vmem:[%s7043_s10] ss:$0 sm:$0xff]  ;;  %s6242_s10 = scalar_lea.vmem %s5188_s17, 128 }
0x1109   :  { %p6243_p12 = scmp.ne.s32.totalorder %s5188_s17, %s6242_s10  ;;  %p6248_p0 = scmp.lt.s32.totalorder %s6242_s10, %s6242_s10 }
0x110a   :  { %v5072_v59 = vadd.f32 %v5071_v57, %v5070_v17 }
0x110b   :  { %p6249_p1 = por %p6248_p0, %p6247_p13 }
0x110c   :  { %6130 = vtanh.f32 %v5072_v59  ;;  %5079 = vst.msk [vmem:[#allocation7] sm:$0x1] %vm110_vm1, %v5072_v59 }
0x110d   :  { %p6250_p2 = pnand %p6249_p1, %p6243_p12 }
0x1116   :  { %v6131_v39 = vpop.eup %6130 }
0x1117   :  { %v5074_v40 = vmul.f32 %v6131_v39, %v5069_v62 }
0x1119   :  { %5075 = vst.msk [vmem:[#allocation3 + $0x7] sm:$0x1] %vm110_vm1, %v5074_v40  ;;  %5078 = vst.msk [vmem:[#allocation6] sm:$0x1] %vm110_vm1, %v5074_v40 }
0x1120   :  { %v5080_v41 = vld [vmem:[#allocation3] sm:$0xff] }
0x1121   :  { %5523 = vmatmul.mubr.msk.f32.vlgmr.msra.gmra.mrb[40].mxu1 %vm907_vm7, %v5080_v41 }
0x11f4   :  { %v5162_v4 = vpop.f32.mrb[40].mxu1 }
0x11f5   :  { %v5163_v19 = vadd.f32 %v5417_v55, %v5162_v4  ;;  %v5524_v63 = vpop.f32.mrb[41].mxu1 }
0x11f7   :  { %v5173_v1 = vsel %vm5172_vm8, %v5163_v19, 0.0 }
0x11f8   :  { %v5174_v20 = vadd.f32 %v5173_v1, %v5171_v47 }
0x11fa   :  { %5176 = vrot.lane.b32.xlu1 %v5174_v20, %s6289_s14 }
0x126c   :  { %v5177_v2 = vpop.permute.xlu1 %5176 }
0x126d   :  { %v5179_v12 = vsel %vm249_vm3, %v5163_v19, %v5177_v2 }
0x126e   :  { %5180 = vst.msk [vmem:[#allocation17] sm:$0xff] %vm907_vm7, %v5179_v12 }
0x126f   :  { %6253 = shalt.err (!%p6250_p2)
}
0x1270   :  { %s6254_s13 = scalar_lea.hbm %s7044_s11, 128 }
0x1271   :  { %p6255_p3 = scmp.ne.s32.totalorder %s7044_s11, %s6254_s13  ;;  %p6258_p4 = scmp.lt.u32.totalorder %s6254_s13, %s7044_s11 }
0x1273   :  { %p6260_p5 = pnand %p6258_p4, %p6255_p3 }
0x1275   :  { %6263 = shalt.err (!%p6260_p5)
}
0x1276   :  { %5190 = dma.vmem_to_hbm [thread:$0]  %s5188_s17, 128, %s7044_s11, [#allocation10]  }
0x1277   :  { %6270 = dma.done.wait [#allocation10], 128  }
0x1278   :  { %6271 = vsyncadd [#allocation10], 4294967168 }
0x1279   :  { %5194 = vsyncpa [#allocation9], 1 }
0x127a   :  { %5195 = vsyncpa [#allocation12], 1 }
0x127b   :  { %5196 = vsyncpa [#allocation15], 1 }
0x127c   :  { %5197 = vsyncpa [#allocation10], 1 }

</bundles_post_ra>
